<compile_context>
chip_gen: v7x
topology: tpu7x:2x2x1
jax: 0.10.0
libtpu: 0.0.40
codegen_flags: <defaults>
</compile_context>

<pallas_src>
import functools
import math

import jax
import jax.numpy as jnp
from jax import lax
from jax.experimental import pallas as pl
from jax.experimental.pallas import tpu as pltpu

TILE_ROWS = 1024                      # max rows of the patch matrix per grid step
VMEM_LIMIT_BYTES = 48 * 1024 * 1024   # <= v7x 64 MiB physical; > default 32 MiB


def _round_up(x, m):
    return ((x + m - 1) // m) * m


def _compiler_params():
    return pltpu.CompilerParams(
        dimension_semantics=("parallel",),
        vmem_limit_bytes=VMEM_LIMIT_BYTES,
    )


def _pick_tile(rows):
    """Largest row tile <= TILE_ROWS, but >= 2 grid steps whenever rows allow
    it so dimension_semantics=('parallel',) actually feeds both v7x cores."""
    if rows <= 8:
        return rows
    half = _round_up(-(-rows // 2), 8)          # cdiv(rows, 2) rounded to sublanes
    return min(TILE_ROWS, half, rows)


# ----------------------------- stem conv kernel ---------------------------- #
def _conv_kernel(x_ref, w_ref, b_ref, o_ref, *, relu):
    # x: (tile_r, K) bf16, w: (K, Cout) bf16, b: (1, Cout) f32
    acc = jnp.dot(x_ref[...], w_ref[...], preferred_element_type=jnp.float32)
    acc = acc + b_ref[...]
    if relu:
        acc = jnp.maximum(acc, 0.0)
    o_ref[...] = acc.astype(o_ref.dtype)


def conv_call(patches, w_mat, b_row, *, relu, out_dtype):
    rows, k = patches.shape
    cout = w_mat.shape[1]
    tile_r = _pick_tile(rows)
    return pl.pallas_call(
        functools.partial(_conv_kernel, relu=relu),
        out_shape=jax.ShapeDtypeStruct((rows, cout), out_dtype),
        grid=(pl.cdiv(rows, tile_r),),
        in_specs=[
            pl.BlockSpec((tile_r, k), lambda i: (i, 0)),
            pl.BlockSpec((k, cout), lambda i: (0, 0)),     # grid-invariant
            pl.BlockSpec((1, cout), lambda i: (0, 0)),     # grid-invariant
        ],
        out_specs=pl.BlockSpec((tile_r, cout), lambda i: (i, 0)),
        compiler_params=_compiler_params(),
    )(patches, w_mat, b_row)


# --------------------- fused tail kernel (conv3 + res1 + res2) ------------- #
def _tail_kernel(x_ref, mask_ref, b3_ref, w3_ref, w3a_ref, w1a_ref,
                 w3b_ref, w1b_ref, o_ref, xb, *, H, W):
    # x_ref : (1, H*W, 128) bf16   compact conv2 output rows for this image
    # mask  : (Rp, 1) f32          1 on interior rows of the padded-flat layout
    # w3    : (9, 128, 128) bf16   conv3 per-tap weights; b3: (1,128) f32
    # w3a/b : (9, 128, 128) bf16   residual 3x3 per-tap weights (Cout 32->128 pad)
    # w1a/b : (128, 128) bf16      residual 1x1 weights (K 32->128 pad)
    # o_ref : (1, H*W, 128) f32    final encoder output rows for this image
    # xb    : (Rtot, 128) f32      zero-guarded padded-flat feature map scratch
    Wp, Hp = W + 2, H + 2
    Rp = Hp * Wp
    G = _round_up(Wp + 1, 8)                       # guard rows (sublane aligned)
    mask = mask_ref[...]                           # (Rp, 1)

    def conv3x3(w_taps_ref, relu_in):
        # 3x3 stride-1 pad-1 conv as 9 row-shifted matmuls over the guarded
        # padded-flat buffer (this IS the in-kernel "im2col").
        acc = jnp.zeros((Rp, 128), jnp.float32)
        for di in range(3):
            for dj in range(3):
                start = G + (di - 1) * Wp + (dj - 1)
                xk = xb[pl.ds(start, Rp), :]
                if relu_in:
                    xk = jnp.maximum(xk, 0.0)
                acc += jnp.dot(xk.astype(jnp.bfloat16),
                               w_taps_ref[di * 3 + dj],
                               preferred_element_type=jnp.float32)
        return acc

    # 1) Scatter compact conv2 rows into the zero-guarded padded-flat buffer.
    xb[...] = jnp.zeros_like(xb)
    for oh in range(H):
        dst = G + (oh + 1) * Wp + 1
        xb[pl.ds(dst, W), :] = x_ref[0, pl.ds(oh * W, W), :].astype(jnp.float32)

    # 2) conv3: 3x3 s1 p1 + bias (no ReLU).  Border rows re-zeroed via mask so
    #    they act as zero padding for the next conv.
    x_cur = mask * (conv3x3(w3_ref, relu_in=False) + b3_ref[...])
    xb[pl.ds(G, Rp), :] = x_cur

    # 3) Residual block 1: x + Conv1x1(ReLU(Conv3x3(ReLU(x))))
    h = mask * jnp.maximum(conv3x3(w3a_ref, relu_in=True), 0.0)
    x_cur = xb[pl.ds(G, Rp), :] + jnp.dot(h.astype(jnp.bfloat16), w1a_ref[...],
                                          preferred_element_type=jnp.float32)
    xb[pl.ds(G, Rp), :] = x_cur

    # 4) Residual block 2 + encoder trailing ReLU.
    h = mask * jnp.maximum(conv3x3(w3b_ref, relu_in=True), 0.0)
    x_cur = xb[pl.ds(G, Rp), :] + jnp.dot(h.astype(jnp.bfloat16), w1b_ref[...],
                                          preferred_element_type=jnp.float32)
    xb[pl.ds(G, Rp), :] = jnp.maximum(x_cur, 0.0)

    # 5) Compact the interior rows into the (H*W, 128) output block.
    for oh in range(H):
        src = G + (oh + 1) * Wp + 1
        o_ref[0, pl.ds(oh * W, W), :] = xb[pl.ds(src, W), :].astype(o_ref.dtype)


def tail_call(x2, prep, *, H, W):
    """x2: (N, H*W, 128) bf16 compact conv2 output -> (N, H*W, 128) f32."""
    n = x2.shape[0]
    Hp, Wp = H + 2, W + 2
    Rp = Hp * Wp
    G = _round_up(Wp + 1, 8)
    Rtot = Rp + 2 * G

    # Interior mask over the padded-flat layout (built once, tiny).
    ids = jnp.arange(Rp, dtype=jnp.int32)
    ph, pw = ids // Wp, ids % Wp
    interior = (ph >= 1) & (ph <= Hp - 2) & (pw >= 1) & (pw <= Wp - 2)
    mask = interior.astype(jnp.float32)[:, None]            # (Rp, 1)

    return pl.pallas_call(
        functools.partial(_tail_kernel, H=H, W=W),
        out_shape=jax.ShapeDtypeStruct((n, H * W, 128), jnp.float32),
        grid=(n,),
        in_specs=[
            pl.BlockSpec((1, H * W, 128), lambda i: (i, 0, 0)),
            pl.BlockSpec((Rp, 1), lambda i: (0, 0)),
            pl.BlockSpec((1, 128), lambda i: (0, 0)),
            pl.BlockSpec((9, 128, 128), lambda i: (0, 0, 0)),
            pl.BlockSpec((9, 128, 128), lambda i: (0, 0, 0)),
            pl.BlockSpec((128, 128), lambda i: (0, 0)),
            pl.BlockSpec((9, 128, 128), lambda i: (0, 0, 0)),
            pl.BlockSpec((128, 128), lambda i: (0, 0)),
        ],
        out_specs=pl.BlockSpec((1, H * W, 128), lambda i: (i, 0, 0)),
        scratch_shapes=[pltpu.VMEM((Rtot, 128), jnp.float32)],
        compiler_params=_compiler_params(),
    )(x2, mask, prep["b3"], prep["w3_taps"],
      prep["res1_w3"], prep["res1_w1"], prep["res2_w3"], prep["res2_w1"])


# ------------------------------- glue (JAX) -------------------------------- #
def im2col(x_nhwc, ksize, stride, pad):
    """x: (N, H, W, C) -> (N*Ho*Wo, ksize*ksize*C), plus (N, Ho, Wo)."""
    if pad:
        x_nhwc = jnp.pad(x_nhwc, ((0, 0), (pad, pad), (pad, pad), (0, 0)))
    n, h, w, c = x_nhwc.shape
    ho = (h - ksize) // stride + 1
    wo = (w - ksize) // stride + 1
    cols = []
    for i in range(ksize):
        for j in range(ksize):
            cols.append(
                x_nhwc[
                    :,
                    i : i + (ho - 1) * stride + 1 : stride,
                    j : j + (wo - 1) * stride + 1 : stride,
                    :,
                ]
            )
    patches = jnp.stack(cols, axis=3)  # (N, Ho, Wo, KH*KW, C)
    return patches.reshape(n * ho * wo, ksize * ksize * c), (n, ho, wo)


def init_params(key, n_channels=1):
    def conv_init(k, cout, cin, ks, bias=True):
        kw, kb = jax.random.split(k)
        fan_in = cin * ks * ks
        w = jax.random.normal(kw, (cout, cin, ks, ks), jnp.float32) / math.sqrt(fan_in)
        b = 0.05 * jax.random.normal(kb, (cout,), jnp.float32) if bias else None
        return w, b

    keys = jax.random.split(key, 7)
    p = {}
    p["conv1_w"], p["conv1_b"] = conv_init(keys[0], 64, n_channels, 4)
    p["conv2_w"], p["conv2_b"] = conv_init(keys[1], 128, 64, 4)
    p["conv3_w"], p["conv3_b"] = conv_init(keys[2], 128, 128, 3)
    p["res1_w3"], _ = conv_init(keys[3], 32, 128, 3, bias=False)
    p["res1_w1"], _ = conv_init(keys[4], 128, 32, 1, bias=False)
    p["res2_w3"], _ = conv_init(keys[5], 32, 128, 3, bias=False)
    p["res2_w1"], _ = conv_init(keys[6], 128, 32, 1, bias=False)
    return p


def prepare_params(params):
    """One-time weight re-layout (hoisted out of the forward path)."""
    def flat(w):   # OIHW -> (KH*KW*Cin, Cout)
        cout = w.shape[0]
        return jnp.transpose(w, (2, 3, 1, 0)).reshape(-1, cout)

    def taps(w):   # OIHW -> (KH*KW, Cin, Cout), per-tap matrices
        cout, cin, kh, kw = w.shape
        return jnp.transpose(w, (2, 3, 1, 0)).reshape(kh * kw, cin, cout)

    prep = {
        "w1": flat(params["conv1_w"]).astype(jnp.bfloat16),
        "b1": params["conv1_b"][None, :].astype(jnp.float32),
        "w2": flat(params["conv2_w"]).astype(jnp.bfloat16),
        "b2": params["conv2_b"][None, :].astype(jnp.float32),
        "w3_taps": taps(params["conv3_w"]).astype(jnp.bfloat16),   # (9,128,128)
        "b3": params["conv3_b"][None, :].astype(jnp.float32),
    }
    for r in ("res1", "res2"):
        w3 = taps(params[f"{r}_w3"])                               # (9,128,32)
        w3 = jnp.pad(w3, ((0, 0), (0, 0), (0, 128 - w3.shape[2]))) # Cout -> 128
        prep[f"{r}_w3"] = w3.astype(jnp.bfloat16)
        w1 = flat(params[f"{r}_w1"])                               # (32,128)
        w1 = jnp.pad(w1, ((0, 128 - w1.shape[0]), (0, 0)))         # K -> 128
        prep[f"{r}_w1"] = w1.astype(jnp.bfloat16)
    return prep


def vqvae_encoder_forward(x_nchw, prep):
    """Matches VQVAEEncoder.forward."""
    x = jnp.transpose(x_nchw, (0, 2, 3, 1)).astype(jnp.bfloat16)   # NCHW -> NHWC

    # Conv(Cin->64, k4 s2 p1) + ReLU
    p, (n, h1, w1) = im2col(x, 4, 2, 1)
    y = conv_call(p, prep["w1"], prep["b1"], relu=True, out_dtype=jnp.bfloat16)
    x = y.reshape(n, h1, w1, 64)

    # Conv(64->128, k4 s2 p1) + ReLU
    p, (n, h2, w2) = im2col(x, 4, 2, 1)
    y2 = conv_call(p, prep["w2"], prep["b2"], relu=True, out_dtype=jnp.bfloat16)
    x2 = y2.reshape(n, h2 * w2, 128)                                # compact rows

    # Fused tail: conv3 + ResidualCNN x2 + trailing ReLU (single pallas_call)
    out_flat = tail_call(x2, prep, H=h2, W=w2)                      # (n, h2*w2, 128) f32

    out = out_flat.reshape(n, h2, w2, 128)
    return jnp.transpose(out, (0, 3, 1, 2))                         # NHWC -> NCHW


def reference_forward(x_nchw, params):
    """Pure-JAX f32 reference (lax.conv) mirroring the PyTorch module."""
    def conv(x, w, b, stride, pad):
        y = lax.conv_general_dilated(
            x, w, (stride, stride), [(pad, pad)] * 2,
            dimension_numbers=("NCHW", "OIHW", "NCHW"),
            precision=lax.Precision.HIGHEST)
        if b is not None:
            y = y + b[None, :, None, None]
        return y

    x = x_nchw.astype(jnp.float32)
    x = jnp.maximum(conv(x, params["conv1_w"], params["conv1_b"], 2, 1), 0.0)
    x = jnp.maximum(conv(x, params["conv2_w"], params["conv2_b"], 2, 1), 0.0)
    x = conv(x, params["conv3_w"], params["conv3_b"], 1, 1)
    for r in ("res1", "res2"):
        h = jnp.maximum(x, 0.0)
        h = conv(h, params[f"{r}_w3"], None, 1, 1)
        h = jnp.maximum(h, 0.0)
        h = conv(h, params[f"{r}_w1"], None, 1, 0)
        x = x + h
    return jnp.maximum(x, 0.0)


if __name__ == "__main__":
    key = jax.random.PRNGKey(0)
    key, xkey = jax.random.split(key)
    # Small input consistent with the module defaults: batch=2, channels=1, 16x16.
    x = jax.random.normal(xkey, (2, 1, 16, 16), jnp.float32)

    params = init_params(key, n_channels=1)
    prep = prepare_params(params)

    fwd = jax.jit(vqvae_encoder_forward)
    out = jax.block_until_ready(fwd(x, prep))

    assert out.shape == (2, 128, 4, 4), out.shape
    assert bool(jnp.all(jnp.isfinite(out)))

    ref = reference_forward(x, params)
    scale = max(1.0, float(jnp.max(jnp.abs(ref))))
    max_err = float(jnp.max(jnp.abs(out - ref)))
    # bf16 matmul inputs / bf16 stem activations with f32 accumulation.
    assert max_err <= 5e-2 * scale, (max_err, scale)

    print("KERNEL_OK")
</pallas_src>

<mosaic_0001>
module attributes {stable_mosaic.version = 11 : i64} {
  func.func @_conv_kernel(%arg0: i32, %arg1: memref<64x16xbf16, #tpu.memory_space<vmem>>, %arg2: memref<16x64xbf16, #tpu.memory_space<vmem>>, %arg3: memref<1x64xf32, #tpu.memory_space<vmem>>, %arg4: memref<64x64xbf16, #tpu.memory_space<vmem>>) attributes {dimension_semantics = [#tpu.dimension_semantics<parallel>], iteration_bounds = array<i64: 2>, scalar_prefetch = 0 : i64, scratch_operands = 0 : i64, tpu.core_type = #tpu.core_type<tc>, window_params = [{transform_indices = @transform_0, window_bounds = array<i64: 64, 16>}, {pipeline_mode = #tpu.pipeline_mode<synchronous>, transform_indices = @transform_1, window_bounds = array<i64: 16, 64>}, {pipeline_mode = #tpu.pipeline_mode<synchronous>, transform_indices = @transform_2, window_bounds = array<i64: 1, 64>}, {transform_indices = @transform_3, window_bounds = array<i64: 64, 64>}]} {
    %c0 = arith.constant 0 : index
    %c0_0 = arith.constant 0 : index
    %0 = vector.load %arg1[%c0, %c0_0] : memref<64x16xbf16, #tpu.memory_space<vmem>>, vector<64x16xbf16>
    %c0_1 = arith.constant 0 : index
    %c0_2 = arith.constant 0 : index
    %1 = vector.load %arg2[%c0_1, %c0_2] : memref<16x64xbf16, #tpu.memory_space<vmem>>, vector<16x64xbf16>
    %cst = arith.constant dense<0.000000e+00> : vector<64x64xf32>
    %2 = tpu.matmul %0, %1, %cst {dimension_numbers = #tpu.dot_dimension_numbers<[1], [0], [0], [1], [0, 0, 1, 1], [], []>} : vector<64x16xbf16>, vector<16x64xbf16>, vector<64x64xf32> -> vector<64x64xf32>
    %c0_3 = arith.constant 0 : index
    %c0_4 = arith.constant 0 : index
    %3 = vector.load %arg3[%c0_3, %c0_4] : memref<1x64xf32, #tpu.memory_space<vmem>>, vector<1x64xf32>
    %4 = vector.broadcast %3 : vector<1x64xf32> to vector<64x64xf32>
    %5 = arith.addf %2, %4 : vector<64x64xf32>
    %cst_5 = arith.constant 0.000000e+00 : f32
    %6 = vector.broadcast %cst_5 : f32 to vector<64x64xf32>
    %7 = arith.maximumf %5, %6 : vector<64x64xf32>
    %8 = arith.truncf %7 : vector<64x64xf32> to vector<64x64xbf16>
    %c0_6 = arith.constant 0 : index
    %c0_7 = arith.constant 0 : index
    %9 = vector.load %arg4[%c0_6, %c0_7] : memref<64x64xbf16, #tpu.memory_space<vmem>>, vector<64x64xbf16>
    tpu.vector_store %arg4[%c0_6, %c0_7], %8 {strides = array<i32>} : memref<64x64xbf16, #tpu.memory_space<vmem>>, vector<64x64xbf16>,
    return
  }
  func.func @transform_0(%arg0: i32) -> (i32, i32) {
    %c0_i32 = arith.constant 0 : i32
    %c0_i32_0 = arith.constant 0 : i32
    return %arg0, %c0_i32 : i32, i32
  }
  func.func @transform_1(%arg0: i32) -> (i32, i32) {
    %c0_i32 = arith.constant 0 : i32
    %c0_i32_0 = arith.constant 0 : i32
    %c0_i32_1 = arith.constant 0 : i32
    return %c0_i32, %c0_i32_0 : i32, i32
  }
  func.func @transform_2(%arg0: i32) -> (i32, i32) {
    %c0_i32 = arith.constant 0 : i32
    %c0_i32_0 = arith.constant 0 : i32
    %c0_i32_1 = arith.constant 0 : i32
    return %c0_i32, %c0_i32_0 : i32, i32
  }
  func.func @transform_3(%arg0: i32) -> (i32, i32) {
    %c0_i32 = arith.constant 0 : i32
    %c0_i32_0 = arith.constant 0 : i32
    return %arg0, %c0_i32 : i32, i32
  }
}

module attributes {stable_mosaic.version = 11 : i64} {
  func.func @_conv_kernel(%arg0: i32, %arg1: memref<16x1024xbf16, #tpu.memory_space<vmem>>, %arg2: memref<1024x128xbf16, #tpu.memory_space<vmem>>, %arg3: memref<1x128xf32, #tpu.memory_space<vmem>>, %arg4: memref<16x128xbf16, #tpu.memory_space<vmem>>) attributes {dimension_semantics = [#tpu.dimension_semantics<parallel>], iteration_bounds = array<i64: 2>, scalar_prefetch = 0 : i64, scratch_operands = 0 : i64, tpu.core_type = #tpu.core_type<tc>, window_params = [{transform_indices = @transform_0, window_bounds = array<i64: 16, 1024>}, {pipeline_mode = #tpu.pipeline_mode<synchronous>, transform_indices = @transform_1, window_bounds = array<i64: 1024, 128>}, {pipeline_mode = #tpu.pipeline_mode<synchronous>, transform_indices = @transform_2, window_bounds = array<i64: 1, 128>}, {transform_indices = @transform_3, window_bounds = array<i64: 16, 128>}]} {
    %c0 = arith.constant 0 : index
    %c0_0 = arith.constant 0 : index
    %0 = vector.load %arg1[%c0, %c0_0] : memref<16x1024xbf16, #tpu.memory_space<vmem>>, vector<16x1024xbf16>
    %c0_1 = arith.constant 0 : index
    %c0_2 = arith.constant 0 : index
    %1 = vector.load %arg2[%c0_1, %c0_2] : memref<1024x128xbf16, #tpu.memory_space<vmem>>, vector<1024x128xbf16>
    %cst = arith.constant dense<0.000000e+00> : vector<16x128xf32>
    %2 = tpu.matmul %0, %1, %cst {dimension_numbers = #tpu.dot_dimension_numbers<[1], [0], [0], [1], [0, 0, 1, 1], [], []>} : vector<16x1024xbf16>, vector<1024x128xbf16>, vector<16x128xf32> -> vector<16x128xf32>
    %c0_3 = arith.constant 0 : index
    %c0_4 = arith.constant 0 : index
    %3 = vector.load %arg3[%c0_3, %c0_4] : memref<1x128xf32, #tpu.memory_space<vmem>>, vector<1x128xf32>
    %4 = vector.broadcast %3 : vector<1x128xf32> to vector<16x128xf32>
    %5 = arith.addf %2, %4 : vector<16x128xf32>
    %cst_5 = arith.constant 0.000000e+00 : f32
    %6 = vector.broadcast %cst_5 : f32 to vector<16x128xf32>
    %7 = arith.maximumf %5, %6 : vector<16x128xf32>
    %8 = arith.truncf %7 : vector<16x128xf32> to vector<16x128xbf16>
    %c0_6 = arith.constant 0 : index
    %c0_7 = arith.constant 0 : index
    %9 = vector.load %arg4[%c0_6, %c0_7] : memref<16x128xbf16, #tpu.memory_space<vmem>>, vector<16x128xbf16>
    tpu.vector_store %arg4[%c0_6, %c0_7], %8 {strides = array<i32>} : memref<16x128xbf16, #tpu.memory_space<vmem>>, vector<16x128xbf16>,
    return
  }
  func.func @transform_0(%arg0: i32) -> (i32, i32) {
    %c0_i32 = arith.constant 0 : i32
    %c0_i32_0 = arith.constant 0 : i32
    return %arg0, %c0_i32 : i32, i32
  }
  func.func @transform_1(%arg0: i32) -> (i32, i32) {
    %c0_i32 = arith.constant 0 : i32
    %c0_i32_0 = arith.constant 0 : i32
    %c0_i32_1 = arith.constant 0 : i32
    return %c0_i32, %c0_i32_0 : i32, i32
  }
  func.func @transform_2(%arg0: i32) -> (i32, i32) {
    %c0_i32 = arith.constant 0 : i32
    %c0_i32_0 = arith.constant 0 : i32
    %c0_i32_1 = arith.constant 0 : i32
    return %c0_i32, %c0_i32_0 : i32, i32
  }
  func.func @transform_3(%arg0: i32) -> (i32, i32) {
    %c0_i32 = arith.constant 0 : i32
    %c0_i32_0 = arith.constant 0 : i32
    return %arg0, %c0_i32 : i32, i32
  }
}

module attributes {stable_mosaic.version = 11 : i64} {
  func.func @_tail_kernel(%arg0: i32, %arg1: memref<1x16x128xbf16, #tpu.memory_space<vmem>>, %arg2: memref<36x1xf32, #tpu.memory_space<vmem>>, %arg3: memref<1x128xf32, #tpu.memory_space<vmem>>, %arg4: memref<9x128x128xbf16, #tpu.memory_space<vmem>>, %arg5: memref<9x128x128xbf16, #tpu.memory_space<vmem>>, %arg6: memref<128x128xbf16, #tpu.memory_space<vmem>>, %arg7: memref<9x128x128xbf16, #tpu.memory_space<vmem>>, %arg8: memref<128x128xbf16, #tpu.memory_space<vmem>>, %arg9: memref<1x16x128xf32, #tpu.memory_space<vmem>>, %arg10: memref<52x128xf32, #tpu.memory_space<vmem>>) attributes {dimension_semantics = [#tpu.dimension_semantics<parallel>], iteration_bounds = array<i64: 2>, scalar_prefetch = 0 : i64, scratch_operands = 1 : i64, tpu.core_type = #tpu.core_type<tc>, window_params = [{transform_indices = @transform_0, window_bounds = array<i64: 1, 16, 128>}, {pipeline_mode = #tpu.pipeline_mode<synchronous>, transform_indices = @transform_1, window_bounds = array<i64: 36, 1>}, {pipeline_mode = #tpu.pipeline_mode<synchronous>, transform_indices = @transform_2, window_bounds = array<i64: 1, 128>}, {pipeline_mode = #tpu.pipeline_mode<synchronous>, transform_indices = @transform_3, window_bounds = array<i64: 9, 128, 128>}, {pipeline_mode = #tpu.pipeline_mode<synchronous>, transform_indices = @transform_4, window_bounds = array<i64: 9, 128, 128>}, {pipeline_mode = #tpu.pipeline_mode<synchronous>, transform_indices = @transform_5, window_bounds = array<i64: 128, 128>}, {pipeline_mode = #tpu.pipeline_mode<synchronous>, transform_indices = @transform_6, window_bounds = array<i64: 9, 128, 128>}, {pipeline_mode = #tpu.pipeline_mode<synchronous>, transform_indices = @transform_7, window_bounds = array<i64: 128, 128>}, {transform_indices = @transform_8, window_bounds = array<i64: 1, 16, 128>}]} {
    %c0 = arith.constant 0 : index
    %c0_0 = arith.constant 0 : index
    %0 = vector.load %arg2[%c0, %c0_0] : memref<36x1xf32, #tpu.memory_space<vmem>>, vector<36x1xf32>
    %cst = arith.constant 0.000000e+00 : f32
    %1 = vector.broadcast %cst : f32 to vector<52x128xf32>
    %c0_1 = arith.constant 0 : index
    %c0_2 = arith.constant 0 : index
    %2 = vector.load %arg10[%c0_1, %c0_2] : memref<52x128xf32, #tpu.memory_space<vmem>>, vector<52x128xf32>
    tpu.vector_store %arg10[%c0_1, %c0_2], %1 {strides = array<i32>} : memref<52x128xf32, #tpu.memory_space<vmem>>, vector<52x128xf32>,
    %c0_3 = arith.constant 0 : index
    %c0_4 = arith.constant 0 : index
    %c0_5 = arith.constant 0 : index
    %3 = vector.load %arg1[%c0_3, %c0_4, %c0_5] : memref<1x16x128xbf16, #tpu.memory_space<vmem>>, vector<1x4x128xbf16>
    %4 = vector.shape_cast %3 : vector<1x4x128xbf16> to vector<4x128xbf16>
    %5 = arith.extf %4 : vector<4x128xbf16> to vector<4x128xf32>
    %c15 = arith.constant 15 : index
    %c0_6 = arith.constant 0 : index
    %6 = vector.load %arg10[%c15, %c0_6] : memref<52x128xf32, #tpu.memory_space<vmem>>, vector<4x128xf32>
    tpu.vector_store %arg10[%c15, %c0_6], %5 {strides = array<i32>} : memref<52x128xf32, #tpu.memory_space<vmem>>, vector<4x128xf32>,
    %c0_7 = arith.constant 0 : index
    %c4 = arith.constant 4 : index
    %c0_8 = arith.constant 0 : index
    %7 = vector.load %arg1[%c0_7, %c4, %c0_8] : memref<1x16x128xbf16, #tpu.memory_space<vmem>>, vector<1x4x128xbf16>
    %8 = vector.shape_cast %7 : vector<1x4x128xbf16> to vector<4x128xbf16>
    %9 = arith.extf %8 : vector<4x128xbf16> to vector<4x128xf32>
    %c21 = arith.constant 21 : index
    %c0_9 = arith.constant 0 : index
    %10 = vector.load %arg10[%c21, %c0_9] : memref<52x128xf32, #tpu.memory_space<vmem>>, vector<4x128xf32>
    tpu.vector_store %arg10[%c21, %c0_9], %9 {strides = array<i32>} : memref<52x128xf32, #tpu.memory_space<vmem>>, vector<4x128xf32>,
    %c0_10 = arith.constant 0 : index
    %c8 = arith.constant 8 : index
    %c0_11 = arith.constant 0 : index
    %11 = vector.load %arg1[%c0_10, %c8, %c0_11] : memref<1x16x128xbf16, #tpu.memory_space<vmem>>, vector<1x4x128xbf16>
    %12 = vector.shape_cast %11 : vector<1x4x128xbf16> to vector<4x128xbf16>
    %13 = arith.extf %12 : vector<4x128xbf16> to vector<4x128xf32>
    %c27 = arith.constant 27 : index
    %c0_12 = arith.constant 0 : index
    %14 = vector.load %arg10[%c27, %c0_12] : memref<52x128xf32, #tpu.memory_space<vmem>>, vector<4x128xf32>
    tpu.vector_store %arg10[%c27, %c0_12], %13 {strides = array<i32>} : memref<52x128xf32, #tpu.memory_space<vmem>>, vector<4x128xf32>,
    %c0_13 = arith.constant 0 : index
    %c12 = arith.constant 12 : index
    %c0_14 = arith.constant 0 : index
    %15 = vector.load %arg1[%c0_13, %c12, %c0_14] : memref<1x16x128xbf16, #tpu.memory_space<vmem>>, vector<1x4x128xbf16>
    %16 = vector.shape_cast %15 : vector<1x4x128xbf16> to vector<4x128xbf16>
    %17 = arith.extf %16 : vector<4x128xbf16> to vector<4x128xf32>
    %c33 = arith.constant 33 : index
    %c0_15 = arith.constant 0 : index
    %18 = vector.load %arg10[%c33, %c0_15] : memref<52x128xf32, #tpu.memory_space<vmem>>, vector<4x128xf32>
    tpu.vector_store %arg10[%c33, %c0_15], %17 {strides = array<i32>} : memref<52x128xf32, #tpu.memory_space<vmem>>, vector<4x128xf32>,
    %cst_16 = arith.constant 0.000000e+00 : f32
    %19 = vector.broadcast %cst_16 : f32 to vector<36x128xf32>
    %c1 = arith.constant 1 : index
    %c0_17 = arith.constant 0 : index
    %20 = vector.load %arg10[%c1, %c0_17] : memref<52x128xf32, #tpu.memory_space<vmem>>, vector<36x128xf32>
    %21 = arith.truncf %20 : vector<36x128xf32> to vector<36x128xbf16>
    %c0_18 = arith.constant 0 : index
    %c0_19 = arith.constant 0 : index
    %c0_20 = arith.constant 0 : index
    %22 = vector.load %arg4[%c0_18, %c0_19, %c0_20] : memref<9x128x128xbf16, #tpu.memory_space<vmem>>, vector<1x128x128xbf16>
    %23 = vector.shape_cast %22 : vector<1x128x128xbf16> to vector<128x128xbf16>
    %cst_21 = arith.constant dense<0.000000e+00> : vector<36x128xf32>
    %24 = tpu.matmul %21, %23, %cst_21 {dimension_numbers = #tpu.dot_dimension_numbers<[1], [0], [0], [1], [0, 0, 1, 1], [], []>} : vector<36x128xbf16>, vector<128x128xbf16>, vector<36x128xf32> -> vector<36x128xf32>
    %25 = arith.addf %19, %24 : vector<36x128xf32>
    %c2 = arith.constant 2 : index
    %c0_22 = arith.constant 0 : index
    %26 = vector.load %arg10[%c2, %c0_22] : memref<52x128xf32, #tpu.memory_space<vmem>>, vector<36x128xf32>
    %27 = arith.truncf %26 : vector<36x128xf32> to vector<36x128xbf16>
    %c1_23 = arith.constant 1 : index
    %c0_24 = arith.constant 0 : index
    %c0_25 = arith.constant 0 : index
    %28 = vector.load %arg4[%c1_23, %c0_24, %c0_25] : memref<9x128x128xbf16, #tpu.memory_space<vmem>>, vector<1x128x128xbf16>
    %29 = vector.shape_cast %28 : vector<1x128x128xbf16> to vector<128x128xbf16>
    %cst_26 = arith.constant dense<0.000000e+00> : vector<36x128xf32>
    %30 = tpu.matmul %27, %29, %cst_26 {dimension_numbers = #tpu.dot_dimension_numbers<[1], [0], [0], [1], [0, 0, 1, 1], [], []>} : vector<36x128xbf16>, vector<128x128xbf16>, vector<36x128xf32> -> vector<36x128xf32>
    %31 = arith.addf %25, %30 : vector<36x128xf32>
    %c3 = arith.constant 3 : index
    %c0_27 = arith.constant 0 : index
    %32 = vector.load %arg10[%c3, %c0_27] : memref<52x128xf32, #tpu.memory_space<vmem>>, vector<36x128xf32>
    %33 = arith.truncf %32 : vector<36x128xf32> to vector<36x128xbf16>
    %c2_28 = arith.constant 2 : index
    %c0_29 = arith.constant 0 : index
    %c0_30 = arith.constant 0 : index
    %34 = vector.load %arg4[%c2_28, %c0_29, %c0_30] : memref<9x128x128xbf16, #tpu.memory_space<vmem>>, vector<1x128x128xbf16>
    %35 = vector.shape_cast %34 : vector<1x128x128xbf16> to vector<128x128xbf16>
    %cst_31 = arith.constant dense<0.000000e+00> : vector<36x128xf32>
    %36 = tpu.matmul %33, %35, %cst_31 {dimension_numbers = #tpu.dot_dimension_numbers<[1], [0], [0], [1], [0, 0, 1, 1], [], []>} : vector<36x128xbf16>, vector<128x128xbf16>, vector<36x128xf32> -> vector<36x128xf32>
    %37 = arith.addf %31, %36 : vector<36x128xf32>
    %c7 = arith.constant 7 : index
    %c0_32 = arith.constant 0 : index
    %38 = vector.load %arg10[%c7, %c0_32] : memref<52x128xf32, #tpu.memory_space<vmem>>, vector<36x128xf32>
    %39 = arith.truncf %38 : vector<36x128xf32> to vector<36x128xbf16>
    %c3_33 = arith.constant 3 : index
    %c0_34 = arith.constant 0 : index
    %c0_35 = arith.constant 0 : index
    %40 = vector.load %arg4[%c3_33, %c0_34, %c0_35] : memref<9x128x128xbf16, #tpu.memory_space<vmem>>, vector<1x128x128xbf16>
    %41 = vector.shape_cast %40 : vector<1x128x128xbf16> to vector<128x128xbf16>
    %cst_36 = arith.constant dense<0.000000e+00> : vector<36x128xf32>
    %42 = tpu.matmul %39, %41, %cst_36 {dimension_numbers = #tpu.dot_dimension_numbers<[1], [0], [0], [1], [0, 0, 1, 1], [], []>} : vector<36x128xbf16>, vector<128x128xbf16>, vector<36x128xf32> -> vector<36x128xf32>
    %43 = arith.addf %37, %42 : vector<36x128xf32>
    %c8_37 = arith.constant 8 : index
    %c0_38 = arith.constant 0 : index
    %44 = vector.load %arg10[%c8_37, %c0_38] : memref<52x128xf32, #tpu.memory_space<vmem>>, vector<36x128xf32>
    %45 = arith.truncf %44 : vector<36x128xf32> to vector<36x128xbf16>
    %c4_39 = arith.constant 4 : index
    %c0_40 = arith.constant 0 : index
    %c0_41 = arith.constant 0 : index
    %46 = vector.load %arg4[%c4_39, %c0_40, %c0_41] : memref<9x128x128xbf16, #tpu.memory_space<vmem>>, vector<1x128x128xbf16>
    %47 = vector.shape_cast %46 : vector<1x128x128xbf16> to vector<128x128xbf16>
    %cst_42 = arith.constant dense<0.000000e+00> : vector<36x128xf32>
    %48 = tpu.matmul %45, %47, %cst_42 {dimension_numbers = #tpu.dot_dimension_numbers<[1], [0], [0], [1], [0, 0, 1, 1], [], []>} : vector<36x128xbf16>, vector<128x128xbf16>, vector<36x128xf32> -> vector<36x128xf32>
    %49 = arith.addf %43, %48 : vector<36x128xf32>
    %c9 = arith.constant 9 : index
    %c0_43 = arith.constant 0 : index
    %50 = vector.load %arg10[%c9, %c0_43] : memref<52x128xf32, #tpu.memory_space<vmem>>, vector<36x128xf32>
    %51 = arith.truncf %50 : vector<36x128xf32> to vector<36x128xbf16>
    %c5 = arith.constant 5 : index
    %c0_44 = arith.constant 0 : index
    %c0_45 = arith.constant 0 : index
    %52 = vector.load %arg4[%c5, %c0_44, %c0_45] : memref<9x128x128xbf16, #tpu.memory_space<vmem>>, vector<1x128x128xbf16>
    %53 = vector.shape_cast %52 : vector<1x128x128xbf16> to vector<128x128xbf16>
    %cst_46 = arith.constant dense<0.000000e+00> : vector<36x128xf32>
    %54 = tpu.matmul %51, %53, %cst_46 {dimension_numbers = #tpu.dot_dimension_numbers<[1], [0], [0], [1], [0, 0, 1, 1], [], []>} : vector<36x128xbf16>, vector<128x128xbf16>, vector<36x128xf32> -> vector<36x128xf32>
    %55 = arith.addf %49, %54 : vector<36x128xf32>
    %c13 = arith.constant 13 : index
    %c0_47 = arith.constant 0 : index
    %56 = vector.load %arg10[%c13, %c0_47] : memref<52x128xf32, #tpu.memory_space<vmem>>, vector<36x128xf32>
    %57 = arith.truncf %56 : vector<36x128xf32> to vector<36x128xbf16>
    %c6 = arith.constant 6 : index
    %c0_48 = arith.constant 0 : index
    %c0_49 = arith.constant 0 : index
    %58 = vector.load %arg4[%c6, %c0_48, %c0_49] : memref<9x128x128xbf16, #tpu.memory_space<vmem>>, vector<1x128x128xbf16>
    %59 = vector.shape_cast %58 : vector<1x128x128xbf16> to vector<128x128xbf16>
    %cst_50 = arith.constant dense<0.000000e+00> : vector<36x128xf32>
    %60 = tpu.matmul %57, %59, %cst_50 {dimension_numbers = #tpu.dot_dimension_numbers<[1], [0], [0], [1], [0, 0, 1, 1], [], []>} : vector<36x128xbf16>, vector<128x128xbf16>, vector<36x128xf32> -> vector<36x128xf32>
    %61 = arith.addf %55, %60 : vector<36x128xf32>
    %c14 = arith.constant 14 : index
    %c0_51 = arith.constant 0 : index
    %62 = vector.load %arg10[%c14, %c0_51] : memref<52x128xf32, #tpu.memory_space<vmem>>, vector<36x128xf32>
    %63 = arith.truncf %62 : vector<36x128xf32> to vector<36x128xbf16>
    %c7_52 = arith.constant 7 : index
    %c0_53 = arith.constant 0 : index
    %c0_54 = arith.constant 0 : index
    %64 = vector.load %arg4[%c7_52, %c0_53, %c0_54] : memref<9x128x128xbf16, #tpu.memory_space<vmem>>, vector<1x128x128xbf16>
    %65 = vector.shape_cast %64 : vector<1x128x128xbf16> to vector<128x128xbf16>
    %cst_55 = arith.constant dense<0.000000e+00> : vector<36x128xf32>
    %66 = tpu.matmul %63, %65, %cst_55 {dimension_numbers = #tpu.dot_dimension_numbers<[1], [0], [0], [1], [0, 0, 1, 1], [], []>} : vector<36x128xbf16>, vector<128x128xbf16>, vector<36x128xf32> -> vector<36x128xf32>
    %67 = arith.addf %61, %66 : vector<36x128xf32>
    %c15_56 = arith.constant 15 : index
    %c0_57 = arith.constant 0 : index
    %68 = vector.load %arg10[%c15_56, %c0_57] : memref<52x128xf32, #tpu.memory_space<vmem>>, vector<36x128xf32>
    %69 = arith.truncf %68 : vector<36x128xf32> to vector<36x128xbf16>
    %c8_58 = arith.constant 8 : index
    %c0_59 = arith.constant 0 : index
    %c0_60 = arith.constant 0 : index
    %70 = vector.load %arg4[%c8_58, %c0_59, %c0_60] : memref<9x128x128xbf16, #tpu.memory_space<vmem>>, vector<1x128x128xbf16>
    %71 = vector.shape_cast %70 : vector<1x128x128xbf16> to vector<128x128xbf16>
    %cst_61 = arith.constant dense<0.000000e+00> : vector<36x128xf32>
    %72 = tpu.matmul %69, %71, %cst_61 {dimension_numbers = #tpu.dot_dimension_numbers<[1], [0], [0], [1], [0, 0, 1, 1], [], []>} : vector<36x128xbf16>, vector<128x128xbf16>, vector<36x128xf32> -> vector<36x128xf32>
    %73 = arith.addf %67, %72 : vector<36x128xf32>
    %c0_62 = arith.constant 0 : index
    %c0_63 = arith.constant 0 : index
    %74 = vector.load %arg3[%c0_62, %c0_63] : memref<1x128xf32, #tpu.memory_space<vmem>>, vector<1x128xf32>
    %75 = vector.broadcast %74 : vector<1x128xf32> to vector<36x128xf32>
    %76 = arith.addf %73, %75 : vector<36x128xf32>
    %77 = vector.broadcast %0 : vector<36x1xf32> to vector<36x128xf32>
    %78 = arith.mulf %77, %76 : vector<36x128xf32>
    %c8_64 = arith.constant 8 : index
    %c0_65 = arith.constant 0 : index
    %79 = vector.load %arg10[%c8_64, %c0_65] : memref<52x128xf32, #tpu.memory_space<vmem>>, vector<36x128xf32>
    tpu.vector_store %arg10[%c8_64, %c0_65], %78 {strides = array<i32>} : memref<52x128xf32, #tpu.memory_space<vmem>>, vector<36x128xf32>,
    %cst_66 = arith.constant 0.000000e+00 : f32
    %80 = vector.broadcast %cst_66 : f32 to vector<36x128xf32>
    %c1_67 = arith.constant 1 : index
    %c0_68 = arith.constant 0 : index
    %81 = vector.load %arg10[%c1_67, %c0_68] : memref<52x128xf32, #tpu.memory_space<vmem>>, vector<36x128xf32>
    %cst_69 = arith.constant 0.000000e+00 : f32
    %82 = vector.broadcast %cst_69 : f32 to vector<36x128xf32>
    %83 = arith.maximumf %81, %82 : vector<36x128xf32>
    %84 = arith.truncf %83 : vector<36x128xf32> to vector<36x128xbf16>
    %c0_70 = arith.constant 0 : index
    %c0_71 = arith.constant 0 : index
    %c0_72 = arith.constant 0 : index
    %85 = vector.load %arg5[%c0_70, %c0_71, %c0_72] : memref<9x128x128xbf16, #tpu.memory_space<vmem>>, vector<1x128x128xbf16>
    %86 = vector.shape_cast %85 : vector<1x128x128xbf16> to vector<128x128xbf16>
    %cst_73 = arith.constant dense<0.000000e+00> : vector<36x128xf32>
    %87 = tpu.matmul %84, %86, %cst_73 {dimension_numbers = #tpu.dot_dimension_numbers<[1], [0], [0], [1], [0, 0, 1, 1], [], []>} : vector<36x128xbf16>, vector<128x128xbf16>, vector<36x128xf32> -> vector<36x128xf32>
    %88 = arith.addf %80, %87 : vector<36x128xf32>
    %c2_74 = arith.constant 2 : index
    %c0_75 = arith.constant 0 : index
    %89 = vector.load %arg10[%c2_74, %c0_75] : memref<52x128xf32, #tpu.memory_space<vmem>>, vector<36x128xf32>
    %cst_76 = arith.constant 0.000000e+00 : f32
    %90 = vector.broadcast %cst_76 : f32 to vector<36x128xf32>
    %91 = arith.maximumf %89, %90 : vector<36x128xf32>
    %92 = arith.truncf %91 : vector<36x128xf32> to vector<36x128xbf16>
    %c1_77 = arith.constant 1 : index
    %c0_78 = arith.constant 0 : index
    %c0_79 = arith.constant 0 : index
    %93 = vector.load %arg5[%c1_77, %c0_78, %c0_79] : memref<9x128x128xbf16, #tpu.memory_space<vmem>>, vector<1x128x128xbf16>
    %94 = vector.shape_cast %93 : vector<1x128x128xbf16> to vector<128x128xbf16>
    %cst_80 = arith.constant dense<0.000000e+00> : vector<36x128xf32>
    %95 = tpu.matmul %92, %94, %cst_80 {dimension_numbers = #tpu.dot_dimension_numbers<[1], [0], [0], [1], [0, 0, 1, 1], [], []>} : vector<36x128xbf16>, vector<128x128xbf16>, vector<36x128xf32> -> vector<36x128xf32>
    %96 = arith.addf %88, %95 : vector<36x128xf32>
    %c3_81 = arith.constant 3 : index
    %c0_82 = arith.constant 0 : index
    %97 = vector.load %arg10[%c3_81, %c0_82] : memref<52x128xf32, #tpu.memory_space<vmem>>, vector<36x128xf32>
    %cst_83 = arith.constant 0.000000e+00 : f32
    %98 = vector.broadcast %cst_83 : f32 to vector<36x128xf32>
    %99 = arith.maximumf %97, %98 : vector<36x128xf32>
    %100 = arith.truncf %99 : vector<36x128xf32> to vector<36x128xbf16>
    %c2_84 = arith.constant 2 : index
    %c0_85 = arith.constant 0 : index
    %c0_86 = arith.constant 0 : index
    %101 = vector.load %arg5[%c2_84, %c0_85, %c0_86] : memref<9x128x128xbf16, #tpu.memory_space<vmem>>, vector<1x128x128xbf16>
    %102 = vector.shape_cast %101 : vector<1x128x128xbf16> to vector<128x128xbf16>
    %cst_87 = arith.constant dense<0.000000e+00> : vector<36x128xf32>
    %103 = tpu.matmul %100, %102, %cst_87 {dimension_numbers = #tpu.dot_dimension_numbers<[1], [0], [0], [1], [0, 0, 1, 1], [], []>} : vector<36x128xbf16>, vector<128x128xbf16>, vector<36x128xf32> -> vector<36x128xf32>
    %104 = arith.addf %96, %103 : vector<36x128xf32>
    %c7_88 = arith.constant 7 : index
    %c0_89 = arith.constant 0 : index
    %105 = vector.load %arg10[%c7_88, %c0_89] : memref<52x128xf32, #tpu.memory_space<vmem>>, vector<36x128xf32>
    %cst_90 = arith.constant 0.000000e+00 : f32
    %106 = vector.broadcast %cst_90 : f32 to vector<36x128xf32>
    %107 = arith.maximumf %105, %106 : vector<36x128xf32>
    %108 = arith.truncf %107 : vector<36x128xf32> to vector<36x128xbf16>
    %c3_91 = arith.constant 3 : index
    %c0_92 = arith.constant 0 : index
    %c0_93 = arith.constant 0 : index
    %109 = vector.load %arg5[%c3_91, %c0_92, %c0_93] : memref<9x128x128xbf16, #tpu.memory_space<vmem>>, vector<1x128x128xbf16>
    %110 = vector.shape_cast %109 : vector<1x128x128xbf16> to vector<128x128xbf16>
    %cst_94 = arith.constant dense<0.000000e+00> : vector<36x128xf32>
    %111 = tpu.matmul %108, %110, %cst_94 {dimension_numbers = #tpu.dot_dimension_numbers<[1], [0], [0], [1], [0, 0, 1, 1], [], []>} : vector<36x128xbf16>, vector<128x128xbf16>, vector<36x128xf32> -> vector<36x128xf32>
    %112 = arith.addf %104, %111 : vector<36x128xf32>
    %c8_95 = arith.constant 8 : index
    %c0_96 = arith.constant 0 : index
    %113 = vector.load %arg10[%c8_95, %c0_96] : memref<52x128xf32, #tpu.memory_space<vmem>>, vector<36x128xf32>
    %cst_97 = arith.constant 0.000000e+00 : f32
    %114 = vector.broadcast %cst_97 : f32 to vector<36x128xf32>
    %115 = arith.maximumf %113, %114 : vector<36x128xf32>
    %116 = arith.truncf %115 : vector<36x128xf32> to vector<36x128xbf16>
    %c4_98 = arith.constant 4 : index
    %c0_99 = arith.constant 0 : index
    %c0_100 = arith.constant 0 : index
    %117 = vector.load %arg5[%c4_98, %c0_99, %c0_100] : memref<9x128x128xbf16, #tpu.memory_space<vmem>>, vector<1x128x128xbf16>
    %118 = vector.shape_cast %117 : vector<1x128x128xbf16> to vector<128x128xbf16>
    %cst_101 = arith.constant dense<0.000000e+00> : vector<36x128xf32>
    %119 = tpu.matmul %116, %118, %cst_101 {dimension_numbers = #tpu.dot_dimension_numbers<[1], [0], [0], [1], [0, 0, 1, 1], [], []>} : vector<36x128xbf16>, vector<128x128xbf16>, vector<36x128xf32> -> vector<36x128xf32>
    %120 = arith.addf %112, %119 : vector<36x128xf32>
    %c9_102 = arith.constant 9 : index
    %c0_103 = arith.constant 0 : index
    %121 = vector.load %arg10[%c9_102, %c0_103] : memref<52x128xf32, #tpu.memory_space<vmem>>, vector<36x128xf32>
    %cst_104 = arith.constant 0.000000e+00 : f32
    %122 = vector.broadcast %cst_104 : f32 to vector<36x128xf32>
    %123 = arith.maximumf %121, %122 : vector<36x128xf32>
    %124 = arith.truncf %123 : vector<36x128xf32> to vector<36x128xbf16>
    %c5_105 = arith.constant 5 : index
    %c0_106 = arith.constant 0 : index
    %c0_107 = arith.constant 0 : index
    %125 = vector.load %arg5[%c5_105, %c0_106, %c0_107] : memref<9x128x128xbf16, #tpu.memory_space<vmem>>, vector<1x128x128xbf16>
    %126 = vector.shape_cast %125 : vector<1x128x128xbf16> to vector<128x128xbf16>
    %cst_108 = arith.constant dense<0.000000e+00> : vector<36x128xf32>
    %127 = tpu.matmul %124, %126, %cst_108 {dimension_numbers = #tpu.dot_dimension_numbers<[1], [0], [0], [1], [0, 0, 1, 1], [], []>} : vector<36x128xbf16>, vector<128x128xbf16>, vector<36x128xf32> -> vector<36x128xf32>
    %128 = arith.addf %120, %127 : vector<36x128xf32>
    %c13_109 = arith.constant 13 : index
    %c0_110 = arith.constant 0 : index
    %129 = vector.load %arg10[%c13_109, %c0_110] : memref<52x128xf32, #tpu.memory_space<vmem>>, vector<36x128xf32>
    %cst_111 = arith.constant 0.000000e+00 : f32
    %130 = vector.broadcast %cst_111 : f32 to vector<36x128xf32>
    %131 = arith.maximumf %129, %130 : vector<36x128xf32>
    %132 = arith.truncf %131 : vector<36x128xf32> to vector<36x128xbf16>
    %c6_112 = arith.constant 6 : index
    %c0_113 = arith.constant 0 : index
    %c0_114 = arith.constant 0 : index
    %133 = vector.load %arg5[%c6_112, %c0_113, %c0_114] : memref<9x128x128xbf16, #tpu.memory_space<vmem>>, vector<1x128x128xbf16>
    %134 = vector.shape_cast %133 : vector<1x128x128xbf16> to vector<128x128xbf16>
    %cst_115 = arith.constant dense<0.000000e+00> : vector<36x128xf32>
    %135 = tpu.matmul %132, %134, %cst_115 {dimension_numbers = #tpu.dot_dimension_numbers<[1], [0], [0], [1], [0, 0, 1, 1], [], []>} : vector<36x128xbf16>, vector<128x128xbf16>, vector<36x128xf32> -> vector<36x128xf32>
    %136 = arith.addf %128, %135 : vector<36x128xf32>
    %c14_116 = arith.constant 14 : index
    %c0_117 = arith.constant 0 : index
    %137 = vector.load %arg10[%c14_116, %c0_117] : memref<52x128xf32, #tpu.memory_space<vmem>>, vector<36x128xf32>
    %cst_118 = arith.constant 0.000000e+00 : f32
    %138 = vector.broadcast %cst_118 : f32 to vector<36x128xf32>
    %139 = arith.maximumf %137, %138 : vector<36x128xf32>
    %140 = arith.truncf %139 : vector<36x128xf32> to vector<36x128xbf16>
    %c7_119 = arith.constant 7 : index
    %c0_120 = arith.constant 0 : index
    %c0_121 = arith.constant 0 : index
    %141 = vector.load %arg5[%c7_119, %c0_120, %c0_121] : memref<9x128x128xbf16, #tpu.memory_space<vmem>>, vector<1x128x128xbf16>
    %142 = vector.shape_cast %141 : vector<1x128x128xbf16> to vector<128x128xbf16>
    %cst_122 = arith.constant dense<0.000000e+00> : vector<36x128xf32>
    %143 = tpu.matmul %140, %142, %cst_122 {dimension_numbers = #tpu.dot_dimension_numbers<[1], [0], [0], [1], [0, 0, 1, 1], [], []>} : vector<36x128xbf16>, vector<128x128xbf16>, vector<36x128xf32> -> vector<36x128xf32>
    %144 = arith.addf %136, %143 : vector<36x128xf32>
    %c15_123 = arith.constant 15 : index
    %c0_124 = arith.constant 0 : index
    %145 = vector.load %arg10[%c15_123, %c0_124] : memref<52x128xf32, #tpu.memory_space<vmem>>, vector<36x128xf32>
    %cst_125 = arith.constant 0.000000e+00 : f32
    %146 = vector.broadcast %cst_125 : f32 to vector<36x128xf32>
    %147 = arith.maximumf %145, %146 : vector<36x128xf32>
    %148 = arith.truncf %147 : vector<36x128xf32> to vector<36x128xbf16>
    %c8_126 = arith.constant 8 : index
    %c0_127 = arith.constant 0 : index
    %c0_128 = arith.constant 0 : index
    %149 = vector.load %arg5[%c8_126, %c0_127, %c0_128] : memref<9x128x128xbf16, #tpu.memory_space<vmem>>, vector<1x128x128xbf16>
    %150 = vector.shape_cast %149 : vector<1x128x128xbf16> to vector<128x128xbf16>
    %cst_129 = arith.constant dense<0.000000e+00> : vector<36x128xf32>
    %151 = tpu.matmul %148, %150, %cst_129 {dimension_numbers = #tpu.dot_dimension_numbers<[1], [0], [0], [1], [0, 0, 1, 1], [], []>} : vector<36x128xbf16>, vector<128x128xbf16>, vector<36x128xf32> -> vector<36x128xf32>
    %152 = arith.addf %144, %151 : vector<36x128xf32>
    %cst_130 = arith.constant 0.000000e+00 : f32
    %153 = vector.broadcast %cst_130 : f32 to vector<36x128xf32>
    %154 = arith.maximumf %152, %153 : vector<36x128xf32>
    %155 = vector.broadcast %0 : vector<36x1xf32> to vector<36x128xf32>
    %156 = arith.mulf %155, %154 : vector<36x128xf32>
    %c8_131 = arith.constant 8 : index
    %c0_132 = arith.constant 0 : index
    %157 = vector.load %arg10[%c8_131, %c0_132] : memref<52x128xf32, #tpu.memory_space<vmem>>, vector<36x128xf32>
    %158 = arith.truncf %156 : vector<36x128xf32> to vector<36x128xbf16>
    %c0_133 = arith.constant 0 : index
    %c0_134 = arith.constant 0 : index
    %159 = vector.load %arg6[%c0_133, %c0_134] : memref<128x128xbf16, #tpu.memory_space<vmem>>, vector<128x128xbf16>
    %cst_135 = arith.constant dense<0.000000e+00> : vector<36x128xf32>
    %160 = tpu.matmul %158, %159, %cst_135 {dimension_numbers = #tpu.dot_dimension_numbers<[1], [0], [0], [1], [0, 0, 1, 1], [], []>} : vector<36x128xbf16>, vector<128x128xbf16>, vector<36x128xf32> -> vector<36x128xf32>
    %161 = arith.addf %157, %160 : vector<36x128xf32>
    %c8_136 = arith.constant 8 : index
    %c0_137 = arith.constant 0 : index
    %162 = vector.load %arg10[%c8_136, %c0_137] : memref<52x128xf32, #tpu.memory_space<vmem>>, vector<36x128xf32>
    tpu.vector_store %arg10[%c8_136, %c0_137], %161 {strides = array<i32>} : memref<52x128xf32, #tpu.memory_space<vmem>>, vector<36x128xf32>,
    %cst_138 = arith.constant 0.000000e+00 : f32
    %163 = vector.broadcast %cst_138 : f32 to vector<36x128xf32>
    %c1_139 = arith.constant 1 : index
    %c0_140 = arith.constant 0 : index
    %164 = vector.load %arg10[%c1_139, %c0_140] : memref<52x128xf32, #tpu.memory_space<vmem>>, vector<36x128xf32>
    %cst_141 = arith.constant 0.000000e+00 : f32
    %165 = vector.broadcast %cst_141 : f32 to vector<36x128xf32>
    %166 = arith.maximumf %164, %165 : vector<36x128xf32>
    %167 = arith.truncf %166 : vector<36x128xf32> to vector<36x128xbf16>
    %c0_142 = arith.constant 0 : index
    %c0_143 = arith.constant 0 : index
    %c0_144 = arith.constant 0 : index
    %168 = vector.load %arg7[%c0_142, %c0_143, %c0_144] : memref<9x128x128xbf16, #tpu.memory_space<vmem>>, vector<1x128x128xbf16>
    %169 = vector.shape_cast %168 : vector<1x128x128xbf16> to vector<128x128xbf16>
    %cst_145 = arith.constant dense<0.000000e+00> : vector<36x128xf32>
    %170 = tpu.matmul %167, %169, %cst_145 {dimension_numbers = #tpu.dot_dimension_numbers<[1], [0], [0], [1], [0, 0, 1, 1], [], []>} : vector<36x128xbf16>, vector<128x128xbf16>, vector<36x128xf32> -> vector<36x128xf32>
    %171 = arith.addf %163, %170 : vector<36x128xf32>
    %c2_146 = arith.constant 2 : index
    %c0_147 = arith.constant 0 : index
    %172 = vector.load %arg10[%c2_146, %c0_147] : memref<52x128xf32, #tpu.memory_space<vmem>>, vector<36x128xf32>
    %cst_148 = arith.constant 0.000000e+00 : f32
    %173 = vector.broadcast %cst_148 : f32 to vector<36x128xf32>
    %174 = arith.maximumf %172, %173 : vector<36x128xf32>
    %175 = arith.truncf %174 : vector<36x128xf32> to vector<36x128xbf16>
    %c1_149 = arith.constant 1 : index
    %c0_150 = arith.constant 0 : index
    %c0_151 = arith.constant 0 : index
    %176 = vector.load %arg7[%c1_149, %c0_150, %c0_151] : memref<9x128x128xbf16, #tpu.memory_space<vmem>>, vector<1x128x128xbf16>
    %177 = vector.shape_cast %176 : vector<1x128x128xbf16> to vector<128x128xbf16>
    %cst_152 = arith.constant dense<0.000000e+00> : vector<36x128xf32>
    %178 = tpu.matmul %175, %177, %cst_152 {dimension_numbers = #tpu.dot_dimension_numbers<[1], [0], [0], [1], [0, 0, 1, 1], [], []>} : vector<36x128xbf16>, vector<128x128xbf16>, vector<36x128xf32> -> vector<36x128xf32>
    %179 = arith.addf %171, %178 : vector<36x128xf32>
    %c3_153 = arith.constant 3 : index
    %c0_154 = arith.constant 0 : index
    %180 = vector.load %arg10[%c3_153, %c0_154] : memref<52x128xf32, #tpu.memory_space<vmem>>, vector<36x128xf32>
    %cst_155 = arith.constant 0.000000e+00 : f32
    %181 = vector.broadcast %cst_155 : f32 to vector<36x128xf32>
    %182 = arith.maximumf %180, %181 : vector<36x128xf32>
    %183 = arith.truncf %182 : vector<36x128xf32> to vector<36x128xbf16>
    %c2_156 = arith.constant 2 : index
    %c0_157 = arith.constant 0 : index
    %c0_158 = arith.constant 0 : index
    %184 = vector.load %arg7[%c2_156, %c0_157, %c0_158] : memref<9x128x128xbf16, #tpu.memory_space<vmem>>, vector<1x128x128xbf16>
    %185 = vector.shape_cast %184 : vector<1x128x128xbf16> to vector<128x128xbf16>
    %cst_159 = arith.constant dense<0.000000e+00> : vector<36x128xf32>
    %186 = tpu.matmul %183, %185, %cst_159 {dimension_numbers = #tpu.dot_dimension_numbers<[1], [0], [0], [1], [0, 0, 1, 1], [], []>} : vector<36x128xbf16>, vector<128x128xbf16>, vector<36x128xf32> -> vector<36x128xf32>
    %187 = arith.addf %179, %186 : vector<36x128xf32>
    %c7_160 = arith.constant 7 : index
    %c0_161 = arith.constant 0 : index
    %188 = vector.load %arg10[%c7_160, %c0_161] : memref<52x128xf32, #tpu.memory_space<vmem>>, vector<36x128xf32>
    %cst_162 = arith.constant 0.000000e+00 : f32
    %189 = vector.broadcast %cst_162 : f32 to vector<36x128xf32>
    %190 = arith.maximumf %188, %189 : vector<36x128xf32>
    %191 = arith.truncf %190 : vector<36x128xf32> to vector<36x128xbf16>
    %c3_163 = arith.constant 3 : index
    %c0_164 = arith.constant 0 : index
    %c0_165 = arith.constant 0 : index
    %192 = vector.load %arg7[%c3_163, %c0_164, %c0_165] : memref<9x128x128xbf16, #tpu.memory_space<vmem>>, vector<1x128x128xbf16>
    %193 = vector.shape_cast %192 : vector<1x128x128xbf16> to vector<128x128xbf16>
    %cst_166 = arith.constant dense<0.000000e+00> : vector<36x128xf32>
    %194 = tpu.matmul %191, %193, %cst_166 {dimension_numbers = #tpu.dot_dimension_numbers<[1], [0], [0], [1], [0, 0, 1, 1], [], []>} : vector<36x128xbf16>, vector<128x128xbf16>, vector<36x128xf32> -> vector<36x128xf32>
    %195 = arith.addf %187, %194 : vector<36x128xf32>
    %c8_167 = arith.constant 8 : index
    %c0_168 = arith.constant 0 : index
    %196 = vector.load %arg10[%c8_167, %c0_168] : memref<52x128xf32, #tpu.memory_space<vmem>>, vector<36x128xf32>
    %cst_169 = arith.constant 0.000000e+00 : f32
    %197 = vector.broadcast %cst_169 : f32 to vector<36x128xf32>
    %198 = arith.maximumf %196, %197 : vector<36x128xf32>
    %199 = arith.truncf %198 : vector<36x128xf32> to vector<36x128xbf16>
    %c4_170 = arith.constant 4 : index
    %c0_171 = arith.constant 0 : index
    %c0_172 = arith.constant 0 : index
    %200 = vector.load %arg7[%c4_170, %c0_171, %c0_172] : memref<9x128x128xbf16, #tpu.memory_space<vmem>>, vector<1x128x128xbf16>
    %201 = vector.shape_cast %200 : vector<1x128x128xbf16> to vector<128x128xbf16>
    %cst_173 = arith.constant dense<0.000000e+00> : vector<36x128xf32>
    %202 = tpu.matmul %199, %201, %cst_173 {dimension_numbers = #tpu.dot_dimension_numbers<[1], [0], [0], [1], [0, 0, 1, 1], [], []>} : vector<36x128xbf16>, vector<128x128xbf16>, vector<36x128xf32> -> vector<36x128xf32>
    %203 = arith.addf %195, %202 : vector<36x128xf32>
    %c9_174 = arith.constant 9 : index
    %c0_175 = arith.constant 0 : index
    %204 = vector.load %arg10[%c9_174, %c0_175] : memref<52x128xf32, #tpu.memory_space<vmem>>, vector<36x128xf32>
    %cst_176 = arith.constant 0.000000e+00 : f32
    %205 = vector.broadcast %cst_176 : f32 to vector<36x128xf32>
    %206 = arith.maximumf %204, %205 : vector<36x128xf32>
    %207 = arith.truncf %206 : vector<36x128xf32> to vector<36x128xbf16>
    %c5_177 = arith.constant 5 : index
    %c0_178 = arith.constant 0 : index
    %c0_179 = arith.constant 0 : index
    %208 = vector.load %arg7[%c5_177, %c0_178, %c0_179] : memref<9x128x128xbf16, #tpu.memory_space<vmem>>, vector<1x128x128xbf16>
    %209 = vector.shape_cast %208 : vector<1x128x128xbf16> to vector<128x128xbf16>
    %cst_180 = arith.constant dense<0.000000e+00> : vector<36x128xf32>
    %210 = tpu.matmul %207, %209, %cst_180 {dimension_numbers = #tpu.dot_dimension_numbers<[1], [0], [0], [1], [0, 0, 1, 1], [], []>} : vector<36x128xbf16>, vector<128x128xbf16>, vector<36x128xf32> -> vector<36x128xf32>
    %211 = arith.addf %203, %210 : vector<36x128xf32>
    %c13_181 = arith.constant 13 : index
    %c0_182 = arith.constant 0 : index
    %212 = vector.load %arg10[%c13_181, %c0_182] : memref<52x128xf32, #tpu.memory_space<vmem>>, vector<36x128xf32>
    %cst_183 = arith.constant 0.000000e+00 : f32
    %213 = vector.broadcast %cst_183 : f32 to vector<36x128xf32>
    %214 = arith.maximumf %212, %213 : vector<36x128xf32>
    %215 = arith.truncf %214 : vector<36x128xf32> to vector<36x128xbf16>
    %c6_184 = arith.constant 6 : index
    %c0_185 = arith.constant 0 : index
    %c0_186 = arith.constant 0 : index
    %216 = vector.load %arg7[%c6_184, %c0_185, %c0_186] : memref<9x128x128xbf16, #tpu.memory_space<vmem>>, vector<1x128x128xbf16>
    %217 = vector.shape_cast %216 : vector<1x128x128xbf16> to vector<128x128xbf16>
    %cst_187 = arith.constant dense<0.000000e+00> : vector<36x128xf32>
    %218 = tpu.matmul %215, %217, %cst_187 {dimension_numbers = #tpu.dot_dimension_numbers<[1], [0], [0], [1], [0, 0, 1, 1], [], []>} : vector<36x128xbf16>, vector<128x128xbf16>, vector<36x128xf32> -> vector<36x128xf32>
    %219 = arith.addf %211, %218 : vector<36x128xf32>
    %c14_188 = arith.constant 14 : index
    %c0_189 = arith.constant 0 : index
    %220 = vector.load %arg10[%c14_188, %c0_189] : memref<52x128xf32, #tpu.memory_space<vmem>>, vector<36x128xf32>
    %cst_190 = arith.constant 0.000000e+00 : f32
    %221 = vector.broadcast %cst_190 : f32 to vector<36x128xf32>
    %222 = arith.maximumf %220, %221 : vector<36x128xf32>
    %223 = arith.truncf %222 : vector<36x128xf32> to vector<36x128xbf16>
    %c7_191 = arith.constant 7 : index
    %c0_192 = arith.constant 0 : index
    %c0_193 = arith.constant 0 : index
    %224 = vector.load %arg7[%c7_191, %c0_192, %c0_193] : memref<9x128x128xbf16, #tpu.memory_space<vmem>>, vector<1x128x128xbf16>
    %225 = vector.shape_cast %224 : vector<1x128x128xbf16> to vector<128x128xbf16>
    %cst_194 = arith.constant dense<0.000000e+00> : vector<36x128xf32>
    %226 = tpu.matmul %223, %225, %cst_194 {dimension_numbers = #tpu.dot_dimension_numbers<[1], [0], [0], [1], [0, 0, 1, 1], [], []>} : vector<36x128xbf16>, vector<128x128xbf16>, vector<36x128xf32> -> vector<36x128xf32>
    %227 = arith.addf %219, %226 : vector<36x128xf32>
    %c15_195 = arith.constant 15 : index
    %c0_196 = arith.constant 0 : index
    %228 = vector.load %arg10[%c15_195, %c0_196] : memref<52x128xf32, #tpu.memory_space<vmem>>, vector<36x128xf32>
    %cst_197 = arith.constant 0.000000e+00 : f32
    %229 = vector.broadcast %cst_197 : f32 to vector<36x128xf32>
    %230 = arith.maximumf %228, %229 : vector<36x128xf32>
    %231 = arith.truncf %230 : vector<36x128xf32> to vector<36x128xbf16>
    %c8_198 = arith.constant 8 : index
    %c0_199 = arith.constant 0 : index
    %c0_200 = arith.constant 0 : index
    %232 = vector.load %arg7[%c8_198, %c0_199, %c0_200] : memref<9x128x128xbf16, #tpu.memory_space<vmem>>, vector<1x128x128xbf16>
    %233 = vector.shape_cast %232 : vector<1x128x128xbf16> to vector<128x128xbf16>
    %cst_201 = arith.constant dense<0.000000e+00> : vector<36x128xf32>
    %234 = tpu.matmul %231, %233, %cst_201 {dimension_numbers = #tpu.dot_dimension_numbers<[1], [0], [0], [1], [0, 0, 1, 1], [], []>} : vector<36x128xbf16>, vector<128x128xbf16>, vector<36x128xf32> -> vector<36x128xf32>
    %235 = arith.addf %227, %234 : vector<36x128xf32>
    %cst_202 = arith.constant 0.000000e+00 : f32
    %236 = vector.broadcast %cst_202 : f32 to vector<36x128xf32>
    %237 = arith.maximumf %235, %236 : vector<36x128xf32>
    %238 = vector.broadcast %0 : vector<36x1xf32> to vector<36x128xf32>
    %239 = arith.mulf %238, %237 : vector<36x128xf32>
    %c8_203 = arith.constant 8 : index
    %c0_204 = arith.constant 0 : index
    %240 = vector.load %arg10[%c8_203, %c0_204] : memref<52x128xf32, #tpu.memory_space<vmem>>, vector<36x128xf32>
    %241 = arith.truncf %239 : vector<36x128xf32> to vector<36x128xbf16>
    %c0_205 = arith.constant 0 : index
    %c0_206 = arith.constant 0 : index
    %242 = vector.load %arg8[%c0_205, %c0_206] : memref<128x128xbf16, #tpu.memory_space<vmem>>, vector<128x128xbf16>
    %cst_207 = arith.constant dense<0.000000e+00> : vector<36x128xf32>
    %243 = tpu.matmul %241, %242, %cst_207 {dimension_numbers = #tpu.dot_dimension_numbers<[1], [0], [0], [1], [0, 0, 1, 1], [], []>} : vector<36x128xbf16>, vector<128x128xbf16>, vector<36x128xf32> -> vector<36x128xf32>
    %244 = arith.addf %240, %243 : vector<36x128xf32>
    %cst_208 = arith.constant 0.000000e+00 : f32
    %245 = vector.broadcast %cst_208 : f32 to vector<36x128xf32>
    %246 = arith.maximumf %244, %245 : vector<36x128xf32>
    %c8_209 = arith.constant 8 : index
    %c0_210 = arith.constant 0 : index
    %247 = vector.load %arg10[%c8_209, %c0_210] : memref<52x128xf32, #tpu.memory_space<vmem>>, vector<36x128xf32>
    tpu.vector_store %arg10[%c8_209, %c0_210], %246 {strides = array<i32>} : memref<52x128xf32, #tpu.memory_space<vmem>>, vector<36x128xf32>,
    %c15_211 = arith.constant 15 : index
    %c0_212 = arith.constant 0 : index
    %248 = vector.load %arg10[%c15_211, %c0_212] : memref<52x128xf32, #tpu.memory_space<vmem>>, vector<4x128xf32>
    %c0_213 = arith.constant 0 : index
    %c0_214 = arith.constant 0 : index
    %c0_215 = arith.constant 0 : index
    %249 = vector.load %arg9[%c0_213, %c0_214, %c0_215] : memref<1x16x128xf32, #tpu.memory_space<vmem>>, vector<1x4x128xf32>
    %250 = vector.shape_cast %249 : vector<1x4x128xf32> to vector<4x128xf32>
    %251 = vector.shape_cast %248 : vector<4x128xf32> to vector<1x4x128xf32>
    tpu.vector_store %arg9[%c0_213, %c0_214, %c0_215], %251 {strides = array<i32>} : memref<1x16x128xf32, #tpu.memory_space<vmem>>, vector<1x4x128xf32>,
    %c21_216 = arith.constant 21 : index
    %c0_217 = arith.constant 0 : index
    %252 = vector.load %arg10[%c21_216, %c0_217] : memref<52x128xf32, #tpu.memory_space<vmem>>, vector<4x128xf32>
    %c0_218 = arith.constant 0 : index
    %c4_219 = arith.constant 4 : index
    %c0_220 = arith.constant 0 : index
    %253 = vector.load %arg9[%c0_218, %c4_219, %c0_220] : memref<1x16x128xf32, #tpu.memory_space<vmem>>, vector<1x4x128xf32>
    %254 = vector.shape_cast %253 : vector<1x4x128xf32> to vector<4x128xf32>
    %255 = vector.shape_cast %252 : vector<4x128xf32> to vector<1x4x128xf32>
    tpu.vector_store %arg9[%c0_218, %c4_219, %c0_220], %255 {strides = array<i32>} : memref<1x16x128xf32, #tpu.memory_space<vmem>>, vector<1x4x128xf32>,
    %c27_221 = arith.constant 27 : index
    %c0_222 = arith.constant 0 : index
    %256 = vector.load %arg10[%c27_221, %c0_222] : memref<52x128xf32, #tpu.memory_space<vmem>>, vector<4x128xf32>
    %c0_223 = arith.constant 0 : index
    %c8_224 = arith.constant 8 : index
    %c0_225 = arith.constant 0 : index
    %257 = vector.load %arg9[%c0_223, %c8_224, %c0_225] : memref<1x16x128xf32, #tpu.memory_space<vmem>>, vector<1x4x128xf32>
    %258 = vector.shape_cast %257 : vector<1x4x128xf32> to vector<4x128xf32>
    %259 = vector.shape_cast %256 : vector<4x128xf32> to vector<1x4x128xf32>
    tpu.vector_store %arg9[%c0_223, %c8_224, %c0_225], %259 {strides = array<i32>} : memref<1x16x128xf32, #tpu.memory_space<vmem>>, vector<1x4x128xf32>,
    %c33_226 = arith.constant 33 : index
    %c0_227 = arith.constant 0 : index
    %260 = vector.load %arg10[%c33_226, %c0_227] : memref<52x128xf32, #tpu.memory_space<vmem>>, vector<4x128xf32>
    %c0_228 = arith.constant 0 : index
    %c12_229 = arith.constant 12 : index
    %c0_230 = arith.constant 0 : index
    %261 = vector.load %arg9[%c0_228, %c12_229, %c0_230] : memref<1x16x128xf32, #tpu.memory_space<vmem>>, vector<1x4x128xf32>
    %262 = vector.shape_cast %261 : vector<1x4x128xf32> to vector<4x128xf32>
    %263 = vector.shape_cast %260 : vector<4x128xf32> to vector<1x4x128xf32>
    tpu.vector_store %arg9[%c0_228, %c12_229, %c0_230], %263 {strides = array<i32>} : memref<1x16x128xf32, #tpu.memory_space<vmem>>, vector<1x4x128xf32>,
    return
  }
  func.func @transform_0(%arg0: i32) -> (i32, i32, i32) {
    %c0_i32 = arith.constant 0 : i32
    %c0_i32_0 = arith.constant 0 : i32
    %c0_i32_1 = arith.constant 0 : i32
    return %arg0, %c0_i32, %c0_i32_0 : i32, i32, i32
  }
  func.func @transform_1(%arg0: i32) -> (i32, i32) {
    %c0_i32 = arith.constant 0 : i32
    %c0_i32_0 = arith.constant 0 : i32
    %c0_i32_1 = arith.constant 0 : i32
    return %c0_i32, %c0_i32_0 : i32, i32
  }
  func.func @transform_2(%arg0: i32) -> (i32, i32) {
    %c0_i32 = arith.constant 0 : i32
    %c0_i32_0 = arith.constant 0 : i32
    %c0_i32_1 = arith.constant 0 : i32
    return %c0_i32, %c0_i32_0 : i32, i32
  }
  func.func @transform_3(%arg0: i32) -> (i32, i32, i32) {
    %c0_i32 = arith.constant 0 : i32
    %c0_i32_0 = arith.constant 0 : i32
    %c0_i32_1 = arith.constant 0 : i32
    %c0_i32_2 = arith.constant 0 : i32
    return %c0_i32, %c0_i32_0, %c0_i32_1 : i32, i32, i32
  }
  func.func @transform_4(%arg0: i32) -> (i32, i32, i32) {
    %c0_i32 = arith.constant 0 : i32
    %c0_i32_0 = arith.constant 0 : i32
    %c0_i32_1 = arith.constant 0 : i32
    %c0_i32_2 = arith.constant 0 : i32
    return %c0_i32, %c0_i32_0, %c0_i32_1 : i32, i32, i32
  }
  func.func @transform_5(%arg0: i32) -> (i32, i32) {
    %c0_i32 = arith.constant 0 : i32
    %c0_i32_0 = arith.constant 0 : i32
    %c0_i32_1 = arith.constant 0 : i32
    return %c0_i32, %c0_i32_0 : i32, i32
  }
  func.func @transform_6(%arg0: i32) -> (i32, i32, i32) {
    %c0_i32 = arith.constant 0 : i32
    %c0_i32_0 = arith.constant 0 : i32
    %c0_i32_1 = arith.constant 0 : i32
    %c0_i32_2 = arith.constant 0 : i32
    return %c0_i32, %c0_i32_0, %c0_i32_1 : i32, i32, i32
  }
  func.func @transform_7(%arg0: i32) -> (i32, i32) {
    %c0_i32 = arith.constant 0 : i32
    %c0_i32_0 = arith.constant 0 : i32
    %c0_i32_1 = arith.constant 0 : i32
    return %c0_i32, %c0_i32_0 : i32, i32
  }
  func.func @transform_8(%arg0: i32) -> (i32, i32, i32) {
    %c0_i32 = arith.constant 0 : i32
    %c0_i32_0 = arith.constant 0 : i32
    %c0_i32_1 = arith.constant 0 : i32
    return %arg0, %c0_i32, %c0_i32_0 : i32, i32, i32
  }
}

</mosaic_0001>

<bundles_post_ra>
// kernel: vqvae_encoder_forward.3
= control target key start
LH: loop header
LB: loop body
LE: loop exit
PB: predicated region body
PF: predicated region fallthrough
CT: control target
= control target key end

     0   :  { %s496_s12 = smov 0   ;;  %s527_s0 = inlined_call_operand.vmem [shape: bf16[128,16], index: 0, kind: input, shape index: {}]   ;;  %s528_s1 = inlined_call_operand.vmem [shape: bf16[16,64], index: 1, kind: input, shape index: {}]   ;;  %s529_s2 = inlined_call_operand.vmem [shape: f32[1,64], index: 2, kind: input, shape index: {}]   ;;  %s530_s3 = inlined_call_operand.vmem [shape: bf16[128,64], index: 3, kind: output, shape index: {}]  }
   0x1 LB: > { %s401_s13 = sadd.s32 4294967295, %s474_s12   ;;  %p405_p0 = scmp.ge.s32.totalorder %s474_s12, 1  ;;  %s474_s12 = sphi %s496_s12, %s13_s12  }
   0x2   : > { %p138_p1 = scmp.lt.s32.totalorder %s474_s12, 3 }
   0x4   : > { %p139_p2 = pnand %p405_p0, %p138_p1 }
   0x5   : > { %v463_v0 = vld [vmem:[%s528_s1] sm:$0xff] (!%p139_p2)   ;;  %s406_s16 = sshll.u32 (!%p139_p2), %s401_s13, 3  ;;  %vm218_vm0 = vcmask (!%p139_p2), 130048   ;;  %vm336_vm1 = vcmask (!%p139_p2), 519168  }
   0x6   : > { %142 = sbr.rel (%p139_p2) target bundleno = 240 (0xf0), region = 32  ;;  %p163_p3 = scmp.lt.s32.totalorder (!%p139_p2), %s406_s16, 15  ;;  %443 = vmatprep.subr.bf16.mxu0 (!%p139_p2), %v463_v0  ;;  %453 = vmatprep.subr.bf16.mxu1 (!%p139_p2), %v463_v0  ;;  %v410_v5 = vld [vmem:[%s529_s2] ss:$0 sm:$0xff] (!%p139_p2) }
   0x7   : > { %444 = vmatpush3.bf16.msra.mxu0 (!%p139_p2), %v463_v0  ;;  %454 = vmatpush3.bf16.msra.mxu1 (!%p139_p2), %v463_v0 }
   0xd   : > { %s532_s16 = smov (!%p163_p3, %s406_s16), 15 }
   0xe   : > { %s407_s17 = sshll.u32 %s532_s16, 2 }
   0xf   : > { %s166_s20 = scalar_lea.vmem %s527_s0, %s407_s17  ;;  %s172_s25 = scalar_lea.vmem %s530_s3, %s407_s17 }
  0x10   : > { %v464_v1 = vld [vmem:[%s166_s20] sm:$0xff]   ;;  %v465_v2 = vld [vmem:[%s166_s20 + $0x10] sm:$0xff]   ;;  %v466_v3 = vld [vmem:[%s166_s20 + $0x8] sm:$0xff]  }
  0x11   : > { %445 = vmatprep.mubr.msk.bf16.mxu0 %vm218_vm0, %v464_v1  ;;  %449 = vmatprep.mubr.msk.bf16.mxu1 %vm218_vm0, %v465_v2  ;;  %v467_v4 = vld [vmem:[%s166_s20 + $0x18] sm:$0xff]  }
  0x12   : > { %446 = vmatmul.mubr.msk.bf16.vlgmr.msra.gmra.mrb[0].mxu0 %vm218_vm0, %v466_v3  ;;  %450 = vmatmul.mubr.msk.bf16.vlgmr.msra.gmra.mrb[0].mxu1 %vm218_vm0, %v467_v4 }
  0xe5   : > { %v447_v6 = vpop.f32.mrb[0].mxu0  ;;  %v451_v8 = vpop.f32.mrb[0].mxu1 }
  0xe6   : > { %v274_v7 = vadd.f32 %v447_v6, %v410_v5  ;;  %v265_v9 = vpop.f32.mrb[1].mxu0  ;;  %v290_v10 = vadd.f32 %v451_v8, %v410_v5  ;;  %v281_v12 = vpop.f32.mrb[1].mxu1 }
  0xe7   : > { %v266_v11 = vadd.f32 %v410_v5, %v265_v9  ;;  %v448_v13 = vpop.f32.mrb[2].mxu0  ;;  %v282_v15 = vadd.f32 %v410_v5, %v281_v12  ;;  %v452_v17 = vpop.f32.mrb[2].mxu1 }
  0xe8   : > { %v298_v14 = vmax.f32 %v274_v7, 0.0  ;;  %v277_v16 = vadd.f32 %v448_v13, %v410_v5  ;;  %v268_v18 = vpop.f32.mrb[3].mxu0  ;;  %v302_v19 = vmax.f32 %v290_v10, 0.0  ;;  %v293_v21 = vadd.f32 %v452_v17, %v410_v5  ;;  %v284_v23 = vpop.f32.mrb[3].mxu1 }
  0xe9   : > { %v296_v20 = vmax.f32 %v266_v11, 0.0  ;;  %v269_v22 = vadd.f32 %v410_v5, %v268_v18  ;;  %v300_v25 = vmax.f32 %v282_v15, 0.0  ;;  %v285_v27 = vadd.f32 %v410_v5, %v284_v23 }
  0xea   : > { %v432_v24 = vpack.c.bf16 %v298_v14, %v298_v14  ;;  %v299_v26 = vmax.f32 %v277_v16, 0.0  ;;  %v436_v28 = vpack.c.bf16 %v302_v19, %v302_v19  ;;  %v303_v30 = vmax.f32 %v293_v21, 0.0 }
  0xeb   : > { %v430_v29 = vpack.c.bf16 %v296_v20, %v296_v20  ;;  %v297_v31 = vmax.f32 %v269_v22, 0.0  ;;  %v434_v32 = vpack.c.bf16 %v300_v25, %v300_v25  ;;  %v301_v34 = vmax.f32 %v285_v27, 0.0 }
  0xec   : > { %339 = vst.msk [vmem:[%s172_s25 + $0x8] sm:$0xf] %vm336_vm1, %v432_v24  ;;  %v433_v33 = vpack.c.bf16 %v299_v26, %v299_v26  ;;  %343 = vst.msk [vmem:[%s172_s25 + $0x18] sm:$0xf] %vm336_vm1, %v436_v28  ;;  %v437_v35 = vpack.c.bf16 %v303_v30, %v303_v30 }
  0xed   : > { %337 = vst.msk [vmem:[%s172_s25] sm:$0xf] %vm336_vm1, %v430_v29  ;;  %v431_v36 = vpack.c.bf16 %v297_v31, %v297_v31  ;;  %341 = vst.msk [vmem:[%s172_s25 + $0x10] sm:$0xf] %vm336_vm1, %v434_v32  ;;  %v435_v37 = vpack.c.bf16 %v301_v34, %v301_v34 }
  0xee   : > { %340 = vst.msk [vmem:[%s172_s25 + $0xc] sm:$0xf] %vm336_vm1, %v433_v33  ;;  %344 = vst.msk [vmem:[%s172_s25 + $0x1c] sm:$0xf] %vm336_vm1, %v437_v35 }
  0xef   : > { %338 = vst.msk [vmem:[%s172_s25 + $0x4] sm:$0xf] %vm336_vm1, %v431_v36  ;;  %342 = vst.msk [vmem:[%s172_s25 + $0x14] sm:$0xf] %vm336_vm1, %v435_v37 }
  0xf0 PF: > { %s13_s12 = sadd.s32 1, %s474_s12  }
  0xf1   : > { %p10_p4 = scmp.ge.s32.totalorder %s13_s12, 4  }
  0xf3   :  { %12 = sbr.rel (!%p10_p4) target bundleno = 1 (0x1), region = 62 }

// kernel: vqvae_encoder_forward.4
= control target key start
LH: loop header
LB: loop body
LE: loop exit
PB: predicated region body
PF: predicated region fallthrough
CT: control target
= control target key end

     0   :  { %s1260_s12 = smov 0   ;;  %s1488_s0 = inlined_call_operand.vmem [shape: bf16[32,1024], index: 0, kind: input, shape index: {}]   ;;  %s1489_s1 = inlined_call_operand.vmem [shape: bf16[1024,128], index: 1, kind: input, shape index: {}]   ;;  %s1490_s2 = inlined_call_operand.vmem [shape: f32[1,128], index: 2, kind: input, shape index: {}]   ;;  %s1491_s3 = inlined_call_operand.vmem [shape: bf16[32,128], index: 3, kind: output, shape index: {}]  }
   0x1 LB: > { %s977_s13 = sadd.s32 4294967295, %s1238_s12   ;;  %p981_p0 = scmp.ge.s32.totalorder %s1238_s12, 1  ;;  %s1238_s12 = sphi %s1260_s12, %s13_s12  }
   0x2   : > { %p139_p1 = scmp.lt.s32.totalorder %s1238_s12, 3 }
   0x4   : > { %p140_p2 = pnand %p981_p0, %p139_p1 }
   0x5   : > { %v1168_v0 = vld [vmem:[%s1489_s1 + $0x40] sm:$0xff] (!%p140_p2)   ;;  %v1172_v4 = vld [vmem:[%s1489_s1 + $0x48] sm:$0xff] (!%p140_p2)   ;;  %v1176_v8 = vld [vmem:[%s1489_s1 + $0x50] sm:$0xff] (!%p140_p2)   ;;  %s982_s21 = sshll.u32 (!%p140_p2), %s977_s13, 1 }
   0x6   : > { %143 = sbr.rel (%p140_p2) target bundleno = 297 (0x129), region = 32  ;;  %v1169_v1 = vld [vmem:[%s1489_s1 + $0xc0] sm:$0xff] (!%p140_p2)   ;;  %1072 = vmatprep.subr.bf16.mxu0 (!%p140_p2), %v1168_v0  ;;  %v1173_v5 = vld [vmem:[%s1489_s1 + $0xc8] sm:$0xff] (!%p140_p2)   ;;  %v1177_v9 = vld [vmem:[%s1489_s1 + $0xd0] sm:$0xff] (!%p140_p2)   ;;  %p165_p3 = scmp.lt.s32.totalorder (!%p140_p2), %s982_s21, 3 }
   0x7   : > { %v1170_v2 = vld [vmem:[%s1489_s1] sm:$0xff] (!%p140_p2)   ;;  %1094 = vmatprep.subr.bf16.mxu1 (!%p140_p2), %v1169_v1  ;;  %v1174_v6 = vld [vmem:[%s1489_s1 + $0x8] sm:$0xff] (!%p140_p2)   ;;  %v1178_v10 = vld [vmem:[%s1489_s1 + $0x10] sm:$0xff] (!%p140_p2)  }
   0x8   : > { %v1171_v3 = vld [vmem:[%s1489_s1 + $0x80] sm:$0xff] (!%p140_p2)   ;;  %1073 = vmatpush3.bf16.msra.mxu0 (!%p140_p2), %v1170_v2  ;;  %v1175_v7 = vld [vmem:[%s1489_s1 + $0x88] sm:$0xff] (!%p140_p2)   ;;  %v1179_v11 = vld [vmem:[%s1489_s1 + $0x90] sm:$0xff] (!%p140_p2)  }
   0x9   : > { %1095 = vmatpush3.bf16.msra.mxu1 (!%p140_p2), %v1171_v3  ;;  %1074 = vmatprep.subr.bf16.mxu0 (!%p140_p2), %v1172_v4  ;;  %v1180_v12 = vld [vmem:[%s1489_s1 + $0x58] sm:$0xff] (!%p140_p2)   ;;  %v1184_v16 = vld [vmem:[%s1489_s1 + $0x60] sm:$0xff] (!%p140_p2)   ;;  %v1188_v20 = vld [vmem:[%s1489_s1 + $0x68] sm:$0xff] (!%p140_p2)  }
   0xa   : > { %1096 = vmatprep.subr.bf16.mxu1 (!%p140_p2), %v1173_v5  ;;  %v1181_v13 = vld [vmem:[%s1489_s1 + $0xd8] sm:$0xff] (!%p140_p2)   ;;  %v1185_v17 = vld [vmem:[%s1489_s1 + $0xe0] sm:$0xff] (!%p140_p2)   ;;  %v1189_v21 = vld [vmem:[%s1489_s1 + $0xe8] sm:$0xff] (!%p140_p2)  }
   0xb   : > { %v1182_v14 = vld [vmem:[%s1489_s1 + $0x18] sm:$0xff] (!%p140_p2)   ;;  %v1186_v18 = vld [vmem:[%s1489_s1 + $0x20] sm:$0xff] (!%p140_p2)   ;;  %v1190_v22 = vld [vmem:[%s1489_s1 + $0x28] sm:$0xff] (!%p140_p2)  }
   0xc   : > { %1075 = vmatpush3.bf16.msra.mxu0 (!%p140_p2), %v1174_v6  ;;  %v1183_v15 = vld [vmem:[%s1489_s1 + $0x98] sm:$0xff] (!%p140_p2)   ;;  %v1187_v19 = vld [vmem:[%s1489_s1 + $0xa0] sm:$0xff] (!%p140_p2)   ;;  %v1191_v23 = vld [vmem:[%s1489_s1 + $0xa8] sm:$0xff] (!%p140_p2)  }
   0xd   : > { %1097 = vmatpush3.bf16.msra.mxu1 %v1175_v7  ;;  %1076 = vmatprep.subr.bf16.mxu0 %v1176_v8  ;;  %s1493_s21 = smov (!%p165_p3, %s982_s21), 3  ;;  %v1192_v24 = vld [vmem:[%s1489_s1 + $0x70] sm:$0xff]   ;;  %v1196_v28 = vld [vmem:[%s1489_s1 + $0x78] sm:$0xff]   ;;  %v1200_v40 = vld [vmem:[%s1489_s1 + $0x140] sm:$0xff]  }
   0xe   : > { %1098 = vmatprep.subr.bf16.mxu1 %v1177_v9  ;;  %v1193_v25 = vld [vmem:[%s1489_s1 + $0xf0] sm:$0xff]   ;;  %s1064_s18 = sshll.u32 %s1493_s21, 5  ;;  %v1197_v29 = vld [vmem:[%s1489_s1 + $0xf8] sm:$0xff]   ;;  %v1201_v41 = vld [vmem:[%s1489_s1 + $0x1c0] sm:$0xff]  }
   0xf   : > { %v1194_v26 = vld [vmem:[%s1489_s1 + $0x30] sm:$0xff]   ;;  %s1366_s28 = scalar_lea.vmem %s1488_s0, %s1064_s18  ;;  %v1198_v30 = vld [vmem:[%s1489_s1 + $0x38] sm:$0xff]   ;;  %v1202_v42 = vld [vmem:[%s1489_s1 + $0x100] sm:$0xff]  }
  0x10   : > { %1077 = vmatpush3.bf16.msra.mxu0 %v1178_v10  ;;  %v1195_v27 = vld [vmem:[%s1489_s1 + $0xb0] sm:$0xff]   ;;  %v1199_v31 = vld [vmem:[%s1489_s1 + $0xb8] sm:$0xff]   ;;  %v178_v32 = vld [vmem:[%s1366_s28] sm:$0xff] }
  0x11   : > { %1099 = vmatpush3.bf16.msra.mxu1 %v1179_v11  ;;  %1078 = vmatprep.subr.bf16.mxu0 %v1180_v12  ;;  %v182_v33 = vld [vmem:[%s1366_s28 + $0x20] sm:$0xff]  ;;  %v179_v34 = vld [vmem:[%s1366_s28 + $0x8] sm:$0xff]  ;;  %v1208_v48 = vld [vmem:[%s1489_s1 + $0x150] sm:$0xff]  }
  0x12   : > { %1100 = vmatprep.subr.bf16.mxu1 %v1181_v13  ;;  %v988_v35 = vcombine.low %v178_v32, %v182_v33  ;;  %v989_v36 = vcombine.high %v178_v32, %v182_v33  ;;  %v183_v37 = vld [vmem:[%s1366_s28 + $0x28] sm:$0xff]  ;;  %v1203_v43 = vld [vmem:[%s1489_s1 + $0x180] sm:$0xff]   ;;  %v1209_v49 = vld [vmem:[%s1489_s1 + $0x1d0] sm:$0xff]  }
  0x13   : > { %v990_v38 = vcombine.low %v179_v34, %v183_v37  ;;  %v991_v39 = vcombine.high %v179_v34, %v183_v37  ;;  %v1204_v44 = vld [vmem:[%s1489_s1 + $0x148] sm:$0xff]   ;;  %v1210_v50 = vld [vmem:[%s1489_s1 + $0x110] sm:$0xff]   ;;  %v1212_v52 = vld [vmem:[%s1489_s1 + $0x158] sm:$0xff]  }
  0x14   : > { %1079 = vmatpush3.bf16.msra.mxu0 %v1182_v14  ;;  %777 = vmatprep.mubr.bf16.mxu0 %v989_v36  ;;  %v1205_v45 = vld [vmem:[%s1489_s1 + $0x1c8] sm:$0xff]   ;;  %v1211_v51 = vld [vmem:[%s1489_s1 + $0x190] sm:$0xff]   ;;  %v1213_v53 = vld [vmem:[%s1489_s1 + $0x1d8] sm:$0xff]  }
  0x15   : > { %1101 = vmatpush3.bf16.msra.mxu1 %v1183_v15  ;;  %1080 = vmatprep.subr.bf16.mxu0 %v1184_v16  ;;  %v1206_v46 = vld [vmem:[%s1489_s1 + $0x108] sm:$0xff]   ;;  %v1214_v54 = vld [vmem:[%s1489_s1 + $0x118] sm:$0xff]   ;;  %v1216_v56 = vld [vmem:[%s1489_s1 + $0x160] sm:$0xff]  }
  0x16   : > { %1102 = vmatprep.subr.bf16.mxu1 %v1185_v17  ;;  %818 = vmatprep.mubr.bf16.mxu1 %v991_v39  ;;  %v1207_v47 = vld [vmem:[%s1489_s1 + $0x188] sm:$0xff]   ;;  %v1215_v55 = vld [vmem:[%s1489_s1 + $0x198] sm:$0xff]   ;;  %v1217_v57 = vld [vmem:[%s1489_s1 + $0x1e0] sm:$0xff]  }
  0x17   : > { %v1218_v58 = vld [vmem:[%s1489_s1 + $0x120] sm:$0xff]   ;;  %v1220_v60 = vld [vmem:[%s1489_s1 + $0x168] sm:$0xff]   ;;  %v1224_v0 = vld [vmem:[%s1489_s1 + $0x170] sm:$0xff]  }
  0x18   : > { %1081 = vmatpush3.bf16.msra.mxu0 %v1186_v18  ;;  %v1219_v59 = vld [vmem:[%s1489_s1 + $0x1a0] sm:$0xff]   ;;  %v1221_v61 = vld [vmem:[%s1489_s1 + $0x1e8] sm:$0xff]   ;;  %v1225_v1 = vld [vmem:[%s1489_s1 + $0x1f0] sm:$0xff]  }
  0x19   : > { %1103 = vmatpush3.bf16.msra.mxu1 %v1187_v19  ;;  %1082 = vmatprep.subr.bf16.mxu0 %v1188_v20  ;;  %v1222_v62 = vld [vmem:[%s1489_s1 + $0x128] sm:$0xff]   ;;  %v1226_v2 = vld [vmem:[%s1489_s1 + $0x130] sm:$0xff]   ;;  %v1228_v4 = vld [vmem:[%s1489_s1 + $0x178] sm:$0xff]  }
  0x1a   : > { %1104 = vmatprep.subr.bf16.mxu1 %v1189_v21  ;;  %v1223_v63 = vld [vmem:[%s1489_s1 + $0x1a8] sm:$0xff]   ;;  %v1227_v3 = vld [vmem:[%s1489_s1 + $0x1b0] sm:$0xff]   ;;  %v1229_v5 = vld [vmem:[%s1489_s1 + $0x1f8] sm:$0xff]  }
  0x1b   : > { %v1230_v6 = vld [vmem:[%s1489_s1 + $0x138] sm:$0xff]   ;;  %v180_v8 = vld [vmem:[%s1366_s28 + $0x10] sm:$0xff]  ;;  %v987_v18 = vld [vmem:[%s1490_s2] ss:$0 sm:$0xff] }
  0x1c   : > { %1083 = vmatpush3.bf16.msra.mxu0 %v1190_v22  ;;  %v1231_v7 = vld [vmem:[%s1489_s1 + $0x1b8] sm:$0xff]   ;;  %v184_v9 = vld [vmem:[%s1366_s28 + $0x30] sm:$0xff] }
  0x1d   : > { %1105 = vmatpush3.bf16.msra.mxu1 %v1191_v23  ;;  %1084 = vmatprep.subr.bf16.mxu0 %v1192_v24  ;;  %v992_v10 = vcombine.low %v180_v8, %v184_v9  ;;  %v993_v11 = vcombine.high %v180_v8, %v184_v9  ;;  %v181_v12 = vld [vmem:[%s1366_s28 + $0x18] sm:$0xff] }
  0x1e   : > { %1106 = vmatprep.subr.bf16.mxu1 %v1193_v25  ;;  %v185_v13 = vld [vmem:[%s1366_s28 + $0x38] sm:$0xff]  ;;  %s986_s28 = sshll.u32 %s1493_s21, 2 }
  0x1f   : > { %v994_v14 = vcombine.low %v181_v12, %v185_v13  ;;  %v995_v15 = vcombine.high %v181_v12, %v185_v13  ;;  %s175_s29 = scalar_lea.vmem %s1491_s3, %s986_s28 }
  0x20   : > { %1085 = vmatpush3.bf16.msra.mxu0 %v1194_v26 }
  0x21   : > { %1107 = vmatpush3.bf16.msra.mxu1 %v1195_v27  ;;  %1086 = vmatprep.subr.bf16.mxu0 %v1196_v28 }
  0x22   : > { %1108 = vmatprep.subr.bf16.mxu1 %v1197_v29 }
  0x24   : > { %1087 = vmatpush3.bf16.msra.mxu0 %v1198_v30 }
  0x25   : > { %1109 = vmatpush3.bf16.msra.mxu1 %v1199_v31  ;;  %1116 = vmatprep.subr.bf16.mxu0 %v1200_v40 }
  0x26   : > { %1138 = vmatprep.subr.bf16.mxu1 %v1201_v41 }
  0x27   : > { %778 = vmatmul.mubr.bf16.vlgmr.msra.gmra.mrb[0].mxu0 %v988_v35 }
  0x28   : > { %819 = vmatmul.mubr.bf16.vlgmr.msra.gmra.mrb[0].mxu1 %v990_v38  ;;  %1117 = vmatpush3.bf16.msra.mxu0 %v1202_v42 }
  0x29   : > { %1139 = vmatpush3.bf16.msra.mxu1 %v1203_v43  ;;  %1118 = vmatprep.subr.bf16.mxu0 %v1204_v44 }
  0x2a   : > { %1140 = vmatprep.subr.bf16.mxu1 %v1205_v45  ;;  %859 = vmatprep.mubr.bf16.mxu0 %v993_v11 }
  0x2b   : > { %900 = vmatprep.mubr.bf16.mxu1 %v995_v15 }
  0x2c   : > { %1119 = vmatpush3.bf16.msra.mxu0 %v1206_v46 }
  0x2d   : > { %1141 = vmatpush3.bf16.msra.mxu1 %v1207_v47  ;;  %1120 = vmatprep.subr.bf16.mxu0 %v1208_v48 }
  0x2e   : > { %1142 = vmatprep.subr.bf16.mxu1 %v1209_v49 }
  0x30   : > { %1121 = vmatpush3.bf16.msra.mxu0 %v1210_v50 }
  0x31   : > { %1143 = vmatpush3.bf16.msra.mxu1 %v1211_v51  ;;  %1122 = vmatprep.subr.bf16.mxu0 %v1212_v52 }
  0x32   : > { %1144 = vmatprep.subr.bf16.mxu1 %v1213_v53 }
  0x34   : > { %1123 = vmatpush3.bf16.msra.mxu0 %v1214_v54 }
  0x35   : > { %1145 = vmatpush3.bf16.msra.mxu1 %v1215_v55  ;;  %1124 = vmatprep.subr.bf16.mxu0 %v1216_v56 }
  0x36   : > { %1146 = vmatprep.subr.bf16.mxu1 %v1217_v57 }
  0x38   : > { %1125 = vmatpush3.bf16.msra.mxu0 %v1218_v58 }
  0x39   : > { %1147 = vmatpush3.bf16.msra.mxu1 %v1219_v59  ;;  %1126 = vmatprep.subr.bf16.mxu0 %v1220_v60 }
  0x3a   : > { %1148 = vmatprep.subr.bf16.mxu1 %v1221_v61 }
  0x3c   : > { %1127 = vmatpush3.bf16.msra.mxu0 %v1222_v62 }
  0x3d   : > { %1149 = vmatpush3.bf16.msra.mxu1 %v1223_v63  ;;  %1128 = vmatprep.subr.bf16.mxu0 %v1224_v0 }
  0x3e   : > { %1150 = vmatprep.subr.bf16.mxu1 %v1225_v1 }
  0x40   : > { %1129 = vmatpush3.bf16.msra.mxu0 %v1226_v2 }
  0x41   : > { %1151 = vmatpush3.bf16.msra.mxu1 %v1227_v3  ;;  %1130 = vmatprep.subr.bf16.mxu0 %v1228_v4 }
  0x42   : > { %1152 = vmatprep.subr.bf16.mxu1 %v1229_v5 }
  0x44   : > { %1131 = vmatpush3.bf16.msra.mxu0 %v1230_v6 }
  0x45   : > { %1153 = vmatpush3.bf16.msra.mxu1 %v1231_v7 }
  0x47   : > { %860 = vmatmul.mubr.bf16.vlgmr.msra.gmra.mrb[4].mxu0 %v992_v10 }
  0x48   : > { %901 = vmatmul.mubr.bf16.vlgmr.msra.gmra.mrb[4].mxu1 %v994_v14 }
  0xfa   : > { %v1088_v16 = vpop.f32.mrb[0].mxu0 }
  0xfb   : > { %v1110_v17 = vpop.f32.mrb[0].mxu1  ;;  %v1089_v19 = vpop.f32.mrb[1].mxu0 }
  0xfc   : > { %v1090_v20 = vadd.f32 %v1089_v19, %v1088_v16  ;;  %v1111_v21 = vpop.f32.mrb[1].mxu1  ;;  %v1091_v22 = vpop.f32.mrb[2].mxu0 }
  0xfd   : > { %v1112_v23 = vadd.f32 %v1111_v21, %v1110_v17  ;;  %v1113_v24 = vpop.f32.mrb[2].mxu1  ;;  %v1092_v25 = vpop.f32.mrb[3].mxu0 }
  0xfe   : > { %v780_v26 = vadd.f32 %v1090_v20, %v987_v18  ;;  %v1093_v27 = vadd.f32 %v1092_v25, %v1091_v22  ;;  %v1114_v28 = vpop.f32.mrb[3].mxu1 }
  0xff   : > { %v1115_v29 = vadd.f32 %v1114_v28, %v1113_v24 }
 0x100   : > { %v821_v30 = vadd.f32 %v1112_v23, %v780_v26  ;;  %v783_v31 = vadd.f32 %v1093_v27, %v987_v18 }
 0x102   : > { %v824_v32 = vadd.f32 %v1115_v29, %v783_v31 }
 0x11a   : > { %v1132_v33 = vpop.f32.mrb[4].mxu0 }
 0x11b   : > { %v1154_v34 = vpop.f32.mrb[4].mxu1  ;;  %v1133_v35 = vpop.f32.mrb[5].mxu0 }
 0x11c   : > { %v1134_v36 = vadd.f32 %v1133_v35, %v1132_v33  ;;  %v1155_v37 = vpop.f32.mrb[5].mxu1  ;;  %v1135_v38 = vpop.f32.mrb[6].mxu0 }
 0x11d   : > { %v1156_v39 = vadd.f32 %v1155_v37, %v1154_v34  ;;  %v1157_v40 = vpop.f32.mrb[6].mxu1  ;;  %v1136_v41 = vpop.f32.mrb[7].mxu0 }
 0x11e   : > { %v862_v42 = vadd.f32 %v1134_v36, %v821_v30  ;;  %v1137_v43 = vadd.f32 %v1136_v41, %v1135_v38  ;;  %v1158_v44 = vpop.f32.mrb[7].mxu1 }
 0x11f   : > { %v1159_v45 = vadd.f32 %v1158_v44, %v1157_v40 }
 0x120   : > { %v903_v46 = vadd.f32 %v1156_v39, %v862_v42  ;;  %v865_v47 = vadd.f32 %v1137_v43, %v824_v32 }
 0x122   : > { %v906_v48 = vadd.f32 %v1159_v45, %v865_v47  ;;  %v909_v49 = vmax.f32 %v903_v46, 0.0 }
 0x124   : > { %v910_v50 = vmax.f32 %v906_v48, 0.0 }
 0x126   : > { %v1070_v51 = vpack.c.bf16 %v910_v50, %v909_v49 }
 0x128   : > { %1071 = vst [vmem:[%s175_s29] sm:$0xff] %v1070_v51  }
 0x129 PF: > { %s13_s12 = sadd.s32 1, %s1238_s12  }
 0x12a   : > { %p10_p4 = scmp.ge.s32.totalorder %s13_s12, 4  }
 0x12c   :  { %12 = sbr.rel (!%p10_p4) target bundleno = 1 (0x1), region = 62 }

// kernel: vqvae_encoder_forward.5
= control target key start
LH: loop header
LB: loop body
LE: loop exit
PB: predicated region body
PF: predicated region fallthrough
CT: control target
= control target key end

     0   :  { %13 = vsyncpa [#allocation4], 0  ;;  %s8181_s0 = inlined_call_operand.vmem [shape: bf16[2,16,128], index: 0, kind: input, shape index: {}]   ;;  %s8182_s1 = inlined_call_operand.vmem [shape: f32[36,1], index: 1, kind: input, shape index: {}]   ;;  %s8183_s2 = inlined_call_operand.vmem [shape: f32[1,128], index: 2, kind: input, shape index: {}]   ;;  %s8184_s3 = inlined_call_operand.vmem [shape: bf16[9,128,128], index: 3, kind: input, shape index: {}]   ;;  %s8185_s4 = inlined_call_operand.vmem [shape: bf16[9,128,128], index: 4, kind: input, shape index: {}]   ;;  %s8186_s5 = inlined_call_operand.vmem [shape: bf16[128,128], index: 5, kind: input, shape index: {}]   ;;  %s8187_s6 = inlined_call_operand.vmem [shape: bf16[9,128,128], index: 6, kind: input, shape index: {}]   ;;  %s8188_s7 = inlined_call_operand.vmem [shape: bf16[128,128], index: 7, kind: input, shape index: {}]   ;;  %s8189_s8 = inlined_call_operand.hbm [shape: f32[2,16,128], index: 8, kind: output, shape index: {}]  }
   0x1   :  { %15 = vsyncpa [#allocation4 + $0x1], 0  ;;  %s6776_s27 = smov 0   ;;  %s6778_s28 = smov 0  }
   0x2   :  { %s6780_s29 = smov 0   ;;  %s6782_s30 = smov 0  }
   0x3 LB: > { %s6797_s9 = sadd.s32 4294967295, %s6723_s30   ;;  %s4426_s10 = sadd.s32 4294967294, %s6723_s30   ;;  %s6723_s30 = sphi %s6782_s30, %s8195_s30   ;;  %s6719_s29 = sphi %s6780_s29, %s8194_s29   ;;  %s6715_s28 = sphi %s6778_s28, %s8193_s28   ;;  %s6711_s27 = sphi %s6776_s27, %s8192_s27  }
   0x4   : > { %s6801_s11 = sadd.s32 1, %s6723_s30   ;;  %s201_s12 = sadd.s32 1, %s6719_s29 }
   0x5   : > { %s198_s13 = ssub.s32 %s6723_s30, %s6801_s11  ;;  %p211_p0 = scmp.ne.s32.totalorder %s6719_s29, %s6715_s28 }
   0x6   : > { %p199_p1 = scmp.eq.s32.totalorder %s198_s13, 0  ;;  %p212_p2 = scmp.eq.s32.totalorder %s6797_s9, 1 }
   0x7   : > { %p217_p3 = scmp.ne.s32.totalorder %s6715_s28, %s6711_s27  ;;  %p218_p4 = scmp.eq.s32.totalorder %s4426_s10, 1 }
   0x8   : > { %s6812_s14 = scalar_select %p199_p1, %s6719_s29, %s201_s12  }
   0x9   : > { %p6814_p5 = por %p212_p2, %p211_p0  ;;  %p6818_p6 = por %p218_p4, %p217_p3 }
   0xa   : > { %p4429_p7 = scmp.ge.s32.totalorder %s6723_s30, 1  ;;  %p265_p8 = scmp.lt.s32.totalorder %s6723_s30, 3 }
   0xc   : > { %p266_p9 = pnand %p4429_p7, %p265_p8 }
   0xd   : > { %v6426_v0 = vld [vmem:[%s8184_s3 + $0x40] sm:$0xff] (!%p266_p9)   ;;  %v6725_v1 = vmov (!%p266_p9), 0.0   ;;  %v6428_v3 = vld [vmem:[%s8184_s3 + $0x48] sm:$0xff] (!%p266_p9)   ;;  %vm6726_vm0 = vmmov (!%p266_p9), 0   ;;  %p299_p10 = scmp.lt.s32.totalorder (!%p266_p9), %s6797_s9, 1  ;;  %v6430_v5 = vld [vmem:[%s8184_s3 + $0x50] sm:$0xff] (!%p266_p9)  }
   0xe   : > { %269 = sbr.rel (%p266_p9) target bundleno = 1837 (0x72d), region = 52  ;;  %5376 = vmatprep.subr.bf16.mxu0 (!%p266_p9), %v6725_v1  ;;  %310 = vst [vmem:[#allocation2] sm:$0xff] (!%p266_p9), %v6725_v1  ;;  %311 = vst [vmem:[#allocation2 + $0x8] sm:$0xff] (!%p266_p9), %v6725_v1  ;;  %5404 = vmatprep.subr.bf16.mxu1 (!%p266_p9), %v6725_v1  ;;  %v6427_v2 = vld [vmem:[%s8184_s3] sm:$0xff] (!%p266_p9)   ;;  %v6429_v4 = vld [vmem:[%s8184_s3 + $0x8] sm:$0xff] (!%p266_p9)   ;;  %v6727_v51 = vmov (!%p266_p9), 0  }
   0xf   : > { %312 = vst [vmem:[#allocation2 + $0x10] sm:$0xff] (!%p266_p9), %v6725_v1  ;;  %313 = vst [vmem:[#allocation2 + $0x18] sm:$0xff] (!%p266_p9), %v6725_v1  ;;  %5377 = vmatpush3.bf16.msra.mxu0 (!%p266_p9), %v6426_v0  ;;  %5392 = vmatprep.mubr.msk.bf16.mxu0 (!%p266_p9), %vm6726_vm0, %v6725_v1  ;;  %v6431_v6 = vld [vmem:[%s8184_s3 + $0x10] sm:$0xff] (!%p266_p9)   ;;  %v6432_v7 = vld [vmem:[%s8184_s3 + $0x58] sm:$0xff] (!%p266_p9)   ;;  %s296_s17 = sand.u32 (!%p266_p9), 1, %s6715_s28   ;;  %s5056_s20 = sshll.u32 (!%p266_p9), %s6797_s9, 8 }
  0x10   : > { %314 = vst [vmem:[#allocation2 + $0x20] sm:$0xff] (!%p266_p9), %v6725_v1  ;;  %315 = vst [vmem:[#allocation2 + $0x28] sm:$0xff] (!%p266_p9), %v6725_v1  ;;  %5405 = vmatpush3.bf16.msra.mxu1 (!%p266_p9), %v6427_v2  ;;  %5378 = vmatprep.subr.bf16.mxu0 (!%p266_p9), %v6725_v1  ;;  %v6433_v8 = vld [vmem:[%s8184_s3 + $0x18] sm:$0xff] (!%p266_p9)   ;;  %v6434_v9 = vld [vmem:[%s8184_s3 + $0x60] sm:$0xff] (!%p266_p9)   ;;  %s4430_s18 = sshll.u32 (!%p266_p9), %s296_s17, 4  ;;  %s8134_s25 = scalar_lea.hbm (!%p266_p9), %s8189_s8, %s5056_s20 }
  0x11   : > { %316 = vst [vmem:[#allocation2 + $0x30] sm:$0xf] (!%p266_p9), %v6725_v1  ;;  %5406 = vmatprep.subr.bf16.mxu1 (!%p266_p9), %v6725_v1  ;;  %5420 = vmatprep.mubr.msk.bf16.mxu1 (!%p266_p9), %vm6726_vm0, %v6725_v1  ;;  %v6435_v10 = vld [vmem:[%s8184_s3 + $0x20] sm:$0xff] (!%p266_p9)   ;;  %v6436_v13 = vld [vmem:[%s8184_s3 + $0x68] sm:$0xff] (!%p266_p9)   ;;  %v6438_v15 = vld [vmem:[%s8184_s3 + $0x70] sm:$0xff] (!%p266_p9)  }
  0x12   : > { %v6437_v14 = vld [vmem:[%s8184_s3 + $0x28] sm:$0xff] (!%p266_p9)   ;;  %v6439_v16 = vld [vmem:[%s8184_s3 + $0x30] sm:$0xff] (!%p266_p9)   ;;  %v6440_v17 = vld [vmem:[%s8184_s3 + $0x78] sm:$0xff] (!%p266_p9)   ;;  %6424 = vset.pattern.permute.xlu0 (!%p266_p9), %v6727_v51  ;;  %6425 = vset.pattern.permute.xlu1 (!%p266_p9), %v6727_v51 }
  0x13   : > { %5379 = vmatpush3.bf16.msra.mxu0 (!%p266_p9), %v6428_v3  ;;  %v6441_v20 = vld [vmem:[%s8184_s3 + $0x38] sm:$0xff] (!%p266_p9)   ;;  %v6442_v29 = vld [vmem:[%s8184_s3 + $0x80] sm:$0xff] (!%p266_p9)   ;;  %v6444_v31 = vld [vmem:[%s8184_s3 + $0x88] sm:$0xff] (!%p266_p9)  }
  0x14   : > { %5407 = vmatpush3.bf16.msra.mxu1 (!%p266_p9), %v6429_v4  ;;  %5380 = vmatprep.subr.bf16.mxu0 (!%p266_p9), %v6725_v1  ;;  %v6443_v30 = vld [vmem:[%s8184_s3 + $0xc0] sm:$0xff] (!%p266_p9)   ;;  %v6445_v32 = vld [vmem:[%s8184_s3 + $0xc8] sm:$0xff] (!%p266_p9)   ;;  %v6446_v38 = vld [vmem:[%s8184_s3 + $0x90] sm:$0xff] (!%p266_p9)  }
  0x15   : > { %s300_s10 = scalar_select %p299_p10, %s6797_s9, 1  ;;  %5408 = vmatprep.subr.bf16.mxu1 %v6725_v1  ;;  %v353_v23 = vld [vmem:[#allocation2 + $0x2] sm:$0xff]  ;;  %v6447_v40 = vld [vmem:[%s8184_s3 + $0xd0] sm:$0xff]   ;;  %v6448_v41 = vld [vmem:[%s8184_s3 + $0x98] sm:$0xff]  }
  0x16   : > { %v329_v25 = vld [vmem:[#allocation2 + $0x1] sm:$0xff]  ;;  %v6449_v43 = vld [vmem:[%s8184_s3 + $0xd8] sm:$0xff]   ;;  %v6454_v52 = vld [vmem:[%s8184_s3 + $0xb0] sm:$0xff]   ;;  %s8140_s9 = scalar_lea.sflag [#allocation4], %s296_s17 }
  0x17   : > { %5381 = vmatpush3.bf16.msra.mxu0 %v6430_v5  ;;  %s5055_s19 = sshll.u32 %s300_s10, 3  ;;  %v6450_v46 = vld [vmem:[%s8184_s3 + $0xa0] sm:$0xff]   ;;  %v6452_v49 = vld [vmem:[%s8184_s3 + $0xa8] sm:$0xff]   ;;  %v6455_v53 = vld [vmem:[%s8184_s3 + $0xf0] sm:$0xff]   ;;  %s6728_s10 = smov [#allocation3]  }
  0x18   : > { %5409 = vmatpush3.bf16.msra.mxu1 %v6431_v6  ;;  %5382 = vmatprep.subr.bf16.mxu0 %v6725_v1  ;;  %s303_s24 = scalar_lea.vmem %s8181_s0, %s5055_s19  ;;  %v6451_v48 = vld [vmem:[%s8184_s3 + $0xe0] sm:$0xff]   ;;  %v6453_v50 = vld [vmem:[%s8184_s3 + $0xe8] sm:$0xff]   ;;  %v6456_v54 = vld [vmem:[%s8184_s3 + $0xb8] sm:$0xff]   ;;  %s298_s19 = scalar_lea.vmem [#allocation3], %s4430_s18 }
  0x19   : > { %5410 = vmatprep.subr.bf16.mxu1 %v6725_v1  ;;  %v317_v11 = vld [vmem:[%s303_s24] ss:$4 sps:$2 sm:$0xf]   ;;  %v320_v18 = vld [vmem:[%s303_s24] sm:$0xc]  ;;  %v6457_v56 = vld [vmem:[%s8184_s3 + $0xf8] sm:$0xff]  }
  0x1a   : > { %v318_v12 = vunpack.c.l.bf16 %v317_v11  ;;  %v326_v19 = vld [vmem:[%s303_s24 + $0x4] sm:$0xc]  ;;  %v321_v21 = vunpack.c.l.bf16 %v320_v18  ;;  %v6460_v0 = vld [vmem:[%s8184_s3 + $0x108] sm:$0xff]   ;;  %v6464_v11 = vld [vmem:[%s8184_s3 + $0x118] sm:$0xff]   ;;  %s4364_s21 = sshll.u32 %s298_s19, 4  ;;  %s6665_s12 = sshll.u32 %s6728_s10, 4  ;;  %s8136_s21 = int_to_ptr.vmem [resolvable:$true] %s4364_s21  ;;  %s6666_s12 = int_to_ptr.vmem [resolvable:$false] %s6665_s12 }
  0x1b   : > { %5383 = vmatpush3.bf16.msra.mxu0 %v6432_v7  ;;  %v327_v22 = vunpack.c.l.bf16 %v326_v19  ;;  %v586_v55 = vld [vmem:[#allocation2 + $0x3] sm:$0xff]  ;;  %s6661_s26 = scalar_lea.vmem %s8136_s21, 256  ;;  %s6667_s24 = scalar_lea.vmem %s6666_s12, 512 }
  0x1c   : > { %5411 = vmatpush3.bf16.msra.mxu1 %v6433_v8  ;;  %5384 = vmatprep.subr.bf16.mxu0 %v6725_v1  ;;  %319 = vst [vmem:[#allocation2 + $0xf] ss:$12 sps:$4 sm:$0xff] %v318_v12   ;;  %322 = vst [vmem:[#allocation2 + $0x11] sm:$0xf0] %v321_v21  ;;  %v720_v58 = vld [vmem:[#allocation2 + $0x7] sm:$0xff]  ;;  %v6462_v8 = vld [vmem:[%s8184_s3 + $0x110] sm:$0xff]   ;;  %p6662_p11 = scmp.ne.s32.totalorder %s8136_s21, %s6661_s26  ;;  %p6668_p0 = scmp.lt.s32.totalorder %s8136_s21, %s6666_s12 }
  0x1d   : > { %5412 = vmatprep.subr.bf16.mxu1 %v6725_v1  ;;  %328 = vst [vmem:[#allocation2 + $0x1d] sm:$0xf0] %v327_v22  ;;  %v6458_v61 = vld [vmem:[%s8184_s3 + $0x100] sm:$0xff]   ;;  %v6461_v2 = vld [vmem:[%s8184_s3 + $0x148] sm:$0xff]   ;;  %v6470_v21 = vld [vmem:[%s8184_s3 + $0x130] sm:$0xff]   ;;  %p6669_p1 = scmp.lt.s32.totalorder %s6667_s24, %s6661_s26 }
  0x1e   : > { %v6459_v63 = vld [vmem:[%s8184_s3 + $0x140] sm:$0xff]   ;;  %v6468_v19 = vld [vmem:[%s8184_s3 + $0x128] sm:$0xff]   ;;  %v6471_v22 = vld [vmem:[%s8184_s3 + $0x170] sm:$0xff]   ;;  %p6663_p12 = pnand %p6662_p11, %p6814_p5 }
  0x1f   : > { %5385 = vmatpush3.bf16.msra.mxu0 %v6434_v9  ;;  %v6467_v18 = vld [vmem:[%s8184_s3 + $0x160] sm:$0xff]   ;;  %v6485_v51 = vld [vmem:[%s8184_s3 + $0x1e8] sm:$0xff]   ;;  %p6670_p2 = por %p6669_p1, %p6668_p0 }
  0x20   : > { %5413 = vmatpush3.bf16.msra.mxu1 %v6435_v10  ;;  %5386 = vmatprep.subr.bf16.mxu0 %v6725_v1  ;;  %v6463_v10 = vld [vmem:[%s8184_s3 + $0x150] sm:$0xff]   ;;  %p6664_p13 = pneg %p6663_p12 }
  0x21   : > { %5414 = vmatprep.subr.bf16.mxu1 %v6725_v1 }
  0x22   : > { %p6671_p3 = pnand %p6670_p2, %p6664_p13 }
  0x23   : > { %5387 = vmatpush3.bf16.msra.mxu0 %v6436_v13  ;;  %v354_v24 = vld [vmem:[#allocation2 + $0xa] sm:$0xff]  ;;  %v355_v33 = vld [vmem:[#allocation2 + $0x12] sm:$0xff] }
  0x24   : > { %5415 = vmatpush3.bf16.msra.mxu1 %v6437_v14  ;;  %5388 = vmatprep.subr.bf16.mxu0 %v6725_v1  ;;  %v6903_v26 = vld [vmem:[#allocation2 + $0x9] sm:$0xff]  ;;  %v358_v27 = vpack.c.bf16 %v354_v24, %v353_v23  ;;  %v356_v34 = vld [vmem:[#allocation2 + $0x1a] sm:$0xff]  ;;  %v6922_v35 = vld [vmem:[#allocation2 + $0x11] sm:$0xff] }
  0x25   : > { %5416 = vmatprep.subr.bf16.mxu1 %v6725_v1  ;;  %v334_v28 = vpack.c.bf16 %v6903_v26, %v329_v25  ;;  %v6924_v36 = vld [vmem:[#allocation2 + $0x19] sm:$0xff]  ;;  %v359_v37 = vpack.c.bf16 %v356_v34, %v355_v33  ;;  %v357_v42 = vld [vmem:[#allocation2 + $0x22] sm:$0xf]  ;;  %v587_v57 = vld [vmem:[#allocation2 + $0xb] sm:$0xff]  ;;  %v993_v33 = vpack.c.bf16 %v6922_v35, %v6903_v26 }
  0x26   : > { %v335_v39 = vpack.c.bf16 %v6924_v36, %v6922_v35  ;;  %v333_v44 = vld [vmem:[#allocation2 + $0x21] sm:$0xf]  ;;  %v360_v45 = vpack.c.bf16 %v357_v42, %v357_v42  ;;  %v6988_v59 = vld [vmem:[#allocation2 + $0xf] sm:$0xff]  ;;  %v591_v60 = vpack.c.bf16 %v587_v57, %v586_v55  ;;  %v7006_v5 = vld [vmem:[#allocation2 + $0x17] sm:$0xff] }
  0x27   : > { %5389 = vmatpush3.bf16.msra.mxu0 %v6438_v15  ;;  %v336_v47 = vpack.c.bf16 %v333_v44, %v333_v44  ;;  %v725_v62 = vpack.c.bf16 %v6988_v59, %v720_v58  ;;  %v588_v3 = vld [vmem:[#allocation2 + $0x13] sm:$0xff]  ;;  %v589_v4 = vld [vmem:[#allocation2 + $0x1b] sm:$0xff]  ;;  %v590_v12 = vld [vmem:[#allocation2 + $0x23] sm:$0xf] }
  0x28   : > { %5417 = vmatpush3.bf16.msra.mxu1 %v6439_v16  ;;  %5390 = vmatprep.subr.bf16.mxu0 %v6725_v1  ;;  %v7009_v6 = vld [vmem:[#allocation2 + $0x1f] sm:$0xff]  ;;  %v592_v7 = vpack.c.bf16 %v589_v4, %v588_v3  ;;  %v724_v14 = vld [vmem:[#allocation2 + $0x27] sm:$0xf]  ;;  %v593_v15 = vpack.c.bf16 %v590_v12, %v590_v12  ;;  %v6478_v26 = vld [vmem:[%s8184_s3 + $0x190] sm:$0xff]  }
  0x29   : > { %5418 = vmatprep.subr.bf16.mxu1 %v6725_v1  ;;  %v726_v9 = vpack.c.bf16 %v7009_v6, %v7006_v5  ;;  %v6465_v13 = vld [vmem:[%s8184_s3 + $0x158] sm:$0xff]   ;;  %v6466_v16 = vld [vmem:[%s8184_s3 + $0x120] sm:$0xff]   ;;  %v306_v24 = vld [vmem:[%s8182_s1 + $0x8] sm:$0xff] }
  0x2a   : > { %v305_v23 = vld [vmem:[%s8182_s1] sm:$0xff]  ;;  %v6472_v25 = vld [vmem:[%s8184_s3 + $0x138] sm:$0xff]   ;;  %v6476_v34 = vld [vmem:[%s8184_s3 + $0x188] sm:$0xff]  }
  0x2b   : > { %5391 = vmatpush3.bf16.msra.mxu0 %v6440_v17  ;;  %v727_v17 = vpack.c.bf16 %v724_v14, %v724_v14  ;;  %1538 = vperm.xlu0 %6424, %v305_v23   ;;  %v858_v44 = vld [vmem:[#allocation2 + $0x28] sm:$0xf]  ;;  %v6488_v55 = vld [vmem:[%s8184_s3 + $0x1b8] sm:$0xff]   ;;  %v307_v58 = vld [vmem:[%s8182_s1 + $0x10] sm:$0xff]  ;;  %v1395_v23 = vpack.c.bf16 %v7006_v5, %v6988_v59 }
  0x2c   : > { %5419 = vmatpush3.bf16.msra.mxu1 %v6441_v20  ;;  %5432 = vmatprep.subr.bf16.mxu0 %v6725_v1  ;;  %v6469_v20 = vld [vmem:[%s8184_s3 + $0x168] sm:$0xff]   ;;  %v1123_v57 = vld [vmem:[#allocation2 + $0x15] sm:$0xff]  ;;  %v6498_v59 = vld [vmem:[%s8185_s4 + $0x40] sm:$0xff]  }
  0x2d   : > { %5460 = vmatprep.subr.bf16.mxu1 %v6725_v1  ;;  %1548 = vperm.xlu1 %6425, %v307_v58   ;;  %v6491_v4 = vld [vmem:[%s8184_s3 + $0x208] sm:$0xff]   ;;  %v6493_v14 = vld [vmem:[%s8184_s3 + $0x218] sm:$0xff]  }
  0x2e   : > { %5393 = vmatmul.mubr.bf16.vlgmr.msra.gmra.mrb[0].mxu0 %v358_v27  ;;  %v854_v27 = vld [vmem:[#allocation2 + $0x8] sm:$0xff] }
  0x2f   : > { %5421 = vmatmul.mubr.bf16.vlgmr.msra.gmra.mrb[0].mxu1 %v334_v28  ;;  %5433 = vmatpush3.bf16.msra.mxu0 %v6442_v29  ;;  %v855_v28 = vld [vmem:[#allocation2 + $0x10] sm:$0xff]  ;;  %v6473_v29 = vld [vmem:[%s8184_s3 + $0x178] sm:$0xff]   ;;  %v6499_v5 = vld [vmem:[%s8185_s4 + $0x48] sm:$0xff]  }
  0x30   : > { %5461 = vmatpush3.bf16.msra.mxu1 %v6443_v30  ;;  %5434 = vmatprep.subr.bf16.mxu0 %v6725_v1  ;;  %v6474_v30 = vld [vmem:[%s8184_s3 + $0x180] sm:$0xff]  }
  0x31   : > { %5462 = vmatprep.subr.bf16.mxu1 %v6725_v1  ;;  %5396 = vmatprep.mubr.msk.bf16.mxu0 %vm6726_vm0, %v6725_v1 }
  0x32   : > { %5424 = vmatprep.mubr.msk.bf16.mxu1 %vm6726_vm0, %v6725_v1  ;;  %1543 = vperm.xlu0 %6424, %v306_v24   ;;  %v1393_v24 = vld [vmem:[#allocation2 + $0x27] sm:$0xff] }
  0x33   : > { %5435 = vmatpush3.bf16.msra.mxu0 %v6444_v31  ;;  %v859_v31 = vpack.c.bf16 %v855_v28, %v854_v27  ;;  %v1394_v27 = vld [vmem:[#allocation2 + $0x2f] sm:$0xf] }
  0x34   : > { %5463 = vmatpush3.bf16.msra.mxu1 %v6445_v32  ;;  %5436 = vmatprep.subr.bf16.mxu0 %v6725_v1  ;;  %v6475_v32 = vld [vmem:[%s8184_s3 + $0x1c0] sm:$0xff]   ;;  %v1397_v28 = vpack.c.bf16 %v1394_v27, %v1394_v27 }
  0x35   : > { %5464 = vmatprep.subr.bf16.mxu1 %v6725_v1 }
  0x36   : > { %5397 = vmatmul.mubr.bf16.gmra.mrb[4].mxu0 %v359_v37  ;;  %v856_v37 = vld [vmem:[#allocation2 + $0x18] sm:$0xff] }
  0x37   : > { %5437 = vmatpush3.bf16.msra.mxu0 %v6446_v38  ;;  %5425 = vmatmul.mubr.bf16.gmra.mrb[4].mxu1 %v335_v39  ;;  %v857_v38 = vld [vmem:[#allocation2 + $0x20] sm:$0xff]  ;;  %v6477_v39 = vld [vmem:[%s8184_s3 + $0x1c8] sm:$0xff]  }
  0x38   : > { %5465 = vmatpush3.bf16.msra.mxu1 %v6447_v40  ;;  %5438 = vmatprep.subr.bf16.mxu0 %v6725_v1  ;;  %v991_v40 = vld [vmem:[#allocation2 + $0x21] sm:$0xff]  ;;  %v860_v35 = vpack.c.bf16 %v857_v38, %v856_v37 }
  0x39   : > { %5466 = vmatprep.subr.bf16.mxu1 %v6725_v1  ;;  %5400 = vmatprep.mubr.msk.bf16.mxu0 %vm6726_vm0, %v6725_v1  ;;  %v994_v42 = vpack.c.bf16 %v991_v40, %v6924_v36  ;;  %v6482_v36 = vld [vmem:[%s8184_s3 + $0x1a0] sm:$0xff]  }
  0x3a   : > { %5428 = vmatprep.mubr.msk.bf16.mxu1 %vm6726_vm0, %v6725_v1 }
  0x3b   : > { %5439 = vmatpush3.bf16.msra.mxu0 %v6448_v41  ;;  %v6479_v41 = vld [vmem:[%s8184_s3 + $0x1d0] sm:$0xff]  }
  0x3c   : > { %5467 = vmatpush3.bf16.msra.mxu1 %v6449_v43  ;;  %5440 = vmatprep.subr.bf16.mxu0 %v6725_v1  ;;  %v6480_v43 = vld [vmem:[%s8184_s3 + $0x198] sm:$0xff]  }
  0x3d   : > { %5468 = vmatprep.subr.bf16.mxu1 %v6725_v1 }
  0x3e   : > { %5401 = vmatmul.mubr.bf16.gmra.mrb[8].mxu0 %v360_v45  ;;  %v6481_v45 = vld [vmem:[%s8184_s3 + $0x1d8] sm:$0xff]  }
  0x3f   : > { %5441 = vmatpush3.bf16.msra.mxu0 %v6450_v46  ;;  %5429 = vmatmul.mubr.bf16.gmra.mrb[8].mxu1 %v336_v47  ;;  %v992_v46 = vld [vmem:[#allocation2 + $0x29] sm:$0xf]  ;;  %v861_v47 = vpack.c.bf16 %v858_v44, %v858_v44 }
  0x40   : > { %5469 = vmatpush3.bf16.msra.mxu1 %v6451_v48  ;;  %5442 = vmatprep.subr.bf16.mxu0 %v6725_v1  ;;  %v6483_v48 = vld [vmem:[%s8184_s3 + $0x1e0] sm:$0xff]  }
  0x41   : > { %5470 = vmatprep.subr.bf16.mxu1 %v6725_v1  ;;  %5448 = vmatprep.mubr.msk.bf16.mxu0 %vm6726_vm0, %v6725_v1 }
  0x42   : > { %5476 = vmatprep.mubr.msk.bf16.mxu1 %vm6726_vm0, %v6725_v1 }
  0x43   : > { %5443 = vmatpush3.bf16.msra.mxu0 %v6452_v49  ;;  %v995_v49 = vpack.c.bf16 %v992_v46, %v992_v46 }
  0x44   : > { %5471 = vmatpush3.bf16.msra.mxu1 %v6453_v50  ;;  %5444 = vmatprep.subr.bf16.mxu0 %v6725_v1  ;;  %v6484_v50 = vld [vmem:[%s8184_s3 + $0x1a8] sm:$0xff]  }
  0x45   : > { %5472 = vmatprep.subr.bf16.mxu1 %v6725_v1 }
  0x47   : > { %5445 = vmatpush3.bf16.msra.mxu0 %v6454_v52  ;;  %v7138_v52 = vld [vmem:[#allocation2] sm:$0xff] }
  0x48   : > { %5473 = vmatpush3.bf16.msra.mxu1 %v6455_v53  ;;  %5446 = vmatprep.subr.bf16.mxu0 %v6725_v1  ;;  %v6486_v53 = vld [vmem:[%s8184_s3 + $0x1b0] sm:$0xff]  }
  0x49   : > { %5474 = vmatprep.subr.bf16.mxu1 %v6725_v1 }
  0x4b   : > { %5447 = vmatpush3.bf16.msra.mxu0 %v6456_v54  ;;  %v6487_v54 = vld [vmem:[%s8184_s3 + $0x1f0] sm:$0xff]  }
  0x4c   : > { %5475 = vmatpush3.bf16.msra.mxu1 %v6457_v56  ;;  %5488 = vmatprep.subr.bf16.mxu0 %v6725_v1  ;;  %v1122_v56 = vld [vmem:[#allocation2 + $0xd] sm:$0xff] }
  0x4d   : > { %5516 = vmatprep.subr.bf16.mxu1 %v6725_v1 }
  0x4e   : > { %5449 = vmatmul.mubr.bf16.vlgmr.msra.gmra.mrb[12].mxu0 %v591_v60  ;;  %v6489_v60 = vld [vmem:[%s8184_s3 + $0x1f8] sm:$0xff]  }
  0x4f   : > { %5489 = vmatpush3.bf16.msra.mxu0 %v6458_v61  ;;  %5477 = vmatmul.mubr.bf16.vlgmr.msra.gmra.mrb[12].mxu1 %v725_v62  ;;  %v1256_v61 = vld [vmem:[#allocation2 + $0xe] sm:$0xff]  ;;  %v1257_v62 = vld [vmem:[#allocation2 + $0x16] sm:$0xff] }
  0x50   : > { %5517 = vmatpush3.bf16.msra.mxu1 %v6459_v63  ;;  %5490 = vmatprep.subr.bf16.mxu0 %v6725_v1  ;;  %v6490_v63 = vld [vmem:[%s8184_s3 + $0x200] sm:$0xff]   ;;  %v1261_v3 = vpack.c.bf16 %v1257_v62, %v1256_v61 }
  0x51   : > { %5518 = vmatprep.subr.bf16.mxu1 %v6725_v1  ;;  %5452 = vmatprep.mubr.msk.bf16.mxu0 %vm6726_vm0, %v6725_v1 }
  0x52   : > { %5480 = vmatprep.mubr.msk.bf16.mxu1 %vm6726_vm0, %v6725_v1 }
  0x53   : > { %5491 = vmatpush3.bf16.msra.mxu0 %v6460_v0  ;;  %v308_v0 = vld [vmem:[%s8182_s1 + $0x18] sm:$0xff] }
  0x54   : > { %5519 = vmatpush3.bf16.msra.mxu1 %v6461_v2  ;;  %5492 = vmatprep.subr.bf16.mxu0 %v6725_v1  ;;  %v1127_v2 = vpack.c.bf16 %v1123_v57, %v1122_v56 }
  0x55   : > { %5520 = vmatprep.subr.bf16.mxu1 %v6725_v1  ;;  %1553 = vperm.xlu1 %6425, %v308_v0  }
  0x56   : > { %5453 = vmatmul.mubr.bf16.gmra.mrb[16].mxu0 %v592_v7  ;;  %v1124_v7 = vld [vmem:[#allocation2 + $0x1d] sm:$0xff] }
  0x57   : > { %5493 = vmatpush3.bf16.msra.mxu0 %v6462_v8  ;;  %5481 = vmatmul.mubr.bf16.gmra.mrb[16].mxu1 %v726_v9  ;;  %v1125_v8 = vld [vmem:[#allocation2 + $0x25] sm:$0xff] }
  0x58   : > { %5521 = vmatpush3.bf16.msra.mxu1 %v6463_v10  ;;  %5494 = vmatprep.subr.bf16.mxu0 %v6725_v1  ;;  %v1258_v9 = vld [vmem:[#allocation2 + $0x1e] sm:$0xff]  ;;  %v1259_v10 = vld [vmem:[#allocation2 + $0x26] sm:$0xff]  ;;  %v1128_v12 = vpack.c.bf16 %v1125_v8, %v1124_v7 }
  0x59   : > { %5522 = vmatprep.subr.bf16.mxu1 %v6725_v1  ;;  %5456 = vmatprep.mubr.msk.bf16.mxu0 %vm6726_vm0, %v6725_v1 }
  0x5a   : > { %5484 = vmatprep.mubr.msk.bf16.mxu1 %vm6726_vm0, %v6725_v1 }
  0x5b   : > { %5495 = vmatpush3.bf16.msra.mxu0 %v6464_v11  ;;  %v6492_v11 = vld [vmem:[%s8184_s3 + $0x210] sm:$0xff]  }
  0x5c   : > { %5523 = vmatpush3.bf16.msra.mxu1 %v6465_v13  ;;  %5496 = vmatprep.subr.bf16.mxu0 %v6725_v1  ;;  %v1262_v13 = vpack.c.bf16 %v1259_v10, %v1258_v9 }
  0x5d   : > { %5524 = vmatprep.subr.bf16.mxu1 %v6725_v1 }
  0x5e   : > { %5457 = vmatmul.mubr.bf16.gmra.mrb[20].mxu0 %v593_v15  ;;  %v1126_v15 = vld [vmem:[#allocation2 + $0x2d] sm:$0xf] }
  0x5f   : > { %5497 = vmatpush3.bf16.msra.mxu0 %v6466_v16  ;;  %5485 = vmatmul.mubr.bf16.gmra.mrb[20].mxu1 %v727_v17  ;;  %v1260_v16 = vld [vmem:[#allocation2 + $0x2e] sm:$0xf]  ;;  %v6494_v17 = vld [vmem:[%s8184_s3 + $0x220] sm:$0xff]  }
  0x60   : > { %5525 = vmatpush3.bf16.msra.mxu1 %v6467_v18  ;;  %5498 = vmatprep.subr.bf16.mxu0 %v6725_v1  ;;  %v1129_v18 = vpack.c.bf16 %v1126_v15, %v1126_v15 }
  0x61   : > { %5526 = vmatprep.subr.bf16.mxu1 %v6725_v1  ;;  %5504 = vmatprep.mubr.msk.bf16.mxu0 %vm6726_vm0, %v6725_v1 }
  0x62   : > { %5532 = vmatprep.mubr.msk.bf16.mxu1 %vm6726_vm0, %v6725_v1 }
  0x63   : > { %5499 = vmatpush3.bf16.msra.mxu0 %v6468_v19  ;;  %v1263_v19 = vpack.c.bf16 %v1260_v16, %v1260_v16 }
  0x64   : > { %5527 = vmatpush3.bf16.msra.mxu1 %v6469_v20  ;;  %5500 = vmatprep.subr.bf16.mxu0 %v6725_v1  ;;  %v6495_v20 = vld [vmem:[%s8184_s3 + $0x228] sm:$0xff]  }
  0x65   : > { %5528 = vmatprep.subr.bf16.mxu1 %v6725_v1 }
  0x67   : > { %5501 = vmatpush3.bf16.msra.mxu0 %v6470_v21  ;;  %v6496_v21 = vld [vmem:[%s8184_s3 + $0x230] sm:$0xff]  }
  0x68   : > { %5529 = vmatpush3.bf16.msra.mxu1 %v6471_v22  ;;  %5502 = vmatprep.subr.bf16.mxu0 %v6725_v1  ;;  %v6497_v22 = vld [vmem:[%s8184_s3 + $0x238] sm:$0xff]  }
  0x69   : > { %5530 = vmatprep.subr.bf16.mxu1 %v6725_v1 }
  0x6b   : > { %5503 = vmatpush3.bf16.msra.mxu0 %v6472_v25  ;;  %v1396_v25 = vpack.c.bf16 %v1393_v24, %v7009_v6  ;;  %v6500_v6 = vld [vmem:[%s8185_s4 + $0x50] sm:$0xff]  }
  0x6c   : > { %5531 = vmatpush3.bf16.msra.mxu1 %v6473_v29  ;;  %5544 = vmatprep.subr.bf16.mxu0 %v6725_v1 }
  0x6d   : > { %5572 = vmatprep.subr.bf16.mxu1 %v6725_v1 }
  0x6e   : > { %5505 = vmatmul.mubr.bf16.vlgmr.msra.gmra.mrb[24].mxu0 %v859_v31 }
  0x6f   : > { %5545 = vmatpush3.bf16.msra.mxu0 %v6474_v30  ;;  %5533 = vmatmul.mubr.bf16.vlgmr.msra.gmra.mrb[24].mxu1 %v993_v33  ;;  %v6501_v30 = vld [vmem:[%s8185_s4 + $0x58] sm:$0xff]  }
  0x70   : > { %5573 = vmatpush3.bf16.msra.mxu1 %v6475_v32  ;;  %5546 = vmatprep.subr.bf16.mxu0 %v6725_v1 }
  0x71   : > { %5574 = vmatprep.subr.bf16.mxu1 %v6725_v1  ;;  %5508 = vmatprep.mubr.msk.bf16.mxu0 %vm6726_vm0, %v6725_v1 }
  0x72   : > { %5536 = vmatprep.mubr.msk.bf16.mxu1 %vm6726_vm0, %v6725_v1 }
  0x73   : > { %5547 = vmatpush3.bf16.msra.mxu0 %v6476_v34 }
  0x74   : > { %5575 = vmatpush3.bf16.msra.mxu1 %v6477_v39  ;;  %5548 = vmatprep.subr.bf16.mxu0 %v6725_v1 }
  0x75   : > { %5576 = vmatprep.subr.bf16.mxu1 %v6725_v1 }
  0x76   : > { %5509 = vmatmul.mubr.bf16.gmra.mrb[28].mxu0 %v860_v35  ;;  %v6502_v35 = vld [vmem:[%s8185_s4 + $0x60] sm:$0xff]  }
  0x77   : > { %5549 = vmatpush3.bf16.msra.mxu0 %v6478_v26  ;;  %5537 = vmatmul.mubr.bf16.gmra.mrb[28].mxu1 %v994_v42  ;;  %v6503_v42 = vld [vmem:[%s8185_s4 + $0x68] sm:$0xff]  }
  0x78   : > { %5577 = vmatpush3.bf16.msra.mxu1 %v6479_v41  ;;  %5550 = vmatprep.subr.bf16.mxu0 %v6725_v1 }
  0x79   : > { %5578 = vmatprep.subr.bf16.mxu1 %v6725_v1  ;;  %5512 = vmatprep.mubr.msk.bf16.mxu0 %vm6726_vm0, %v6725_v1 }
  0x7a   : > { %5540 = vmatprep.mubr.msk.bf16.mxu1 %vm6726_vm0, %v6725_v1 }
  0x7b   : > { %5551 = vmatpush3.bf16.msra.mxu0 %v6480_v43 }
  0x7c   : > { %5579 = vmatpush3.bf16.msra.mxu1 %v6481_v45  ;;  %5552 = vmatprep.subr.bf16.mxu0 %v6725_v1 }
  0x7d   : > { %5580 = vmatprep.subr.bf16.mxu1 %v6725_v1 }
  0x7e   : > { %5513 = vmatmul.mubr.bf16.gmra.mrb[32].mxu0 %v861_v47 }
  0x7f   : > { %5553 = vmatpush3.bf16.msra.mxu0 %v6482_v36  ;;  %5541 = vmatmul.mubr.bf16.gmra.mrb[32].mxu1 %v995_v49 }
  0x80   : > { %5581 = vmatpush3.bf16.msra.mxu1 %v6483_v48  ;;  %5554 = vmatprep.subr.bf16.mxu0 %v6725_v1  ;;  %v309_v1 = vld [vmem:[%s8182_s1 + $0x20] sm:$0xf] }
  0x81   : > { %5582 = vmatprep.subr.bf16.mxu1 %v7138_v52  ;;  %5560 = vmatprep.mubr.msk.bf16.mxu0 %vm6726_vm0, %v7138_v52 }
  0x82   : > { %5588 = vmatprep.mubr.msk.bf16.mxu1 %vm6726_vm0, %v7138_v52  ;;  %1558 = vperm.xlu0 %6424, %v309_v1  }
  0x83   : > { %5555 = vmatpush3.bf16.msra.mxu0 %v6484_v50 }
  0x84   : > { %5583 = vmatpush3.bf16.msra.mxu1 %v6485_v51  ;;  %5556 = vmatprep.subr.bf16.mxu0 %v7138_v52  ;;  %v6504_v51 = vld [vmem:[%s8185_s4 + $0x70] sm:$0xff]  }
  0x85   : > { %5584 = vmatprep.subr.bf16.mxu1 %v7138_v52 }
  0x87   : > { %5557 = vmatpush3.bf16.msra.mxu0 %v6486_v53 }
  0x88   : > { %5585 = vmatpush3.bf16.msra.mxu1 %v6487_v54  ;;  %5558 = vmatprep.subr.bf16.mxu0 %v7138_v52  ;;  %v6505_v54 = vld [vmem:[%s8185_s4 + $0x78] sm:$0xff]  }
  0x89   : > { %5586 = vmatprep.subr.bf16.mxu1 %v7138_v52 }
  0x8b   : > { %5559 = vmatpush3.bf16.msra.mxu0 %v6488_v55 }
  0x8c   : > { %5587 = vmatpush3.bf16.msra.mxu1 %v6489_v60  ;;  %5600 = vmatprep.subr.bf16.mxu0 %v7138_v52 }
  0x8d   : > { %5628 = vmatprep.subr.bf16.mxu1 %v7138_v52 }
  0x8e   : > { %5561 = vmatmul.mubr.bf16.vlgmr.msra.gmra.mrb[36].mxu0 %v1127_v2 }
  0x8f   : > { %5601 = vmatpush3.bf16.msra.mxu0 %v6490_v63  ;;  %5589 = vmatmul.mubr.bf16.vlgmr.msra.gmra.mrb[36].mxu1 %v1261_v3 }
  0x90   : > { %5602 = vmatprep.subr.bf16.mxu0 %v7138_v52  ;;  %5564 = vmatprep.mubr.msk.bf16.mxu0 %vm6726_vm0, %v7138_v52 }
  0x91   : > { %5592 = vmatprep.mubr.msk.bf16.mxu1 %vm6726_vm0, %v7138_v52  ;;  %5629 = vmatpush3.bf16.msra.mxu1 %v6498_v59 }
  0x92   : > { %5630 = vmatprep.subr.bf16.mxu1 %v7138_v52 }
  0x93   : > { %5603 = vmatpush3.bf16.msra.mxu0 %v6491_v4 }
  0x94   : > { %5604 = vmatprep.subr.bf16.mxu0 %v7138_v52 }
  0x95   : > { %5631 = vmatpush3.bf16.msra.mxu1 %v6499_v5 }
  0x96   : > { %5565 = vmatmul.mubr.bf16.gmra.mrb[40].mxu0 %v1128_v12  ;;  %5632 = vmatprep.subr.bf16.mxu1 %v7138_v52 }
  0x97   : > { %5605 = vmatpush3.bf16.msra.mxu0 %v6492_v11  ;;  %5593 = vmatmul.mubr.bf16.gmra.mrb[40].mxu1 %v1262_v13 }
  0x98   : > { %5606 = vmatprep.subr.bf16.mxu0 %v7138_v52  ;;  %5568 = vmatprep.mubr.msk.bf16.mxu0 %vm6726_vm0, %v7138_v52 }
  0x99   : > { %5596 = vmatprep.mubr.msk.bf16.mxu1 %vm6726_vm0, %v7138_v52  ;;  %5633 = vmatpush3.bf16.msra.mxu1 %v6500_v6 }
  0x9a   : > { %5634 = vmatprep.subr.bf16.mxu1 %v7138_v52 }
  0x9b   : > { %5607 = vmatpush3.bf16.msra.mxu0 %v6493_v14 }
  0x9c   : > { %5608 = vmatprep.subr.bf16.mxu0 %v7138_v52 }
  0x9d   : > { %5635 = vmatpush3.bf16.msra.mxu1 %v6501_v30 }
  0x9e   : > { %5569 = vmatmul.mubr.bf16.gmra.mrb[44].mxu0 %v1129_v18  ;;  %5636 = vmatprep.subr.bf16.mxu1 %v7138_v52 }
  0x9f   : > { %5609 = vmatpush3.bf16.msra.mxu0 %v6494_v17  ;;  %5597 = vmatmul.mubr.bf16.gmra.mrb[44].mxu1 %v1263_v19 }
  0xa0   : > { %5610 = vmatprep.subr.bf16.mxu0 %v7138_v52  ;;  %5616 = vmatprep.mubr.msk.bf16.mxu0 %vm6726_vm0, %v7138_v52 }
  0xa1   : > { %5644 = vmatprep.mubr.msk.bf16.mxu1 %vm6726_vm0, %v7138_v52  ;;  %5637 = vmatpush3.bf16.msra.mxu1 %v6502_v35 }
  0xa2   : > { %5638 = vmatprep.subr.bf16.mxu1 %v7138_v52 }
  0xa3   : > { %5611 = vmatpush3.bf16.msra.mxu0 %v6495_v20 }
  0xa4   : > { %5612 = vmatprep.subr.bf16.mxu0 %v7138_v52 }
  0xa5   : > { %5639 = vmatpush3.bf16.msra.mxu1 %v6503_v42 }
  0xa6   : > { %5640 = vmatprep.subr.bf16.mxu1 %v7138_v52 }
  0xa7   : > { %5613 = vmatpush3.bf16.msra.mxu0 %v6496_v21 }
  0xa8   : > { %5614 = vmatprep.subr.bf16.mxu0 %v7138_v52 }
  0xa9   : > { %5641 = vmatpush3.bf16.msra.mxu1 %v6504_v51 }
  0xaa   : > { %5642 = vmatprep.subr.bf16.mxu1 %v7138_v52 }
  0xab   : > { %5615 = vmatpush3.bf16.msra.mxu0 %v6497_v22 }
  0xac   : > { %5880 = vmatprep.subr.bf16.mxu0 %v7138_v52 }
  0xad   : > { %5643 = vmatpush3.bf16.msra.mxu1 %v6505_v54 }
  0xae   : > { %5617 = vmatmul.mubr.bf16.vlgmr.msra.gmra.mrb[48].mxu0 %v1395_v23  ;;  %5656 = vmatprep.subr.bf16.mxu1 %v7138_v52 }
  0xaf   : > { %5620 = vmatprep.mubr.msk.bf16.mxu0 %vm6726_vm0, %v7138_v52 }
  0xb6   : > { %5621 = vmatmul.mubr.bf16.gmra.mrb[52].mxu0 %v1396_v25 }
  0xb7   : > { %5624 = vmatprep.mubr.msk.bf16.mxu0 %vm6726_vm0, %v7138_v52 }
  0xbe   : > { %5625 = vmatmul.mubr.bf16.gmra.mrb[56].mxu0 %v1397_v28 }
  0xbf   : > { %5896 = vmatprep.mubr.msk.bf16.mxu0 %vm6726_vm0, %v7138_v52 }
 0x101   : > { %v460_v29 = vpop.f32.mrb[0].mxu0 }
 0x102   : > { %v564_v31 = vpop.f32.mrb[0].mxu1  ;;  %v5394_v32 = vpop.f32.mrb[1].mxu0 }
 0x103   : > { %v565_v33 = vadd.f32 %v564_v31, %v460_v29  ;;  %v5422_v34 = vpop.f32.mrb[1].mxu1  ;;  %v463_v37 = vpop.f32.mrb[2].mxu0 }
 0x104   : > { %v567_v38 = vpop.f32.mrb[2].mxu1  ;;  %v5395_v39 = vpop.f32.mrb[3].mxu0 }
 0x105   : > { %v568_v40 = vadd.f32 %v567_v38, %v463_v37  ;;  %v5423_v26 = vpop.f32.mrb[3].mxu1 }
 0x109   : > { %v468_v41 = vpop.f32.mrb[4].mxu0 }
 0x10a   : > { %v5398_v43 = vpop.f32.mrb[5].mxu0  ;;  %v572_v44 = vpop.f32.mrb[4].mxu1 }
 0x10b   : > { %v573_v45 = vadd.f32 %v572_v44, %v468_v41  ;;  %v471_v46 = vpop.f32.mrb[6].mxu0  ;;  %v5426_v36 = vpop.f32.mrb[5].mxu1 }
 0x10c   : > { %v5399_v47 = vpop.f32.mrb[7].mxu0  ;;  %v575_v48 = vpop.f32.mrb[6].mxu1 }
 0x10d   : > { %v576_v49 = vadd.f32 %v575_v48, %v471_v46  ;;  %v5427_v50 = vpop.f32.mrb[7].mxu1 }
 0x111   : > { %v476_v53 = vpop.f32.mrb[8].mxu0 }
 0x112   : > { %v5402_v1 = vpop.f32.mrb[9].mxu0  ;;  %v580_v55 = vpop.f32.mrb[8].mxu1 }
 0x113   : > { %v479_v56 = vpop.f32.mrb[10].mxu0  ;;  %v581_v57 = vadd.f32 %v580_v55, %v476_v53  ;;  %v5430_v58 = vpop.f32.mrb[9].mxu1 }
 0x114   : > { %v5403_v60 = vpop.f32.mrb[11].mxu0  ;;  %v583_v61 = vpop.f32.mrb[10].mxu1 }
 0x115   : > { %v5431_v62 = vpop.f32.mrb[11].mxu1 }
 0x121   : > { %v693_v63 = vpop.f32.mrb[12].mxu0 }
 0x122   : > { %v715_v0 = vadd.f32 %v693_v63, %v565_v33  ;;  %v5450_v2 = vpop.f32.mrb[13].mxu0  ;;  %v827_v3 = vpop.f32.mrb[12].mxu1 }
 0x123   : > { %v696_v4 = vpop.f32.mrb[14].mxu0  ;;  %v5478_v7 = vpop.f32.mrb[13].mxu1 }
 0x124   : > { %v716_v8 = vadd.f32 %v696_v4, %v568_v40  ;;  %v849_v9 = vadd.f32 %v827_v3, %v715_v0  ;;  %v5451_v10 = vpop.f32.mrb[15].mxu0  ;;  %v830_v11 = vpop.f32.mrb[14].mxu1 }
 0x125   : > { %v5479_v12 = vpop.f32.mrb[15].mxu1 }
 0x126   : > { %v850_v13 = vadd.f32 %v830_v11, %v716_v8 }
 0x129   : > { %v701_v14 = vpop.f32.mrb[16].mxu0 }
 0x12a   : > { %v717_v15 = vadd.f32 %v701_v14, %v573_v45  ;;  %v5454_v16 = vpop.f32.mrb[17].mxu0  ;;  %v835_v17 = vpop.f32.mrb[16].mxu1 }
 0x12b   : > { %v704_v18 = vpop.f32.mrb[18].mxu0  ;;  %v5482_v19 = vpop.f32.mrb[17].mxu1 }
 0x12c   : > { %v718_v52 = vadd.f32 %v704_v18, %v576_v49  ;;  %v851_v20 = vadd.f32 %v835_v17, %v717_v15  ;;  %v838_v21 = vpop.f32.mrb[18].mxu1  ;;  %v5455_v22 = vpop.f32.mrb[19].mxu0 }
 0x12d   : > { %v5483_v23 = vpop.f32.mrb[19].mxu1 }
 0x12e   : > { %v852_v24 = vadd.f32 %v838_v21, %v718_v52 }
 0x131   : > { %v709_v25 = vpop.f32.mrb[20].mxu0 }
 0x132   : > { %v719_v27 = vadd.f32 %v709_v25, %v581_v57  ;;  %v843_v28 = vpop.f32.mrb[20].mxu1  ;;  %v5458_v59 = vpop.f32.mrb[21].mxu0 }
 0x133   : > { %v712_v5 = vpop.f32.mrb[22].mxu0  ;;  %v5486_v6 = vpop.f32.mrb[21].mxu1 }
 0x134   : > { %v853_v29 = vadd.f32 %v843_v28, %v719_v27  ;;  %v5459_v30 = vpop.f32.mrb[23].mxu0  ;;  %v846_v31 = vpop.f32.mrb[22].mxu1 }
 0x135   : > { %v5487_v32 = vpop.f32.mrb[23].mxu1 }
 0x141   : > { %v961_v33 = vpop.f32.mrb[24].mxu0 }
 0x142   : > { %v983_v34 = vadd.f32 %v961_v33, %v849_v9  ;;  %v5506_v37 = vpop.f32.mrb[25].mxu0  ;;  %v1095_v38 = vpop.f32.mrb[24].mxu1 }
 0x143   : > { %v964_v39 = vpop.f32.mrb[26].mxu0  ;;  %v5534_v40 = vpop.f32.mrb[25].mxu1 }
 0x144   : > { %v984_v26 = vadd.f32 %v964_v39, %v850_v13  ;;  %v1117_v35 = vadd.f32 %v1095_v38, %v983_v34  ;;  %v5507_v41 = vpop.f32.mrb[27].mxu0  ;;  %v1098_v42 = vpop.f32.mrb[26].mxu1 }
 0x145   : > { %v5535_v43 = vpop.f32.mrb[27].mxu1  ;;  %v7257_v39 = vpop.permute.xlu0 %1538 }
 0x146   : > { %v1118_v44 = vadd.f32 %v1098_v42, %v984_v26  ;;  %v4633_v26 = vld [vmem:[%s8183_s2] ss:$0 sm:$0xff] }
 0x149   : > { %v969_v45 = vpop.f32.mrb[28].mxu0 }
 0x14a   : > { %v985_v46 = vadd.f32 %v969_v45, %v851_v20  ;;  %v5510_v36 = vpop.f32.mrb[29].mxu0  ;;  %v1103_v47 = vpop.f32.mrb[28].mxu1 }
 0x14b   : > { %v972_v48 = vpop.f32.mrb[30].mxu0  ;;  %v5538_v49 = vpop.f32.mrb[29].mxu1 }
 0x14c   : > { %v986_v50 = vadd.f32 %v972_v48, %v852_v24  ;;  %v1119_v51 = vadd.f32 %v1103_v47, %v985_v46  ;;  %v1106_v53 = vpop.f32.mrb[30].mxu1  ;;  %v5511_v54 = vpop.f32.mrb[31].mxu0 }
 0x14d   : > { %v5539_v1 = vpop.f32.mrb[31].mxu1  ;;  %v7265_v47 = vpop.permute.xlu0 %1543 }
 0x14e   : > { %v1120_v55 = vadd.f32 %v1106_v53, %v986_v50  ;;  %v7267_v48 = vpop.permute.xlu1 %1548 }
 0x151   : > { %v977_v56 = vpop.f32.mrb[32].mxu0 }
 0x152   : > { %v987_v57 = vadd.f32 %v977_v56, %v853_v29  ;;  %v1111_v58 = vpop.f32.mrb[32].mxu1  ;;  %v5514_v60 = vpop.f32.mrb[33].mxu0 }
 0x153   : > { %v980_v61 = vpop.f32.mrb[34].mxu0  ;;  %v5542_v62 = vpop.f32.mrb[33].mxu1 }
 0x154   : > { %v1121_v63 = vadd.f32 %v1111_v58, %v987_v57  ;;  %v5515_v0 = vpop.f32.mrb[35].mxu0  ;;  %v1114_v2 = vpop.f32.mrb[34].mxu1 }
 0x155   : > { %v5543_v3 = vpop.f32.mrb[35].mxu1  ;;  %v7274_v57 = vpop.permute.xlu1 %1553 }
 0x161   : > { %v1229_v4 = vpop.f32.mrb[36].mxu0 }
 0x162   : > { %v1251_v7 = vadd.f32 %v1229_v4, %v1117_v35  ;;  %v5562_v8 = vpop.f32.mrb[37].mxu0  ;;  %v1363_v9 = vpop.f32.mrb[36].mxu1 }
 0x163   : > { %v1232_v10 = vpop.f32.mrb[38].mxu0  ;;  %v5590_v11 = vpop.f32.mrb[37].mxu1  ;;  %v6506_v8 = vld [vmem:[%s8185_s4] sm:$0xff]  }
 0x164   : > { %v1252_v12 = vadd.f32 %v1232_v10, %v1118_v44  ;;  %v1385_v13 = vadd.f32 %v1363_v9, %v1251_v7  ;;  %v5563_v14 = vpop.f32.mrb[39].mxu0  ;;  %v1366_v15 = vpop.f32.mrb[38].mxu1 }
 0x165   : > { %v5591_v16 = vpop.f32.mrb[39].mxu1 }
 0x166   : > { %v1386_v17 = vadd.f32 %v1366_v15, %v1252_v12 }
 0x169   : > { %v1237_v18 = vpop.f32.mrb[40].mxu0 }
 0x16a   : > { %v1253_v19 = vadd.f32 %v1237_v18, %v1119_v51  ;;  %v5566_v52 = vpop.f32.mrb[41].mxu0  ;;  %v1371_v20 = vpop.f32.mrb[40].mxu1  ;;  %v7295_v18 = vld [vmem:[#allocation2] sm:$0xff] }
 0x16b   : > { %v1240_v21 = vpop.f32.mrb[42].mxu0  ;;  %v5594_v22 = vpop.f32.mrb[41].mxu1 }
 0x16c   : > { %v1254_v23 = vadd.f32 %v1240_v21, %v1120_v55  ;;  %v1387_v24 = vadd.f32 %v1371_v20, %v1253_v19  ;;  %v1374_v25 = vpop.f32.mrb[42].mxu1  ;;  %v5567_v27 = vpop.f32.mrb[43].mxu0 }
 0x16d   : > { %v5595_v28 = vpop.f32.mrb[43].mxu1 }
 0x16e   : > { %v1388_v59 = vadd.f32 %v1374_v25, %v1254_v23 }
 0x171   : > { %v1245_v5 = vpop.f32.mrb[44].mxu0 }
 0x172   : > { %v1255_v6 = vadd.f32 %v1245_v5, %v1121_v63  ;;  %v1379_v29 = vpop.f32.mrb[44].mxu1  ;;  %v5570_v30 = vpop.f32.mrb[45].mxu0  ;;  %v6508_v5 = vld [vmem:[%s8185_s4 + $0x10] sm:$0xff]  }
 0x173   : > { %v1248_v31 = vpop.f32.mrb[46].mxu0  ;;  %v5598_v32 = vpop.f32.mrb[45].mxu1 }
 0x174   : > { %v1389_v33 = vadd.f32 %v1379_v29, %v1255_v6  ;;  %v5571_v34 = vpop.f32.mrb[47].mxu0  ;;  %v1382_v37 = vpop.f32.mrb[46].mxu1  ;;  %v6509_v31 = vld [vmem:[%s8185_s4 + $0x18] sm:$0xff]  }
 0x175   : > { %v5599_v38 = vpop.f32.mrb[47].mxu1  ;;  %v6511_v37 = vld [vmem:[%s8185_s4 + $0x28] sm:$0xff]  }
 0x176   : > { %v6512_v38 = vld [vmem:[%s8185_s4 + $0x30] sm:$0xff]  }
 0x181   : > { %v1497_v40 = vpop.f32.mrb[48].mxu0 }
 0x182   : > { %v1519_v35 = vadd.f32 %v1497_v40, %v1385_v13  ;;  %v5618_v41 = vpop.f32.mrb[49].mxu0  ;;  %v7287_v13 = vpop.permute.xlu0 %1558  ;;  %v6513_v40 = vld [vmem:[%s8185_s4 + $0x38] sm:$0xff]  }
 0x183   : > { %v1500_v42 = vpop.f32.mrb[50].mxu0  ;;  %v6514_v41 = vld [vmem:[%s8185_s4 + $0x80] sm:$0xff]  }
 0x184   : > { %v1531_v43 = vadd.f32 %v4633_v26, %v1519_v35  ;;  %v1520_v44 = vadd.f32 %v1500_v42, %v1386_v17  ;;  %v5619_v45 = vpop.f32.mrb[51].mxu0  ;;  %v6507_v17 = vld [vmem:[%s8185_s4 + $0x8] sm:$0xff]  }
 0x186   : > { %v7263_v46 = vmul.f32 %v7257_v39, %v1531_v43  ;;  %v1532_v36 = vadd.f32 %v4633_v26, %v1520_v44  ;;  %v6515_v44 = vld [vmem:[%s8185_s4 + $0x88] sm:$0xff]  }
 0x188   : > { %1566 = vst [vmem:[#allocation2 + $0x8] sm:$0xff] %v7263_v46  ;;  %v7271_v49 = vmul.f32 %v7265_v47, %v1532_v36  ;;  %v6516_v36 = vld [vmem:[%s8185_s4 + $0x90] sm:$0xff]  }
 0x189   : > { %v1505_v50 = vpop.f32.mrb[52].mxu0 }
 0x18a   : > { %1567 = vst [vmem:[#allocation2 + $0x10] sm:$0xff] %v7271_v49  ;;  %v1521_v51 = vadd.f32 %v1505_v50, %v1387_v24  ;;  %v5622_v53 = vpop.f32.mrb[53].mxu0 }
 0x18b   : > { %v1508_v54 = vpop.f32.mrb[54].mxu0  ;;  %v6517_v53 = vld [vmem:[%s8185_s4 + $0x98] sm:$0xff]  }
 0x18c   : > { %v1533_v1 = vadd.f32 %v4633_v26, %v1521_v51  ;;  %v1522_v55 = vadd.f32 %v1508_v54, %v1388_v59  ;;  %v5623_v56 = vpop.f32.mrb[55].mxu0 }
 0x18d   : > { %v6519_v56 = vld [vmem:[%s8185_s4 + $0xa8] sm:$0xff]  }
 0x18e   : > { %v7277_v58 = vmul.f32 %v7267_v48, %v1533_v1  ;;  %v1534_v60 = vadd.f32 %v4633_v26, %v1522_v55  ;;  %v6518_v1 = vld [vmem:[%s8185_s4 + $0xa0] sm:$0xff]  }
 0x18f   : > { %v1600_v61 = vld [vmem:[#allocation2 + $0x2] sm:$0xff] }
 0x190   : > { %1568 = vst [vmem:[#allocation2 + $0x18] sm:$0xff] %v7277_v58  ;;  %v7281_v62 = vmul.f32 %v7274_v57, %v1534_v60  ;;  %v1605_v3 = vmax.f32 %v1600_v61, 0.0  ;;  %v6520_v60 = vld [vmem:[%s8185_s4 + $0xb0] sm:$0xff]  }
 0x191   : > { %v1513_v63 = vpop.f32.mrb[56].mxu0  ;;  %v1601_v0 = vld [vmem:[#allocation2 + $0xa] sm:$0xff] }
 0x192   : > { %1569 = vst [vmem:[#allocation2 + $0x20] sm:$0xff] %v7281_v62  ;;  %v1523_v2 = vadd.f32 %v1513_v63, %v1389_v33  ;;  %v1606_v4 = vmax.f32 %v1601_v0, 0.0  ;;  %v5626_v7 = vpop.f32.mrb[57].mxu0  ;;  %v1572_v14 = vld [vmem:[#allocation2 + $0x9] sm:$0xff]  ;;  %v6510_v33 = vld [vmem:[%s8185_s4 + $0x20] sm:$0xff]   ;;  %v6521_v63 = vld [vmem:[%s8185_s4 + $0xb8] sm:$0xff]  }
 0x193   : > { %v1516_v9 = vpop.f32.mrb[58].mxu0  ;;  %v7290_v16 = vld [vmem:[#allocation2 + $0xf] sm:$0xff]  ;;  %v1577_v20 = vmax.f32 %v1572_v14, 0.0  ;;  %v1838_v0 = vld [vmem:[#allocation2 + $0x3] sm:$0xff] }
 0x194   : > { %v1535_v10 = vadd.f32 %v4633_v26, %v1523_v2  ;;  %v1610_v11 = vpack.c.bf16 %v1606_v4, %v1605_v3  ;;  %v5627_v12 = vpop.f32.mrb[59].mxu0  ;;  %v1983_v24 = vmax.f32 %v7290_v16, 0.0  ;;  %v1571_v26 = vld [vmem:[#allocation2 + $0x1] sm:$0xff]  ;;  %v1839_v61 = vld [vmem:[#allocation2 + $0xb] sm:$0xff]  ;;  %v1843_v3 = vmax.f32 %v1838_v0, 0.0 }
 0x195   : > { %v1576_v35 = vmax.f32 %v1571_v26, 0.0  ;;  %v1844_v2 = vmax.f32 %v1839_v61, 0.0  ;;  %v6522_v4 = vld [vmem:[%s8185_s4 + $0xc0] sm:$0xff]   ;;  %v6523_v9 = vld [vmem:[%s8185_s4 + $0xc8] sm:$0xff]   ;;  %v6524_v14 = vld [vmem:[%s8185_s4 + $0xd0] sm:$0xff]  }
 0x196   : > { %v1565_v15 = vmul.f32 %v7287_v13, %v1535_v10  ;;  %5645 = vmatmul.mubr.bf16.vlgmr.msra.gmra.mrb[48].mxu1 %v1610_v11  ;;  %v6532_v16 = vld [vmem:[%s8185_s4 + $0x110] sm:$0xff]   ;;  %v6535_v26 = vld [vmem:[%s8185_s4 + $0x128] sm:$0xff]  }
 0x197   : > { %5657 = vmatpush3.bf16.msra.mxu1 %v6506_v8  ;;  %5648 = vmatprep.mubr.msk.bf16.mxu1 %vm6726_vm0, %v7295_v18  ;;  %v1602_v19 = vld [vmem:[#allocation2 + $0x12] sm:$0xff]  ;;  %v1581_v42 = vpack.c.bf16 %v1577_v20, %v1576_v35  ;;  %v1848_v7 = vpack.c.bf16 %v1844_v2, %v1843_v3  ;;  %v6570_v2 = vld [vmem:[%s8186_s5] sm:$0xff]   ;;  %v6543_v3 = vld [vmem:[%s8185_s4 + $0x168] sm:$0xff]  }
 0x198   : > { %v1573_v52 = vld [vmem:[#allocation2 + $0x11] sm:$0xff]  ;;  %1570 = vst [vmem:[#allocation2 + $0x28] sm:$0xf] %v1565_v15  ;;  %5658 = vmatprep.subr.bf16.mxu1 %v7295_v18  ;;  %v1607_v27 = vmax.f32 %v1602_v19, 0.0  ;;  %5881 = vmatpush3.bf16.msra.mxu0 %v6570_v2 }
 0x199   : > { %v1578_v21 = vmax.f32 %v1573_v52, 0.0  ;;  %v7300_v22 = vld [vmem:[#allocation2 + $0x17] sm:$0xff]  ;;  %v1604_v30 = vld [vmem:[#allocation2 + $0x22] sm:$0xf]  ;;  %5882 = vmatprep.subr.bf16.mxu0 %v7295_v18 }
 0x19a   : > { %v1603_v23 = vld [vmem:[#allocation2 + $0x1a] sm:$0xff]  ;;  %v1984_v25 = vmax.f32 %v7300_v22, 0.0  ;;  %v1609_v32 = vmax.f32 %v1604_v30, 0.0  ;;  %v6536_v35 = vld [vmem:[%s8185_s4 + $0x130] sm:$0xff]  }
 0x19b   : > { %v1608_v28 = vmax.f32 %v1603_v23, 0.0  ;;  %v7304_v59 = vpack.c.bf16 %v1578_v21, %v1577_v20  ;;  %5659 = vmatpush3.bf16.msra.mxu1 %v6507_v17  ;;  %v7344_v43 = vld [vmem:[#allocation2 + $0x19] sm:$0xff]  ;;  %v1575_v51 = vld [vmem:[#allocation2 + $0x21] sm:$0xf]  ;;  %v6527_v23 = vld [vmem:[%s8185_s4 + $0xe8] sm:$0xff]  }
 0x19c   : > { %v7313_v6 = vpack.c.bf16 %v1984_v25, %v1983_v24  ;;  %5660 = vmatprep.subr.bf16.mxu1 %v7295_v18  ;;  %v1612_v34 = vpack.c.bf16 %v1609_v32, %v1609_v32  ;;  %v1579_v45 = vmax.f32 %v7344_v43, 0.0  ;;  %v1580_v54 = vmax.f32 %v1575_v51, 0.0  ;;  %v1841_v8 = vld [vmem:[#allocation2 + $0x1b] sm:$0xff]  ;;  %v1840_v10 = vld [vmem:[#allocation2 + $0x13] sm:$0xff]  ;;  %v1842_v17 = vld [vmem:[#allocation2 + $0x23] sm:$0xf] }
 0x19d   : > { %v1611_v29 = vpack.c.bf16 %v1608_v28, %v1607_v27  ;;  %v1846_v11 = vmax.f32 %v1841_v8, 0.0  ;;  %v1845_v12 = vmax.f32 %v1840_v10, 0.0  ;;  %v6525_v19 = vld [vmem:[%s8185_s4 + $0xd8] sm:$0xff]   ;;  %v1847_v52 = vmax.f32 %v1842_v17, 0.0  ;;  %v6526_v20 = vld [vmem:[%s8185_s4 + $0xe0] sm:$0xff]   ;;  %v6528_v27 = vld [vmem:[%s8185_s4 + $0xf0] sm:$0xff]  }
 0x19e   : > { %v1582_v50 = vpack.c.bf16 %v1579_v45, %v1578_v21  ;;  %v1583_v55 = vpack.c.bf16 %v1580_v54, %v1580_v54  ;;  %v6529_v28 = vld [vmem:[%s8185_s4 + $0xf8] sm:$0xff]   ;;  %v6530_v30 = vld [vmem:[%s8185_s4 + $0x100] sm:$0xff]   ;;  %v6539_v51 = vld [vmem:[%s8185_s4 + $0x148] sm:$0xff]   ;;  %v2123_v54 = vmax.f32 %v7277_v58, 0.0 }
 0x19f   : > { %5649 = vmatmul.mubr.bf16.gmra.mrb[52].mxu1 %v1611_v29  ;;  %v1849_v15 = vpack.c.bf16 %v1846_v11, %v1845_v12  ;;  %v1850_v21 = vpack.c.bf16 %v1847_v52, %v1847_v52  ;;  %v7427_v32 = vld [vmem:[#allocation2 + $0x1f] sm:$0xff]  ;;  %v6572_v8 = vld [vmem:[%s8186_s5 + $0x10] sm:$0xff]  }
 0x1a0   : > { %5661 = vmatpush3.bf16.msra.mxu1 %v6508_v5  ;;  %5652 = vmatprep.mubr.msk.bf16.mxu1 %vm6726_vm0, %v7295_v18  ;;  %v1977_v5 = vld [vmem:[#allocation2 + $0x7] sm:$0xff]  ;;  %v6573_v10 = vld [vmem:[%s8186_s5 + $0x18] sm:$0xff]  }
 0x1a1   : > { %5662 = vmatprep.subr.bf16.mxu1 %v7295_v18  ;;  %v1982_v29 = vmax.f32 %v1977_v5, 0.0  ;;  %v6534_v22 = vld [vmem:[%s8185_s4 + $0x120] sm:$0xff]   ;;  %v2395_v5 = vld [vmem:[#allocation2 + $0x15] sm:$0xff] }
 0x1a2   : > { %v6546_v11 = vld [vmem:[%s8185_s4 + $0x180] sm:$0xff]  }
 0x1a3   : > { %v6574_v12 = vld [vmem:[%s8186_s5 + $0x20] sm:$0xff]  }
 0x1a4   : > { %5663 = vmatpush3.bf16.msra.mxu1 %v6509_v31  ;;  %v1987_v31 = vpack.c.bf16 %v1983_v24, %v1982_v29  ;;  %v6550_v43 = vld [vmem:[%s8185_s4 + $0x1a0] sm:$0xff]   ;;  %v6553_v29 = vld [vmem:[%s8185_s4 + $0x1b8] sm:$0xff]  }
 0x1a5   : > { %5664 = vmatprep.subr.bf16.mxu1 %v7295_v18  ;;  %v2536_v2 = vld [vmem:[#allocation2 + $0x26] sm:$0xff] }
 0x1a7   : > { %5653 = vmatmul.mubr.bf16.gmra.mrb[56].mxu1 %v1612_v34  ;;  %v1985_v34 = vmax.f32 %v7427_v32, 0.0  ;;  %v6577_v32 = vld [vmem:[%s8186_s5 + $0x38] sm:$0xff]  }
 0x1a8   : > { %5665 = vmatpush3.bf16.msra.mxu1 %v6510_v33  ;;  %5672 = vmatprep.mubr.msk.bf16.mxu1 %vm6726_vm0, %v7295_v18  ;;  %v6531_v33 = vld [vmem:[%s8185_s4 + $0x108] sm:$0xff]  }
 0x1a9   : > { %5666 = vmatprep.subr.bf16.mxu1 %v7295_v18  ;;  %v1988_v24 = vpack.c.bf16 %v1985_v34, %v1984_v25 }
 0x1ac   : > { %5667 = vmatpush3.bf16.msra.mxu1 %v6511_v37  ;;  %v1981_v37 = vld [vmem:[#allocation2 + $0x27] sm:$0xf] }
 0x1ad   : > { %5668 = vmatprep.subr.bf16.mxu1 %v7295_v18 }
 0x1b0   : > { %5669 = vmatpush3.bf16.msra.mxu1 %v6512_v38  ;;  %v6533_v38 = vld [vmem:[%s8185_s4 + $0x118] sm:$0xff]  }
 0x1b1   : > { %5670 = vmatprep.subr.bf16.mxu1 %v7295_v18 }
 0x1b4   : > { %5671 = vmatpush3.bf16.msra.mxu1 %v6513_v40  ;;  %v1986_v40 = vmax.f32 %v1981_v37, 0.0  ;;  %v2397_v37 = vld [vmem:[#allocation2 + $0x25] sm:$0xff] }
 0x1b5   : > { %5684 = vmatprep.subr.bf16.mxu1 %v7295_v18 }
 0x1b6   : > { %v1989_v25 = vpack.c.bf16 %v1986_v40, %v1986_v40  ;;  %v2396_v40 = vld [vmem:[#allocation2 + $0x1d] sm:$0xff] }
 0x1b7   : > { %5673 = vmatmul.mubr.bf16.vlgmr.msra.gmra.mrb[48].mxu1 %v1581_v42  ;;  %v2122_v42 = vmax.f32 %v7271_v49, 0.0 }
 0x1b8   : > { %5685 = vmatpush3.bf16.msra.mxu1 %v6514_v41  ;;  %5676 = vmatprep.mubr.msk.bf16.mxu1 %vm6726_vm0, %v7295_v18  ;;  %v6537_v41 = vld [vmem:[%s8185_s4 + $0x138] sm:$0xff]  }
 0x1b9   : > { %5686 = vmatprep.subr.bf16.mxu1 %v7295_v18 }
 0x1bc   : > { %5687 = vmatpush3.bf16.msra.mxu1 %v6515_v44  ;;  %v2121_v44 = vmax.f32 %v7263_v46, 0.0 }
 0x1bd   : > { %5688 = vmatprep.subr.bf16.mxu1 %v7295_v18 }
 0x1bf   : > { %5677 = vmatmul.mubr.bf16.gmra.mrb[52].mxu1 %v1582_v50  ;;  %v2126_v50 = vpack.c.bf16 %v2122_v42, %v2121_v44  ;;  %v6557_v44 = vld [vmem:[%s8185_s4 + $0x1d8] sm:$0xff]  }
 0x1c0   : > { %5689 = vmatpush3.bf16.msra.mxu1 %v6516_v36  ;;  %5680 = vmatprep.mubr.msk.bf16.mxu1 %vm6726_vm0, %v7295_v18  ;;  %v6538_v36 = vld [vmem:[%s8185_s4 + $0x140] sm:$0xff]  }
 0x1c1   : > { %5690 = vmatprep.subr.bf16.mxu1 %v7295_v18 }
 0x1c4   : > { %5691 = vmatpush3.bf16.msra.mxu1 %v6517_v53  ;;  %v2124_v53 = vmax.f32 %v7281_v62, 0.0 }
 0x1c5   : > { %5692 = vmatprep.subr.bf16.mxu1 %v7295_v18 }
 0x1c7   : > { %5681 = vmatmul.mubr.bf16.gmra.mrb[56].mxu1 %v1583_v55  ;;  %v2127_v55 = vpack.c.bf16 %v2124_v53, %v2123_v54  ;;  %v6560_v53 = vld [vmem:[%s8185_s4 + $0x1f0] sm:$0xff]  }
 0x1c8   : > { %5693 = vmatpush3.bf16.msra.mxu1 %v6518_v1  ;;  %5700 = vmatprep.mubr.msk.bf16.mxu1 %vm6726_vm0, %v7295_v18  ;;  %v6540_v1 = vld [vmem:[%s8185_s4 + $0x150] sm:$0xff]  }
 0x1c9   : > { %5694 = vmatprep.subr.bf16.mxu1 %v7295_v18  ;;  %v2534_v54 = vld [vmem:[#allocation2 + $0x16] sm:$0xff] }
 0x1cc   : > { %5695 = vmatpush3.bf16.msra.mxu1 %v6519_v56  ;;  %v7486_v56 = vld [vmem:[#allocation2 + $0x28] sm:$0xf] }
 0x1cd   : > { %5696 = vmatprep.subr.bf16.mxu1 %v7295_v18  ;;  %v2125_v61 = vmax.f32 %v7486_v56, 0.0 }
 0x1cf   : > { %v2128_v0 = vpack.c.bf16 %v2125_v61, %v2125_v61 }
 0x1d0   : > { %5697 = vmatpush3.bf16.msra.mxu1 %v6520_v60  ;;  %v6541_v60 = vld [vmem:[%s8185_s4 + $0x158] sm:$0xff]  }
 0x1d1   : > { %5698 = vmatprep.subr.bf16.mxu1 %v7295_v18 }
 0x1d4   : > { %5699 = vmatpush3.bf16.msra.mxu1 %v6521_v63  ;;  %v6542_v63 = vld [vmem:[%s8185_s4 + $0x160] sm:$0xff]  }
 0x1d5   : > { %5712 = vmatprep.subr.bf16.mxu1 %v7295_v18 }
 0x1d7   : > { %5701 = vmatmul.mubr.bf16.vlgmr.msra.gmra.mrb[48].mxu1 %v1848_v7  ;;  %v6544_v7 = vld [vmem:[%s8185_s4 + $0x170] sm:$0xff]  }
 0x1d8   : > { %5713 = vmatpush3.bf16.msra.mxu1 %v6522_v4  ;;  %5704 = vmatprep.mubr.msk.bf16.mxu1 %vm6726_vm0, %v7295_v18  ;;  %v6571_v4 = vld [vmem:[%s8186_s5 + $0x8] sm:$0xff]  }
 0x1d9   : > { %5714 = vmatprep.subr.bf16.mxu1 %v7295_v18  ;;  %5883 = vmatpush3.bf16.msra.mxu0 %v6571_v4  ;;  %v2535_v4 = vld [vmem:[#allocation2 + $0x1e] sm:$0xff] }
 0x1da   : > { %5884 = vmatprep.subr.bf16.mxu0 %v7295_v18 }
 0x1dc   : > { %5715 = vmatpush3.bf16.msra.mxu1 %v6523_v9  ;;  %v6545_v9 = vld [vmem:[%s8185_s4 + $0x178] sm:$0xff]  }
 0x1dd   : > { %5716 = vmatprep.subr.bf16.mxu1 %v7295_v18  ;;  %5885 = vmatpush3.bf16.msra.mxu0 %v6572_v8  ;;  %v2540_v8 = vmax.f32 %v2535_v4, 0.0  ;;  %v6585_v4 = vld [vmem:[%s8187_s6 + $0x78] sm:$0xff]  }
 0x1de   : > { %5886 = vmatprep.subr.bf16.mxu0 %v7295_v18 }
 0x1df   : > { %5705 = vmatmul.mubr.bf16.gmra.mrb[52].mxu1 %v1849_v15  ;;  %v6547_v15 = vld [vmem:[%s8185_s4 + $0x188] sm:$0xff]  }
 0x1e0   : > { %5717 = vmatpush3.bf16.msra.mxu1 %v6524_v14  ;;  %5708 = vmatprep.mubr.msk.bf16.mxu1 %vm6726_vm0, %v7295_v18  ;;  %v2258_v14 = vld [vmem:[#allocation2 + $0x21] sm:$0xff] }
 0x1e1   : > { %5718 = vmatprep.subr.bf16.mxu1 %v7295_v18  ;;  %5887 = vmatpush3.bf16.msra.mxu0 %v6573_v10  ;;  %v2263_v17 = vmax.f32 %v2258_v14, 0.0  ;;  %v2537_v10 = vld [vmem:[#allocation2 + $0x2e] sm:$0xf]  ;;  %v6565_v14 = vld [vmem:[%s8185_s4 + $0x218] sm:$0xff]  }
 0x1e2   : > { %5888 = vmatprep.subr.bf16.mxu0 %v7295_v18 }
 0x1e3   : > { %v2266_v52 = vpack.c.bf16 %v2263_v17, %v1579_v45  ;;  %v6566_v17 = vld [vmem:[%s8185_s4 + $0x220] sm:$0xff]  }
 0x1e4   : > { %5719 = vmatpush3.bf16.msra.mxu1 %v6525_v19  ;;  %v6575_v19 = vld [vmem:[%s8186_s5 + $0x28] sm:$0xff]  }
 0x1e5   : > { %5720 = vmatprep.subr.bf16.mxu1 %v7295_v18  ;;  %5889 = vmatpush3.bf16.msra.mxu0 %v6574_v12  ;;  %v2542_v12 = vmax.f32 %v2537_v10, 0.0 }
 0x1e6   : > { %5890 = vmatprep.subr.bf16.mxu0 %v7295_v18 }
 0x1e7   : > { %5709 = vmatmul.mubr.bf16.gmra.mrb[56].mxu1 %v1850_v21  ;;  %v6549_v21 = vld [vmem:[%s8185_s4 + $0x198] sm:$0xff]  }
 0x1e8   : > { %5721 = vmatpush3.bf16.msra.mxu1 %v6526_v20  ;;  %5728 = vmatprep.mubr.msk.bf16.mxu1 %vm6726_vm0, %v7295_v18  ;;  %v2259_v20 = vld [vmem:[#allocation2 + $0x29] sm:$0xf] }
 0x1e9   : > { %5722 = vmatprep.subr.bf16.mxu1 %v7295_v18  ;;  %5891 = vmatpush3.bf16.msra.mxu0 %v6575_v19  ;;  %v6567_v19 = vld [vmem:[%s8185_s4 + $0x228] sm:$0xff]  }
 0x1ea   : > { %5892 = vmatprep.subr.bf16.mxu0 %v7295_v18 }
 0x1ec   : > { %5723 = vmatpush3.bf16.msra.mxu1 %v6527_v23  ;;  %v2264_v23 = vmax.f32 %v2259_v20, 0.0  ;;  %v2675_v20 = vld [vmem:[#allocation2 + $0x27] sm:$0xff] }
 0x1ed   : > { %5724 = vmatprep.subr.bf16.mxu1 %v7295_v18 }
 0x1ee   : > { %v2267_v45 = vpack.c.bf16 %v2264_v23, %v2264_v23  ;;  %v2676_v23 = vld [vmem:[#allocation2 + $0x2f] sm:$0xf] }
 0x1f0   : > { %5725 = vmatpush3.bf16.msra.mxu1 %v6528_v27  ;;  %v6551_v27 = vld [vmem:[%s8185_s4 + $0x1a8] sm:$0xff]  }
 0x1f1   : > { %5726 = vmatprep.subr.bf16.mxu1 %v7295_v18 }
 0x1f4   : > { %5727 = vmatpush3.bf16.msra.mxu1 %v6529_v28  ;;  %v6552_v28 = vld [vmem:[%s8185_s4 + $0x1b0] sm:$0xff]  }
 0x1f5   : > { %5740 = vmatprep.subr.bf16.mxu1 %v7295_v18 }
 0x1f7   : > { %5729 = vmatmul.mubr.bf16.vlgmr.msra.gmra.mrb[48].mxu1 %v1987_v31  ;;  %v2400_v31 = vmax.f32 %v2395_v5, 0.0 }
 0x1f8   : > { %5741 = vmatpush3.bf16.msra.mxu1 %v6530_v30  ;;  %5732 = vmatprep.mubr.msk.bf16.mxu1 %vm6726_vm0, %v7295_v18  ;;  %v2394_v30 = vld [vmem:[#allocation2 + $0xd] sm:$0xff] }
 0x1f9   : > { %5742 = vmatprep.subr.bf16.mxu1 %v7295_v18 }
 0x1fc   : > { %5743 = vmatpush3.bf16.msra.mxu1 %v6531_v33  ;;  %v2399_v33 = vmax.f32 %v2394_v30, 0.0 }
 0x1fd   : > { %5744 = vmatprep.subr.bf16.mxu1 %v7295_v18 }
 0x1ff   : > { %5733 = vmatmul.mubr.bf16.gmra.mrb[52].mxu1 %v1988_v24  ;;  %v2404_v24 = vpack.c.bf16 %v2400_v31, %v2399_v33 }
 0x200   : > { %5745 = vmatpush3.bf16.msra.mxu1 %v6532_v16  ;;  %5736 = vmatprep.mubr.msk.bf16.mxu1 %vm6726_vm0, %v7295_v18  ;;  %v6554_v16 = vld [vmem:[%s8185_s4 + $0x1c0] sm:$0xff]  }
 0x201   : > { %5746 = vmatprep.subr.bf16.mxu1 %v7295_v18 }
 0x204   : > { %5747 = vmatpush3.bf16.msra.mxu1 %v6533_v38  ;;  %v6555_v38 = vld [vmem:[%s8185_s4 + $0x1c8] sm:$0xff]  }
 0x205   : > { %5748 = vmatprep.subr.bf16.mxu1 %v7295_v18 }
 0x207   : > { %5737 = vmatmul.mubr.bf16.gmra.mrb[56].mxu1 %v1989_v25  ;;  %v2401_v25 = vmax.f32 %v2396_v40, 0.0 }
 0x208   : > { %5749 = vmatpush3.bf16.msra.mxu1 %v6534_v22  ;;  %5756 = vmatprep.mubr.msk.bf16.mxu1 %vm6726_vm0, %v7295_v18  ;;  %v2402_v22 = vmax.f32 %v2397_v37, 0.0 }
 0x209   : > { %5750 = vmatprep.subr.bf16.mxu1 %v7295_v18 }
 0x20c   : > { %5751 = vmatpush3.bf16.msra.mxu1 %v6535_v26  ;;  %v6556_v26 = vld [vmem:[%s8185_s4 + $0x1d0] sm:$0xff]  }
 0x20d   : > { %5752 = vmatprep.subr.bf16.mxu1 %v7295_v18 }
 0x210   : > { %5753 = vmatpush3.bf16.msra.mxu1 %v6536_v35  ;;  %v2398_v35 = vld [vmem:[#allocation2 + $0x2d] sm:$0xf] }
 0x211   : > { %5754 = vmatprep.subr.bf16.mxu1 %v7295_v18  ;;  %v2403_v42 = vmax.f32 %v2398_v35, 0.0 }
 0x214   : > { %5755 = vmatpush3.bf16.msra.mxu1 %v6537_v41  ;;  %v2405_v41 = vpack.c.bf16 %v2402_v22, %v2401_v25 }
 0x215   : > { %5768 = vmatprep.subr.bf16.mxu1 %v7295_v18 }
 0x217   : > { %5757 = vmatmul.mubr.bf16.vlgmr.msra.gmra.mrb[48].mxu1 %v2126_v50  ;;  %v6558_v50 = vld [vmem:[%s8185_s4 + $0x1e0] sm:$0xff]  }
 0x218   : > { %5769 = vmatpush3.bf16.msra.mxu1 %v6538_v36  ;;  %5760 = vmatprep.mubr.msk.bf16.mxu1 %vm6726_vm0, %v7295_v18  ;;  %v2406_v36 = vpack.c.bf16 %v2403_v42, %v2403_v42 }
 0x219   : > { %5770 = vmatprep.subr.bf16.mxu1 %v7295_v18 }
 0x21c   : > { %5771 = vmatpush3.bf16.msra.mxu1 %v6539_v51  ;;  %v6559_v51 = vld [vmem:[%s8185_s4 + $0x1e8] sm:$0xff]  }
 0x21d   : > { %5772 = vmatprep.subr.bf16.mxu1 %v7295_v18 }
 0x21f   : > { %5761 = vmatmul.mubr.bf16.gmra.mrb[52].mxu1 %v2127_v55  ;;  %v2533_v55 = vld [vmem:[#allocation2 + $0xe] sm:$0xff] }
 0x220   : > { %5773 = vmatpush3.bf16.msra.mxu1 %v6540_v1  ;;  %5764 = vmatprep.mubr.msk.bf16.mxu1 %vm6726_vm0, %v7295_v18  ;;  %v6561_v1 = vld [vmem:[%s8185_s4 + $0x1f8] sm:$0xff]   ;;  %v2538_v61 = vmax.f32 %v2533_v55, 0.0 }
 0x221   : > { %5774 = vmatprep.subr.bf16.mxu1 %v7295_v18  ;;  %v6581_v55 = vld [vmem:[%s8187_s6 + $0x58] sm:$0xff]  }
 0x224   : > { %5775 = vmatpush3.bf16.msra.mxu1 %v6541_v60  ;;  %v2539_v60 = vmax.f32 %v2534_v54, 0.0 }
 0x225   : > { %5776 = vmatprep.subr.bf16.mxu1 %v7295_v18 }
 0x227   : > { %5765 = vmatmul.mubr.bf16.gmra.mrb[56].mxu1 %v2128_v0  ;;  %v2543_v0 = vpack.c.bf16 %v2539_v60, %v2538_v61 }
 0x228   : > { %5777 = vmatpush3.bf16.msra.mxu1 %v6542_v63  ;;  %5784 = vmatprep.mubr.msk.bf16.mxu1 %vm6726_vm0, %v7295_v18  ;;  %v6562_v63 = vld [vmem:[%s8185_s4 + $0x200] sm:$0xff]  }
 0x229   : > { %5778 = vmatprep.subr.bf16.mxu1 %v7295_v18 }
 0x22c   : > { %5779 = vmatpush3.bf16.msra.mxu1 %v6543_v3  ;;  %v6563_v3 = vld [vmem:[%s8185_s4 + $0x208] sm:$0xff]  }
 0x22d   : > { %5780 = vmatprep.subr.bf16.mxu1 %v7295_v18 }
 0x230   : > { %5781 = vmatpush3.bf16.msra.mxu1 %v6544_v7  ;;  %v2541_v7 = vmax.f32 %v2536_v2, 0.0  ;;  %v6583_v2 = vld [vmem:[%s8187_s6 + $0x68] sm:$0xff]  }
 0x231   : > { %5782 = vmatprep.subr.bf16.mxu1 %v7295_v18 }
 0x234   : > { %5783 = vmatpush3.bf16.msra.mxu1 %v6545_v9  ;;  %v6564_v9 = vld [vmem:[%s8185_s4 + $0x210] sm:$0xff]  }
 0x235   : > { %5796 = vmatprep.subr.bf16.mxu1 %v7295_v18 }
 0x237   : > { %5785 = vmatmul.mubr.bf16.vlgmr.msra.gmra.mrb[48].mxu1 %v7304_v59  ;;  %v6548_v59 = vld [vmem:[%s8185_s4 + $0x190] sm:$0xff]  }
 0x238   : > { %5797 = vmatpush3.bf16.msra.mxu1 %v6546_v11  ;;  %5788 = vmatprep.mubr.msk.bf16.mxu1 %vm6726_vm0, %v7295_v18  ;;  %v2544_v11 = vpack.c.bf16 %v2541_v7, %v2540_v8 }
 0x239   : > { %5798 = vmatprep.subr.bf16.mxu1 %v7295_v18 }
 0x23c   : > { %5799 = vmatpush3.bf16.msra.mxu1 %v6547_v15  ;;  %v2545_v15 = vpack.c.bf16 %v2542_v12, %v2542_v12 }
 0x23d   : > { %5800 = vmatprep.subr.bf16.mxu1 %v7295_v18 }
 0x23f   : > { %5789 = vmatmul.mubr.bf16.gmra.mrb[52].mxu1 %v2266_v52  ;;  %v6569_v52 = vld [vmem:[%s8185_s4 + $0x238] sm:$0xff]  }
 0x240   : > { %5801 = vmatpush3.bf16.msra.mxu1 %v6548_v59  ;;  %5792 = vmatprep.mubr.msk.bf16.mxu1 %vm6726_vm0, %v7295_v18  ;;  %v6568_v59 = vld [vmem:[%s8185_s4 + $0x230] sm:$0xff]  }
 0x241   : > { %5802 = vmatprep.subr.bf16.mxu1 %v7295_v18 }
 0x244   : > { %5803 = vmatpush3.bf16.msra.mxu1 %v6549_v21  ;;  %v2680_v21 = vmax.f32 %v2675_v20, 0.0 }
 0x245   : > { %5804 = vmatprep.subr.bf16.mxu1 %v7295_v18 }
 0x247   : > { %5793 = vmatmul.mubr.bf16.gmra.mrb[56].mxu1 %v2267_v45  ;;  %v2681_v45 = vmax.f32 %v2676_v23, 0.0  ;;  %v6586_v23 = vld [vmem:[%s8187_s6] sm:$0xff]  }
 0x248   : > { %5805 = vmatpush3.bf16.msra.mxu1 %v6550_v43  ;;  %5812 = vmatprep.mubr.msk.bf16.mxu1 %vm6726_vm0, %v7295_v18  ;;  %v2683_v43 = vpack.c.bf16 %v2680_v21, %v1985_v34 }
 0x249   : > { %5806 = vmatprep.subr.bf16.mxu1 %v7295_v18 }
 0x24c   : > { %5807 = vmatpush3.bf16.msra.mxu1 %v6551_v27  ;;  %v2684_v27 = vpack.c.bf16 %v2681_v45, %v2681_v45 }
 0x24d   : > { %5808 = vmatprep.subr.bf16.mxu1 %v7295_v18 }
 0x250   : > { %5809 = vmatpush3.bf16.msra.mxu1 %v6552_v28 }
 0x251   : > { %5810 = vmatprep.subr.bf16.mxu1 %v7295_v18 }
 0x254   : > { %5811 = vmatpush3.bf16.msra.mxu1 %v6553_v29 }
 0x255   : > { %5824 = vmatprep.subr.bf16.mxu1 %v7295_v18 }
 0x257   : > { %5813 = vmatmul.mubr.bf16.vlgmr.msra.gmra.mrb[48].mxu1 %v2404_v24  ;;  %v6578_v24 = vld [vmem:[%s8187_s6 + $0x40] sm:$0xff]  }
 0x258   : > { %5825 = vmatpush3.bf16.msra.mxu1 %v6554_v16  ;;  %5816 = vmatprep.mubr.msk.bf16.mxu1 %vm6726_vm0, %v7295_v18 }
 0x259   : > { %5826 = vmatprep.subr.bf16.mxu1 %v7295_v18 }
 0x25c   : > { %5827 = vmatpush3.bf16.msra.mxu1 %v6555_v38 }
 0x25d   : > { %5828 = vmatprep.subr.bf16.mxu1 %v7295_v18 }
 0x25f   : > { %5817 = vmatmul.mubr.bf16.gmra.mrb[52].mxu1 %v2405_v41 }
 0x260   : > { %5829 = vmatpush3.bf16.msra.mxu1 %v6556_v26  ;;  %5820 = vmatprep.mubr.msk.bf16.mxu1 %vm6726_vm0, %v7295_v18  ;;  %v6579_v26 = vld [vmem:[%s8187_s6 + $0x48] sm:$0xff]  }
 0x261   : > { %5830 = vmatprep.subr.bf16.mxu1 %v7295_v18 }
 0x264   : > { %5831 = vmatpush3.bf16.msra.mxu1 %v6557_v44 }
 0x265   : > { %5832 = vmatprep.subr.bf16.mxu1 %v7295_v18 }
 0x267   : > { %5821 = vmatmul.mubr.bf16.gmra.mrb[56].mxu1 %v2406_v36  ;;  %v6580_v36 = vld [vmem:[%s8187_s6 + $0x50] sm:$0xff]  }
 0x268   : > { %5833 = vmatpush3.bf16.msra.mxu1 %v6558_v50  ;;  %5840 = vmatprep.mubr.msk.bf16.mxu1 %vm6726_vm0, %v7295_v18 }
 0x269   : > { %5834 = vmatprep.subr.bf16.mxu1 %v7295_v18 }
 0x26c   : > { %5835 = vmatpush3.bf16.msra.mxu1 %v6559_v51 }
 0x26d   : > { %5836 = vmatprep.subr.bf16.mxu1 %v7295_v18 }
 0x270   : > { %5837 = vmatpush3.bf16.msra.mxu1 %v6560_v53 }
 0x271   : > { %5838 = vmatprep.subr.bf16.mxu1 %v7295_v18 }
 0x274   : > { %5839 = vmatpush3.bf16.msra.mxu1 %v6561_v1 }
 0x275   : > { %5852 = vmatprep.subr.bf16.mxu1 %v7295_v18 }
 0x277   : > { %5841 = vmatmul.mubr.bf16.vlgmr.msra.gmra.mrb[48].mxu1 %v2543_v0  ;;  %v6582_v0 = vld [vmem:[%s8187_s6 + $0x60] sm:$0xff]  }
 0x278   : > { %5853 = vmatpush3.bf16.msra.mxu1 %v6562_v63  ;;  %5844 = vmatprep.mubr.msk.bf16.mxu1 %vm6726_vm0, %v7295_v18 }
 0x279   : > { %5854 = vmatprep.subr.bf16.mxu1 %v7295_v18 }
 0x27c   : > { %5855 = vmatpush3.bf16.msra.mxu1 %v6563_v3  ;;  %v6584_v3 = vld [vmem:[%s8187_s6 + $0x70] sm:$0xff]  }
 0x27d   : > { %5856 = vmatprep.subr.bf16.mxu1 %v7295_v18 }
 0x27f   : > { %5845 = vmatmul.mubr.bf16.gmra.mrb[52].mxu1 %v2544_v11 }
 0x280   : > { %5857 = vmatpush3.bf16.msra.mxu1 %v6564_v9  ;;  %5848 = vmatprep.mubr.msk.bf16.mxu1 %vm6726_vm0, %v7295_v18 }
 0x281   : > { %5858 = vmatprep.subr.bf16.mxu1 %v7295_v18 }
 0x284   : > { %5859 = vmatpush3.bf16.msra.mxu1 %v6565_v14 }
 0x285   : > { %5860 = vmatprep.subr.bf16.mxu1 %v7295_v18 }
 0x287   : > { %5849 = vmatmul.mubr.bf16.gmra.mrb[56].mxu1 %v2545_v15 }
 0x288   : > { %5861 = vmatpush3.bf16.msra.mxu1 %v6566_v17  ;;  %5868 = vmatprep.mubr.msk.bf16.mxu1 %vm6726_vm0, %v7295_v18 }
 0x289   : > { %5862 = vmatprep.subr.bf16.mxu1 %v7295_v18 }
 0x28c   : > { %5863 = vmatpush3.bf16.msra.mxu1 %v6567_v19 }
 0x28d   : > { %5864 = vmatprep.subr.bf16.mxu1 %v7295_v18 }
 0x290   : > { %5865 = vmatpush3.bf16.msra.mxu1 %v6568_v59 }
 0x291   : > { %5866 = vmatprep.subr.bf16.mxu1 %v7295_v18 }
 0x294   : > { %5867 = vmatpush3.bf16.msra.mxu1 %v6569_v52 }
 0x295   : > { %6160 = vmatprep.subr.bf16.mxu1 %v7295_v18 }
 0x297   : > { %5869 = vmatmul.mubr.bf16.vlgmr.msra.gmra.mrb[48].mxu1 %v7313_v6  ;;  %v6576_v6 = vld [vmem:[%s8186_s5 + $0x30] sm:$0xff]  }
 0x298   : > { %5872 = vmatprep.mubr.msk.bf16.mxu1 %vm6726_vm0, %v7295_v18  ;;  %5893 = vmatpush3.bf16.msra.mxu0 %v6576_v6 }
 0x299   : > { %5894 = vmatprep.subr.bf16.mxu0 %v7295_v18 }
 0x29c   : > { %5895 = vmatpush3.bf16.msra.mxu0 %v6577_v32 }
 0x29d   : > { %5908 = vmatprep.subr.bf16.mxu0 %v7295_v18 }
 0x29f   : > { %5873 = vmatmul.mubr.bf16.gmra.mrb[52].mxu1 %v2683_v43 }
 0x2a0   : > { %5876 = vmatprep.mubr.msk.bf16.mxu1 %vm6726_vm0, %v7295_v18 }
 0x2a7   : > { %5877 = vmatmul.mubr.bf16.gmra.mrb[56].mxu1 %v2684_v27 }
 0x2a8   : > { %6176 = vmatprep.mubr.msk.bf16.mxu1 %vm6726_vm0, %v7295_v18 }
 0x36a   : > { %v2784_v34 = vpop.f32.mrb[48].mxu1 }
 0x36b   : > { %v2811_v28 = vmax.f32 %v2784_v34, 0.0  ;;  %v5870_v5 = vpop.f32.mrb[49].mxu1  ;;  %v6587_v34 = vld [vmem:[%s8187_s6 + $0x8] sm:$0xff]  }
 0x36c   : > { %v2787_v29 = vpop.f32.mrb[50].mxu1 }
 0x36d   : > { %v2812_v30 = vmax.f32 %v2787_v29, 0.0  ;;  %v5871_v31 = vpop.f32.mrb[51].mxu1  ;;  %v2816_v33 = vmul.f32 %v2811_v28, %v7257_v39 }
 0x36f   : > { %v2817_v16 = vmul.f32 %v2812_v30, %v7265_v47 }
 0x371   : > { %v2821_v37 = vpack.c.bf16 %v2817_v16, %v2816_v33 }
 0x372   : > { %v2792_v38 = vpop.f32.mrb[52].mxu1 }
 0x373   : > { %v2813_v40 = vmax.f32 %v2792_v38, 0.0  ;;  %v5874_v22 = vpop.f32.mrb[53].mxu1  ;;  %5897 = vmatmul.mubr.bf16.vlgmr.msra.gmra.mrb[60].mxu0 %v2821_v37 }
 0x374   : > { %v2795_v25 = vpop.f32.mrb[54].mxu1  ;;  %5900 = vmatprep.mubr.msk.bf16.mxu0 %vm6726_vm0, %v7295_v18  ;;  %5909 = vmatpush3.bf16.msra.mxu0 %v6578_v24  ;;  %v6588_v22 = vld [vmem:[%s8187_s6 + $0x10] sm:$0xff]  }
 0x375   : > { %v2814_v35 = vmax.f32 %v2795_v25, 0.0  ;;  %v5875_v41 = vpop.f32.mrb[55].mxu1  ;;  %5910 = vmatprep.subr.bf16.mxu0 %v7295_v18  ;;  %v2818_v42 = vmul.f32 %v2813_v40, %v7267_v48 }
 0x376   : > { %v6589_v41 = vld [vmem:[%s8187_s6 + $0x18] sm:$0xff]  }
 0x377   : > { %v2819_v44 = vmul.f32 %v2814_v35, %v7274_v57 }
 0x378   : > { %5911 = vmatpush3.bf16.msra.mxu0 %v6579_v26 }
 0x379   : > { %v2822_v50 = vpack.c.bf16 %v2819_v44, %v2818_v42  ;;  %5912 = vmatprep.subr.bf16.mxu0 %v7295_v18  ;;  %v6590_v44 = vld [vmem:[%s8187_s6 + $0x20] sm:$0xff]  }
 0x37a   : > { %v2800_v51 = vpop.f32.mrb[56].mxu1 }
 0x37b   : > { %v2815_v53 = vmax.f32 %v2800_v51, 0.0  ;;  %v5878_v54 = vpop.f32.mrb[57].mxu1  ;;  %5901 = vmatmul.mubr.bf16.gmra.mrb[64].mxu0 %v2822_v50  ;;  %v6591_v50 = vld [vmem:[%s8187_s6 + $0x28] sm:$0xff]   ;;  %v6592_v51 = vld [vmem:[%s8187_s6 + $0x30] sm:$0xff]  }
 0x37c   : > { %v2803_v1 = vpop.f32.mrb[58].mxu1  ;;  %5904 = vmatprep.mubr.msk.bf16.mxu0 %vm6726_vm0, %v7295_v18  ;;  %5913 = vmatpush3.bf16.msra.mxu0 %v6580_v36 }
 0x37d   : > { %v2820_v60 = vmul.f32 %v2815_v53, %v7287_v13  ;;  %v5879_v61 = vpop.f32.mrb[59].mxu1  ;;  %5914 = vmatprep.subr.bf16.mxu0 %v7295_v18  ;;  %v6593_v53 = vld [vmem:[%s8187_s6 + $0x38] sm:$0xff]  }
 0x37f   : > { %v2823_v63 = vpack.c.bf16 %v2820_v60, %v2820_v60 }
 0x380   : > { %5915 = vmatpush3.bf16.msra.mxu0 %v6581_v55  ;;  %v6594_v55 = vld [vmem:[%s8187_s6 + $0x80] sm:$0xff]  }
 0x381   : > { %5916 = vmatprep.subr.bf16.mxu0 %v7295_v18 }
 0x383   : > { %5905 = vmatmul.mubr.bf16.gmra.mrb[68].mxu0 %v2823_v63  ;;  %v6595_v63 = vld [vmem:[%s8187_s6 + $0x88] sm:$0xff]  }
 0x384   : > { %5924 = vmatprep.mubr.msk.bf16.mxu0 %vm6726_vm0, %v7295_v18  ;;  %5917 = vmatpush3.bf16.msra.mxu0 %v6582_v0 }
 0x385   : > { %5918 = vmatprep.subr.bf16.mxu0 %v7295_v18 }
 0x388   : > { %5919 = vmatpush3.bf16.msra.mxu0 %v6583_v2  ;;  %v6596_v2 = vld [vmem:[%s8187_s6 + $0x90] sm:$0xff]  }
 0x389   : > { %5920 = vmatprep.subr.bf16.mxu0 %v7295_v18 }
 0x38c   : > { %5921 = vmatpush3.bf16.msra.mxu0 %v6584_v3 }
 0x38d   : > { %5922 = vmatprep.subr.bf16.mxu0 %v7295_v18 }
 0x390   : > { %5923 = vmatpush3.bf16.msra.mxu0 %v6585_v4 }
 0x391   : > { %5936 = vmatprep.subr.bf16.mxu0 %v7295_v18 }
 0x446   : > { %v2922_v7 = vpop.f32.mrb[60].mxu0 }
 0x447   : > { %v7716_v8 = vadd.f32 %v2922_v7, %v7263_v46  ;;  %v5898_v9 = vpop.f32.mrb[61].mxu0  ;;  %v6597_v7 = vld [vmem:[%s8187_s6 + $0x98] sm:$0xff]  }
 0x448   : > { %v2925_v10 = vpop.f32.mrb[62].mxu0 }
 0x449   : > { %2949 = vst [vmem:[#allocation2 + $0x8] sm:$0xff] %v7716_v8  ;;  %v7720_v11 = vadd.f32 %v2925_v10, %v7271_v49  ;;  %v5899_v12 = vpop.f32.mrb[63].mxu0  ;;  %v6598_v10 = vld [vmem:[%s8187_s6 + $0xa0] sm:$0xff]  }
 0x44b   : > { %2950 = vst [vmem:[#allocation2 + $0x10] sm:$0xff] %v7720_v11 }
 0x44e   : > { %v2930_v14 = vpop.f32.mrb[64].mxu0 }
 0x44f   : > { %v7724_v15 = vadd.f32 %v2930_v14, %v7277_v58  ;;  %v5902_v17 = vpop.f32.mrb[65].mxu0  ;;  %v7811_v14 = vld [vmem:[#allocation2] sm:$0xff] }
 0x450   : > { %v2933_v19 = vpop.f32.mrb[66].mxu0  ;;  %v2983_v59 = vld [vmem:[#allocation2 + $0x2] sm:$0xff] }
 0x451   : > { %2951 = vst [vmem:[#allocation2 + $0x18] sm:$0xff] %v7724_v15  ;;  %v7728_v46 = vadd.f32 %v2933_v19, %v7281_v62  ;;  %v5903_v52 = vpop.f32.mrb[67].mxu0  ;;  %v2988_v49 = vmax.f32 %v2983_v59, 0.0  ;;  %v2954_v54 = vld [vmem:[#allocation2 + $0x1] sm:$0xff]  ;;  %v6601_v59 = vld [vmem:[%s8187_s6 + $0xb8] sm:$0xff]  }
 0x452   : > { %v2984_v20 = vld [vmem:[#allocation2 + $0xa] sm:$0xff]  ;;  %v2959_v1 = vmax.f32 %v2954_v54, 0.0 }
 0x453   : > { %2952 = vst [vmem:[#allocation2 + $0x20] sm:$0xff] %v7728_v46  ;;  %v2989_v21 = vmax.f32 %v2984_v20, 0.0  ;;  %v2955_v45 = vld [vmem:[#allocation2 + $0x9] sm:$0xff] }
 0x454   : > { %v7735_v32 = vld [vmem:[#allocation2 + $0xf] sm:$0xff]  ;;  %v3221_v52 = vld [vmem:[#allocation2 + $0x3] sm:$0xff] }
 0x455   : > { %v2993_v58 = vpack.c.bf16 %v2989_v21, %v2988_v49  ;;  %v3366_v16 = vmax.f32 %v7735_v32, 0.0  ;;  %v6599_v17 = vld [vmem:[%s8187_s6 + $0xa8] sm:$0xff]   ;;  %v3226_v49 = vmax.f32 %v3221_v52, 0.0  ;;  %v6602_v21 = vld [vmem:[%s8187_s6 + $0xc0] sm:$0xff]   ;;  %v6612_v32 = vld [vmem:[%s8187_s6 + $0x110] sm:$0xff]  }
 0x456   : > { %v2938_v43 = vpop.f32.mrb[68].mxu0  ;;  %v3222_v19 = vld [vmem:[#allocation2 + $0xb] sm:$0xff] }
 0x457   : > { %v2948_v27 = vadd.f32 %v2938_v43, %v7486_v56  ;;  %v5906_v6 = vpop.f32.mrb[69].mxu0  ;;  %5925 = vmatmul.mubr.bf16.vlgmr.msra.gmra.mrb[72].mxu0 %v2993_v58  ;;  %v2960_v56 = vmax.f32 %v2955_v45, 0.0  ;;  %v3227_v20 = vmax.f32 %v3222_v19, 0.0  ;;  %v6603_v43 = vld [vmem:[%s8187_s6 + $0xc8] sm:$0xff]  }
 0x458   : > { %5937 = vmatpush3.bf16.msra.mxu0 %v6586_v23  ;;  %v2941_v62 = vpop.f32.mrb[70].mxu0  ;;  %5928 = vmatprep.mubr.msk.bf16.mxu0 %vm6726_vm0, %v7295_v18  ;;  %v2985_v28 = vld [vmem:[#allocation2 + $0x12] sm:$0xff]  ;;  %v6615_v54 = vld [vmem:[%s8187_s6 + $0x128] sm:$0xff]  }
 0x459   : > { %v2956_v5 = vld [vmem:[#allocation2 + $0x11] sm:$0xff]  ;;  %2953 = vst [vmem:[#allocation2 + $0x28] sm:$0xf] %v2948_v27  ;;  %v5907_v29 = vpop.f32.mrb[71].mxu0  ;;  %5938 = vmatprep.subr.bf16.mxu0 %v7295_v18  ;;  %v2990_v37 = vmax.f32 %v2985_v28, 0.0  ;;  %v2964_v60 = vpack.c.bf16 %v2960_v56, %v2959_v1  ;;  %v3231_v23 = vpack.c.bf16 %v3227_v20, %v3226_v49  ;;  %v6650_v20 = vld [vmem:[%s8188_s7] sm:$0xff]  }
 0x45a   : > { %v2961_v30 = vmax.f32 %v2956_v5, 0.0  ;;  %v7743_v31 = vld [vmem:[#allocation2 + $0x17] sm:$0xff]  ;;  %v2987_v35 = vld [vmem:[#allocation2 + $0x22] sm:$0xf]  ;;  %v6623_v49 = vld [vmem:[%s8187_s6 + $0x168] sm:$0xff]   ;;  %6161 = vmatpush3.bf16.msra.mxu1 %v6650_v20 }
 0x45b   : > { %v2986_v33 = vld [vmem:[#allocation2 + $0x1a] sm:$0xff]  ;;  %v3367_v24 = vmax.f32 %v7743_v31, 0.0  ;;  %v2992_v42 = vmax.f32 %v2987_v35, 0.0  ;;  %v6604_v62 = vld [vmem:[%s8187_s6 + $0xd0] sm:$0xff]   ;;  %v3225_v28 = vld [vmem:[#allocation2 + $0x23] sm:$0xf]  ;;  %6162 = vmatprep.subr.bf16.mxu1 %v7811_v14 }
 0x45c   : > { %v2991_v38 = vmax.f32 %v2986_v33, 0.0  ;;  %v7747_v40 = vpack.c.bf16 %v2961_v30, %v2960_v56  ;;  %5939 = vmatpush3.bf16.msra.mxu0 %v6587_v34  ;;  %v7787_v61 = vld [vmem:[#allocation2 + $0x19] sm:$0xff]  ;;  %v2958_v4 = vld [vmem:[#allocation2 + $0x21] sm:$0xf]  ;;  %v3230_v29 = vmax.f32 %v3225_v28, 0.0  ;;  %v6607_v33 = vld [vmem:[%s8187_s6 + $0xe8] sm:$0xff]  }
 0x45d   : > { %v7756_v25 = vpack.c.bf16 %v3367_v24, %v3366_v16  ;;  %5940 = vmatprep.subr.bf16.mxu0 %v7295_v18  ;;  %v2995_v36 = vpack.c.bf16 %v2992_v42, %v2992_v42  ;;  %v2962_v0 = vmax.f32 %v7787_v61, 0.0  ;;  %v2963_v9 = vmax.f32 %v2958_v4, 0.0  ;;  %v3224_v58 = vld [vmem:[#allocation2 + $0x1b] sm:$0xff]  ;;  %v3223_v45 = vld [vmem:[#allocation2 + $0x13] sm:$0xff]  ;;  %v6619_v4 = vld [vmem:[%s8187_s6 + $0x148] sm:$0xff]  }
 0x45e   : > { %v2994_v26 = vpack.c.bf16 %v2991_v38, %v2990_v37  ;;  %v3229_v27 = vmax.f32 %v3224_v58, 0.0  ;;  %v3228_v6 = vmax.f32 %v3223_v45, 0.0  ;;  %v6605_v5 = vld [vmem:[%s8187_s6 + $0xd8] sm:$0xff]   ;;  %v6606_v56 = vld [vmem:[%s8187_s6 + $0xe0] sm:$0xff]   ;;  %v6608_v37 = vld [vmem:[%s8187_s6 + $0xf0] sm:$0xff]  }
 0x45f   : > { %v2965_v3 = vpack.c.bf16 %v2962_v0, %v2961_v30  ;;  %v2966_v12 = vpack.c.bf16 %v2963_v9, %v2963_v9  ;;  %v3233_v30 = vpack.c.bf16 %v3230_v29, %v3230_v29  ;;  %v6609_v38 = vld [vmem:[%s8187_s6 + $0xf8] sm:$0xff]   ;;  %v6610_v35 = vld [vmem:[%s8187_s6 + $0x100] sm:$0xff]   ;;  %v6616_v1 = vld [vmem:[%s8187_s6 + $0x130] sm:$0xff]   ;;  %v3506_v9 = vmax.f32 %v7724_v15, 0.0 }
 0x460   : > { %5929 = vmatmul.mubr.bf16.gmra.mrb[76].mxu0 %v2994_v26  ;;  %v3232_v34 = vpack.c.bf16 %v3229_v27, %v3228_v6  ;;  %v7872_v42 = vld [vmem:[#allocation2 + $0x1f] sm:$0xff]  ;;  %v6652_v58 = vld [vmem:[%s8188_s7 + $0x10] sm:$0xff]  }
 0x461   : > { %5941 = vmatpush3.bf16.msra.mxu0 %v6588_v22  ;;  %5932 = vmatprep.mubr.msk.bf16.mxu0 %vm6726_vm0, %v7295_v18  ;;  %v3360_v22 = vld [vmem:[#allocation2 + $0x7] sm:$0xff]  ;;  %v6653_v45 = vld [vmem:[%s8188_s7 + $0x18] sm:$0xff]  }
 0x462   : > { %5942 = vmatprep.subr.bf16.mxu0 %v7295_v18  ;;  %v3365_v26 = vmax.f32 %v3360_v22, 0.0  ;;  %v6614_v31 = vld [vmem:[%s8187_s6 + $0x120] sm:$0xff]   ;;  %v3778_v22 = vld [vmem:[#allocation2 + $0x15] sm:$0xff] }
 0x463   : > { %v6626_v27 = vld [vmem:[%s8187_s6 + $0x180] sm:$0xff]  }
 0x464   : > { %v6654_v6 = vld [vmem:[%s8188_s7 + $0x20] sm:$0xff]  }
 0x465   : > { %5943 = vmatpush3.bf16.msra.mxu0 %v6589_v41  ;;  %v3370_v41 = vpack.c.bf16 %v3366_v16, %v3365_v26  ;;  %v6630_v61 = vld [vmem:[%s8187_s6 + $0x1a0] sm:$0xff]   ;;  %v6633_v26 = vld [vmem:[%s8187_s6 + $0x1b8] sm:$0xff]  }
 0x466   : > { %5944 = vmatprep.subr.bf16.mxu0 %v7295_v18  ;;  %v3919_v20 = vld [vmem:[#allocation2 + $0x26] sm:$0xff] }
 0x468   : > { %5933 = vmatmul.mubr.bf16.gmra.mrb[80].mxu0 %v2995_v36  ;;  %v3368_v36 = vmax.f32 %v7872_v42, 0.0 }
 0x469   : > { %5945 = vmatpush3.bf16.msra.mxu0 %v6590_v44  ;;  %5952 = vmatprep.mubr.msk.bf16.mxu0 %vm6726_vm0, %v7295_v18  ;;  %v6611_v44 = vld [vmem:[%s8187_s6 + $0x108] sm:$0xff]  }
 0x46a   : > { %5946 = vmatprep.subr.bf16.mxu0 %v7295_v18  ;;  %v3371_v16 = vpack.c.bf16 %v3368_v36, %v3367_v24 }
 0x46d   : > { %5947 = vmatpush3.bf16.msra.mxu0 %v6591_v50  ;;  %v3364_v50 = vld [vmem:[#allocation2 + $0x27] sm:$0xf] }
 0x46e   : > { %5948 = vmatprep.subr.bf16.mxu0 %v7295_v18 }
 0x471   : > { %5949 = vmatpush3.bf16.msra.mxu0 %v6592_v51  ;;  %v6613_v51 = vld [vmem:[%s8187_s6 + $0x118] sm:$0xff]  }
 0x472   : > { %5950 = vmatprep.subr.bf16.mxu0 %v7295_v18 }
 0x475   : > { %5951 = vmatpush3.bf16.msra.mxu0 %v6593_v53  ;;  %v3369_v53 = vmax.f32 %v3364_v50, 0.0  ;;  %v3780_v50 = vld [vmem:[#allocation2 + $0x25] sm:$0xff] }
 0x476   : > { %5964 = vmatprep.subr.bf16.mxu0 %v7295_v18 }
 0x477   : > { %v3372_v24 = vpack.c.bf16 %v3369_v53, %v3369_v53  ;;  %v3779_v53 = vld [vmem:[#allocation2 + $0x1d] sm:$0xff] }
 0x478   : > { %5953 = vmatmul.mubr.bf16.vlgmr.msra.gmra.mrb[72].mxu0 %v2964_v60  ;;  %v3505_v60 = vmax.f32 %v7720_v11, 0.0 }
 0x479   : > { %5965 = vmatpush3.bf16.msra.mxu0 %v6594_v55  ;;  %5956 = vmatprep.mubr.msk.bf16.mxu0 %vm6726_vm0, %v7295_v18  ;;  %v6617_v55 = vld [vmem:[%s8187_s6 + $0x138] sm:$0xff]  }
 0x47a   : > { %5966 = vmatprep.subr.bf16.mxu0 %v7295_v18 }
 0x47d   : > { %5967 = vmatpush3.bf16.msra.mxu0 %v6595_v63  ;;  %v3504_v63 = vmax.f32 %v7716_v8, 0.0 }
 0x47e   : > { %5968 = vmatprep.subr.bf16.mxu0 %v7295_v18 }
 0x480   : > { %5957 = vmatmul.mubr.bf16.gmra.mrb[76].mxu0 %v2965_v3  ;;  %v3509_v3 = vpack.c.bf16 %v3505_v60, %v3504_v63  ;;  %v6637_v63 = vld [vmem:[%s8187_s6 + $0x1d8] sm:$0xff]  }
 0x481   : > { %5969 = vmatpush3.bf16.msra.mxu0 %v6596_v2  ;;  %5960 = vmatprep.mubr.msk.bf16.mxu0 %vm6726_vm0, %v7295_v18  ;;  %v6618_v2 = vld [vmem:[%s8187_s6 + $0x140] sm:$0xff]  }
 0x482   : > { %5970 = vmatprep.subr.bf16.mxu0 %v7295_v18  ;;  %v6600_v18 = vld [vmem:[%s8187_s6 + $0xb0] sm:$0xff]  }
 0x485   : > { %5971 = vmatpush3.bf16.msra.mxu0 %v6597_v7  ;;  %v3507_v7 = vmax.f32 %v7728_v46, 0.0 }
 0x486   : > { %5972 = vmatprep.subr.bf16.mxu0 %v7811_v14 }
 0x488   : > { %5961 = vmatmul.mubr.bf16.gmra.mrb[80].mxu0 %v2966_v12  ;;  %v3510_v12 = vpack.c.bf16 %v3507_v7, %v3506_v9  ;;  %v6640_v7 = vld [vmem:[%s8187_s6 + $0x1f0] sm:$0xff]  }
 0x489   : > { %5973 = vmatpush3.bf16.msra.mxu0 %v6598_v10  ;;  %5980 = vmatprep.mubr.msk.bf16.mxu0 %vm6726_vm0, %v7811_v14  ;;  %v6620_v10 = vld [vmem:[%s8187_s6 + $0x150] sm:$0xff]  }
 0x48a   : > { %5974 = vmatprep.subr.bf16.mxu0 %v7811_v14  ;;  %v3917_v9 = vld [vmem:[#allocation2 + $0x16] sm:$0xff] }
 0x48d   : > { %5975 = vmatpush3.bf16.msra.mxu0 %v6599_v17  ;;  %v7931_v17 = vld [vmem:[#allocation2 + $0x28] sm:$0xf] }
 0x48e   : > { %5976 = vmatprep.subr.bf16.mxu0 %v7811_v14  ;;  %v3508_v19 = vmax.f32 %v7931_v17, 0.0 }
 0x490   : > { %v3511_v52 = vpack.c.bf16 %v3508_v19, %v3508_v19 }
 0x491   : > { %5977 = vmatpush3.bf16.msra.mxu0 %v6600_v18  ;;  %v6621_v18 = vld [vmem:[%s8187_s6 + $0x158] sm:$0xff]  }
 0x492   : > { %5978 = vmatprep.subr.bf16.mxu0 %v7811_v14 }
 0x495   : > { %5979 = vmatpush3.bf16.msra.mxu0 %v6601_v59  ;;  %v6622_v59 = vld [vmem:[%s8187_s6 + $0x160] sm:$0xff]  }
 0x496   : > { %5992 = vmatprep.subr.bf16.mxu0 %v7811_v14 }
 0x498   : > { %5981 = vmatmul.mubr.bf16.vlgmr.msra.gmra.mrb[72].mxu0 %v3231_v23  ;;  %v6624_v23 = vld [vmem:[%s8187_s6 + $0x170] sm:$0xff]  }
 0x499   : > { %5993 = vmatpush3.bf16.msra.mxu0 %v6602_v21  ;;  %5984 = vmatprep.mubr.msk.bf16.mxu0 %vm6726_vm0, %v7811_v14  ;;  %v6651_v21 = vld [vmem:[%s8188_s7 + $0x8] sm:$0xff]  }
 0x49a   : > { %5994 = vmatprep.subr.bf16.mxu0 %v7811_v14  ;;  %6163 = vmatpush3.bf16.msra.mxu1 %v6651_v21  ;;  %v3918_v21 = vld [vmem:[#allocation2 + $0x1e] sm:$0xff] }
 0x49b   : > { %6164 = vmatprep.subr.bf16.mxu1 %v7811_v14 }
 0x49d   : > { %5995 = vmatpush3.bf16.msra.mxu0 %v6603_v43  ;;  %v6625_v43 = vld [vmem:[%s8187_s6 + $0x178] sm:$0xff]  }
 0x49e   : > { %5996 = vmatprep.subr.bf16.mxu0 %v7811_v14  ;;  %6165 = vmatpush3.bf16.msra.mxu1 %v6652_v58  ;;  %v3923_v58 = vmax.f32 %v3918_v21, 0.0 }
 0x49f   : > { %6166 = vmatprep.subr.bf16.mxu1 %v7811_v14 }
 0x4a0   : > { %5985 = vmatmul.mubr.bf16.gmra.mrb[76].mxu0 %v3232_v34  ;;  %v6627_v34 = vld [vmem:[%s8187_s6 + $0x188] sm:$0xff]  }
 0x4a1   : > { %5997 = vmatpush3.bf16.msra.mxu0 %v6604_v62  ;;  %5988 = vmatprep.mubr.msk.bf16.mxu0 %vm6726_vm0, %v7811_v14  ;;  %v3641_v62 = vld [vmem:[#allocation2 + $0x21] sm:$0xff] }
 0x4a2   : > { %5998 = vmatprep.subr.bf16.mxu0 %v7811_v14  ;;  %6167 = vmatpush3.bf16.msra.mxu1 %v6653_v45  ;;  %v3646_v28 = vmax.f32 %v3641_v62, 0.0  ;;  %v3920_v45 = vld [vmem:[#allocation2 + $0x2e] sm:$0xf]  ;;  %v6645_v62 = vld [vmem:[%s8187_s6 + $0x218] sm:$0xff]  }
 0x4a3   : > { %6168 = vmatprep.subr.bf16.mxu1 %v7811_v14 }
 0x4a4   : > { %v3649_v29 = vpack.c.bf16 %v3646_v28, %v2962_v0  ;;  %v6646_v28 = vld [vmem:[%s8187_s6 + $0x220] sm:$0xff]  }
 0x4a5   : > { %5999 = vmatpush3.bf16.msra.mxu0 %v6605_v5  ;;  %v6655_v5 = vld [vmem:[%s8188_s7 + $0x28] sm:$0xff]  }
 0x4a6   : > { %6000 = vmatprep.subr.bf16.mxu0 %v7811_v14  ;;  %6169 = vmatpush3.bf16.msra.mxu1 %v6654_v6  ;;  %v3925_v6 = vmax.f32 %v3920_v45, 0.0 }
 0x4a7   : > { %6170 = vmatprep.subr.bf16.mxu1 %v7811_v14 }
 0x4a8   : > { %5989 = vmatmul.mubr.bf16.gmra.mrb[80].mxu0 %v3233_v30  ;;  %v6629_v30 = vld [vmem:[%s8187_s6 + $0x198] sm:$0xff]  }
 0x4a9   : > { %6001 = vmatpush3.bf16.msra.mxu0 %v6606_v56  ;;  %6008 = vmatprep.mubr.msk.bf16.mxu0 %vm6726_vm0, %v7811_v14  ;;  %v3642_v56 = vld [vmem:[#allocation2 + $0x29] sm:$0xf] }
 0x4aa   : > { %6002 = vmatprep.subr.bf16.mxu0 %v7811_v14  ;;  %6171 = vmatpush3.bf16.msra.mxu1 %v6655_v5  ;;  %v6647_v5 = vld [vmem:[%s8187_s6 + $0x228] sm:$0xff]  }
 0x4ab   : > { %6172 = vmatprep.subr.bf16.mxu1 %v7811_v14 }
 0x4ad   : > { %6003 = vmatpush3.bf16.msra.mxu0 %v6607_v33  ;;  %v3647_v33 = vmax.f32 %v3642_v56, 0.0  ;;  %v4058_v56 = vld [vmem:[#allocation2 + $0x27] sm:$0xff] }
 0x4ae   : > { %6004 = vmatprep.subr.bf16.mxu0 %v7811_v14 }
 0x4af   : > { %v3650_v0 = vpack.c.bf16 %v3647_v33, %v3647_v33  ;;  %v4059_v33 = vld [vmem:[#allocation2 + $0x2f] sm:$0xf] }
 0x4b1   : > { %6005 = vmatpush3.bf16.msra.mxu0 %v6608_v37  ;;  %v6631_v37 = vld [vmem:[%s8187_s6 + $0x1a8] sm:$0xff]  }
 0x4b2   : > { %6006 = vmatprep.subr.bf16.mxu0 %v7811_v14 }
 0x4b5   : > { %6007 = vmatpush3.bf16.msra.mxu0 %v6609_v38  ;;  %v6632_v38 = vld [vmem:[%s8187_s6 + $0x1b0] sm:$0xff]  }
 0x4b6   : > { %6020 = vmatprep.subr.bf16.mxu0 %v7811_v14 }
 0x4b8   : > { %6009 = vmatmul.mubr.bf16.vlgmr.msra.gmra.mrb[72].mxu0 %v3370_v41  ;;  %v3783_v41 = vmax.f32 %v3778_v22, 0.0 }
 0x4b9   : > { %6021 = vmatpush3.bf16.msra.mxu0 %v6610_v35  ;;  %6012 = vmatprep.mubr.msk.bf16.mxu0 %vm6726_vm0, %v7811_v14  ;;  %v3777_v35 = vld [vmem:[#allocation2 + $0xd] sm:$0xff] }
 0x4ba   : > { %6022 = vmatprep.subr.bf16.mxu0 %v7811_v14 }
 0x4bd   : > { %6023 = vmatpush3.bf16.msra.mxu0 %v6611_v44  ;;  %v3782_v44 = vmax.f32 %v3777_v35, 0.0 }
 0x4be   : > { %6024 = vmatprep.subr.bf16.mxu0 %v7811_v14 }
 0x4c0   : > { %6013 = vmatmul.mubr.bf16.gmra.mrb[76].mxu0 %v3371_v16  ;;  %v3787_v16 = vpack.c.bf16 %v3783_v41, %v3782_v44 }
 0x4c1   : > { %6025 = vmatpush3.bf16.msra.mxu0 %v6612_v32  ;;  %6016 = vmatprep.mubr.msk.bf16.mxu0 %vm6726_vm0, %v7811_v14  ;;  %v6634_v32 = vld [vmem:[%s8187_s6 + $0x1c0] sm:$0xff]  }
 0x4c2   : > { %6026 = vmatprep.subr.bf16.mxu0 %v7811_v14 }
 0x4c5   : > { %6027 = vmatpush3.bf16.msra.mxu0 %v6613_v51  ;;  %v6635_v51 = vld [vmem:[%s8187_s6 + $0x1c8] sm:$0xff]  }
 0x4c6   : > { %6028 = vmatprep.subr.bf16.mxu0 %v7811_v14 }
 0x4c8   : > { %6017 = vmatmul.mubr.bf16.gmra.mrb[80].mxu0 %v3372_v24  ;;  %v3784_v24 = vmax.f32 %v3779_v53, 0.0 }
 0x4c9   : > { %6029 = vmatpush3.bf16.msra.mxu0 %v6614_v31  ;;  %6036 = vmatprep.mubr.msk.bf16.mxu0 %vm6726_vm0, %v7811_v14  ;;  %v3785_v31 = vmax.f32 %v3780_v50, 0.0 }
 0x4ca   : > { %6030 = vmatprep.subr.bf16.mxu0 %v7811_v14 }
 0x4cd   : > { %6031 = vmatpush3.bf16.msra.mxu0 %v6615_v54  ;;  %v6636_v54 = vld [vmem:[%s8187_s6 + $0x1d0] sm:$0xff]  }
 0x4ce   : > { %6032 = vmatprep.subr.bf16.mxu0 %v7811_v14 }
 0x4d1   : > { %6033 = vmatpush3.bf16.msra.mxu0 %v6616_v1  ;;  %v3781_v1 = vld [vmem:[#allocation2 + $0x2d] sm:$0xf] }
 0x4d2   : > { %6034 = vmatprep.subr.bf16.mxu0 %v7811_v14  ;;  %v3786_v60 = vmax.f32 %v3781_v1, 0.0 }
 0x4d5   : > { %6035 = vmatpush3.bf16.msra.mxu0 %v6617_v55  ;;  %v3788_v55 = vpack.c.bf16 %v3785_v31, %v3784_v24 }
 0x4d6   : > { %6048 = vmatprep.subr.bf16.mxu0 %v7811_v14 }
 0x4d8   : > { %6037 = vmatmul.mubr.bf16.vlgmr.msra.gmra.mrb[72].mxu0 %v3509_v3  ;;  %v6638_v3 = vld [vmem:[%s8187_s6 + $0x1e0] sm:$0xff]  }
 0x4d9   : > { %6049 = vmatpush3.bf16.msra.mxu0 %v6618_v2  ;;  %6040 = vmatprep.mubr.msk.bf16.mxu0 %vm6726_vm0, %v7811_v14  ;;  %v3789_v2 = vpack.c.bf16 %v3786_v60, %v3786_v60 }
 0x4da   : > { %6050 = vmatprep.subr.bf16.mxu0 %v7811_v14 }
 0x4dd   : > { %6051 = vmatpush3.bf16.msra.mxu0 %v6619_v4  ;;  %v6639_v4 = vld [vmem:[%s8187_s6 + $0x1e8] sm:$0xff]  }
 0x4de   : > { %6052 = vmatprep.subr.bf16.mxu0 %v7811_v14 }
 0x4e0   : > { %6041 = vmatmul.mubr.bf16.gmra.mrb[76].mxu0 %v3510_v12  ;;  %v3916_v12 = vld [vmem:[#allocation2 + $0xe] sm:$0xff] }
 0x4e1   : > { %6053 = vmatpush3.bf16.msra.mxu0 %v6620_v10  ;;  %6044 = vmatprep.mubr.msk.bf16.mxu0 %vm6726_vm0, %v7811_v14  ;;  %v6641_v10 = vld [vmem:[%s8187_s6 + $0x1f8] sm:$0xff]   ;;  %v3921_v19 = vmax.f32 %v3916_v12, 0.0 }
 0x4e2   : > { %6054 = vmatprep.subr.bf16.mxu0 %v7811_v14 }
 0x4e5   : > { %6055 = vmatpush3.bf16.msra.mxu0 %v6621_v18  ;;  %v3922_v18 = vmax.f32 %v3917_v9, 0.0 }
 0x4e6   : > { %6056 = vmatprep.subr.bf16.mxu0 %v7811_v14 }
 0x4e8   : > { %6045 = vmatmul.mubr.bf16.gmra.mrb[80].mxu0 %v3511_v52  ;;  %v3926_v52 = vpack.c.bf16 %v3922_v18, %v3921_v19 }
 0x4e9   : > { %6057 = vmatpush3.bf16.msra.mxu0 %v6622_v59  ;;  %6064 = vmatprep.mubr.msk.bf16.mxu0 %vm6726_vm0, %v7811_v14  ;;  %v6642_v59 = vld [vmem:[%s8187_s6 + $0x200] sm:$0xff]  }
 0x4ea   : > { %6058 = vmatprep.subr.bf16.mxu0 %v7811_v14 }
 0x4ed   : > { %6059 = vmatpush3.bf16.msra.mxu0 %v6623_v49  ;;  %v6643_v49 = vld [vmem:[%s8187_s6 + $0x208] sm:$0xff]  }
 0x4ee   : > { %6060 = vmatprep.subr.bf16.mxu0 %v7811_v14 }
 0x4f1   : > { %6061 = vmatpush3.bf16.msra.mxu0 %v6624_v23  ;;  %v3924_v23 = vmax.f32 %v3919_v20, 0.0 }
 0x4f2   : > { %6062 = vmatprep.subr.bf16.mxu0 %v7811_v14 }
 0x4f5   : > { %6063 = vmatpush3.bf16.msra.mxu0 %v6625_v43  ;;  %v6644_v43 = vld [vmem:[%s8187_s6 + $0x210] sm:$0xff]  }
 0x4f6   : > { %6076 = vmatprep.subr.bf16.mxu0 %v7811_v14 }
 0x4f8   : > { %6065 = vmatmul.mubr.bf16.vlgmr.msra.gmra.mrb[72].mxu0 %v7747_v40  ;;  %v6628_v40 = vld [vmem:[%s8187_s6 + $0x190] sm:$0xff]  }
 0x4f9   : > { %6077 = vmatpush3.bf16.msra.mxu0 %v6626_v27  ;;  %6068 = vmatprep.mubr.msk.bf16.mxu0 %vm6726_vm0, %v7811_v14  ;;  %v3927_v27 = vpack.c.bf16 %v3924_v23, %v3923_v58 }
 0x4fa   : > { %6078 = vmatprep.subr.bf16.mxu0 %v7811_v14 }
 0x4fd   : > { %6079 = vmatpush3.bf16.msra.mxu0 %v6627_v34  ;;  %v3928_v34 = vpack.c.bf16 %v3925_v6, %v3925_v6 }
 0x4fe   : > { %6080 = vmatprep.subr.bf16.mxu0 %v7811_v14 }
 0x500   : > { %6069 = vmatmul.mubr.bf16.gmra.mrb[76].mxu0 %v3649_v29  ;;  %v6649_v29 = vld [vmem:[%s8187_s6 + $0x238] sm:$0xff]  }
 0x501   : > { %6081 = vmatpush3.bf16.msra.mxu0 %v6628_v40  ;;  %6072 = vmatprep.mubr.msk.bf16.mxu0 %vm6726_vm0, %v7811_v14  ;;  %v6648_v40 = vld [vmem:[%s8187_s6 + $0x230] sm:$0xff]  }
 0x502   : > { %6082 = vmatprep.subr.bf16.mxu0 %v7811_v14 }
 0x505   : > { %6083 = vmatpush3.bf16.msra.mxu0 %v6629_v30  ;;  %v4063_v30 = vmax.f32 %v4058_v56, 0.0 }
 0x506   : > { %6084 = vmatprep.subr.bf16.mxu0 %v7811_v14 }
 0x508   : > { %6073 = vmatmul.mubr.bf16.gmra.mrb[80].mxu0 %v3650_v0  ;;  %v4064_v0 = vmax.f32 %v4059_v33, 0.0 }
 0x509   : > { %6085 = vmatpush3.bf16.msra.mxu0 %v6630_v61  ;;  %6092 = vmatprep.mubr.msk.bf16.mxu0 %vm6726_vm0, %v7811_v14  ;;  %v4066_v61 = vpack.c.bf16 %v4063_v30, %v3368_v36 }
 0x50a   : > { %6086 = vmatprep.subr.bf16.mxu0 %v7811_v14 }
 0x50d   : > { %6087 = vmatpush3.bf16.msra.mxu0 %v6631_v37  ;;  %v4067_v37 = vpack.c.bf16 %v4064_v0, %v4064_v0 }
 0x50e   : > { %6088 = vmatprep.subr.bf16.mxu0 %v7811_v14 }
 0x511   : > { %6089 = vmatpush3.bf16.msra.mxu0 %v6632_v38  ;;  %v6656_v38 = vld [vmem:[%s8188_s7 + $0x30] sm:$0xff]  }
 0x512   : > { %6090 = vmatprep.subr.bf16.mxu0 %v7811_v14  ;;  %6173 = vmatpush3.bf16.msra.mxu1 %v6656_v38 }
 0x513   : > { %6174 = vmatprep.subr.bf16.mxu1 %v7811_v14 }
 0x515   : > { %6091 = vmatpush3.bf16.msra.mxu0 %v6633_v26 }
 0x516   : > { %6104 = vmatprep.subr.bf16.mxu0 %v7811_v14 }
 0x518   : > { %6093 = vmatmul.mubr.bf16.vlgmr.msra.gmra.mrb[72].mxu0 %v3787_v16 }
 0x519   : > { %6105 = vmatpush3.bf16.msra.mxu0 %v6634_v32  ;;  %6096 = vmatprep.mubr.msk.bf16.mxu0 %vm6726_vm0, %v7811_v14 }
 0x51a   : > { %6106 = vmatprep.subr.bf16.mxu0 %v7811_v14 }
 0x51d   : > { %6107 = vmatpush3.bf16.msra.mxu0 %v6635_v51 }
 0x51e   : > { %6108 = vmatprep.subr.bf16.mxu0 %v7811_v14 }
 0x520   : > { %6097 = vmatmul.mubr.bf16.gmra.mrb[76].mxu0 %v3788_v55 }
 0x521   : > { %6109 = vmatpush3.bf16.msra.mxu0 %v6636_v54  ;;  %6100 = vmatprep.mubr.msk.bf16.mxu0 %vm6726_vm0, %v7811_v14 }
 0x522   : > { %6110 = vmatprep.subr.bf16.mxu0 %v7811_v14 }
 0x525   : > { %6111 = vmatpush3.bf16.msra.mxu0 %v6637_v63 }
 0x526   : > { %6112 = vmatprep.subr.bf16.mxu0 %v7811_v14 }
 0x528   : > { %6101 = vmatmul.mubr.bf16.gmra.mrb[80].mxu0 %v3789_v2 }
 0x529   : > { %6113 = vmatpush3.bf16.msra.mxu0 %v6638_v3  ;;  %6120 = vmatprep.mubr.msk.bf16.mxu0 %vm6726_vm0, %v7811_v14 }
 0x52a   : > { %6114 = vmatprep.subr.bf16.mxu0 %v7811_v14 }
 0x52d   : > { %6115 = vmatpush3.bf16.msra.mxu0 %v6639_v4 }
 0x52e   : > { %6116 = vmatprep.subr.bf16.mxu0 %v7811_v14 }
 0x531   : > { %6117 = vmatpush3.bf16.msra.mxu0 %v6640_v7 }
 0x532   : > { %6118 = vmatprep.subr.bf16.mxu0 %v7811_v14 }
 0x535   : > { %6119 = vmatpush3.bf16.msra.mxu0 %v6641_v10 }
 0x536   : > { %6132 = vmatprep.subr.bf16.mxu0 %v7811_v14 }
 0x538   : > { %6121 = vmatmul.mubr.bf16.vlgmr.msra.gmra.mrb[72].mxu0 %v3926_v52 }
 0x539   : > { %6133 = vmatpush3.bf16.msra.mxu0 %v6642_v59  ;;  %6124 = vmatprep.mubr.msk.bf16.mxu0 %vm6726_vm0, %v7811_v14 }
 0x53a   : > { %6134 = vmatprep.subr.bf16.mxu0 %v7811_v14 }
 0x53d   : > { %6135 = vmatpush3.bf16.msra.mxu0 %v6643_v49 }
 0x53e   : > { %6136 = vmatprep.subr.bf16.mxu0 %v7811_v14 }
 0x540   : > { %6125 = vmatmul.mubr.bf16.gmra.mrb[76].mxu0 %v3927_v27 }
 0x541   : > { %6137 = vmatpush3.bf16.msra.mxu0 %v6644_v43  ;;  %6128 = vmatprep.mubr.msk.bf16.mxu0 %vm6726_vm0, %v7811_v14 }
 0x542   : > { %6138 = vmatprep.subr.bf16.mxu0 %v7811_v14 }
 0x545   : > { %6139 = vmatpush3.bf16.msra.mxu0 %v6645_v62 }
 0x546   : > { %6140 = vmatprep.subr.bf16.mxu0 %v7811_v14 }
 0x548   : > { %6129 = vmatmul.mubr.bf16.gmra.mrb[80].mxu0 %v3928_v34 }
 0x549   : > { %6141 = vmatpush3.bf16.msra.mxu0 %v6646_v28  ;;  %6148 = vmatprep.mubr.msk.bf16.mxu0 %vm6726_vm0, %v7811_v14 }
 0x54a   : > { %6142 = vmatprep.subr.bf16.mxu0 %v7811_v14 }
 0x54d   : > { %6143 = vmatpush3.bf16.msra.mxu0 %v6647_v5 }
 0x54e   : > { %6144 = vmatprep.subr.bf16.mxu0 %v7811_v14 }
 0x551   : > { %6145 = vmatpush3.bf16.msra.mxu0 %v6648_v40 }
 0x552   : > { %6146 = vmatprep.subr.bf16.mxu0 %v7811_v14 }
 0x555   : > { %6147 = vmatpush3.bf16.msra.mxu0 %v6649_v29 }
 0x558   : > { %6149 = vmatmul.mubr.bf16.vlgmr.msra.gmra.mrb[72].mxu0 %v7756_v25  ;;  %v6657_v25 = vld [vmem:[%s8188_s7 + $0x38] sm:$0xff]  }
 0x559   : > { %6152 = vmatprep.mubr.msk.bf16.mxu0 %vm6726_vm0, %v7811_v14  ;;  %6175 = vmatpush3.bf16.msra.mxu1 %v6657_v25 }
 0x560   : > { %6153 = vmatmul.mubr.bf16.gmra.mrb[76].mxu0 %v4066_v61 }
 0x561   : > { %6156 = vmatprep.mubr.msk.bf16.mxu0 %vm6726_vm0, %v7811_v14 }
 0x568   : > { %6157 = vmatmul.mubr.bf16.gmra.mrb[80].mxu0 %v4067_v37 }
 0x62b   : > { %v4167_v42 = vpop.f32.mrb[72].mxu0 }
 0x62c   : > { %v4194_v36 = vmax.f32 %v4167_v42, 0.0  ;;  %v6150_v22 = vpop.f32.mrb[73].mxu0 }
 0x62d   : > { %v4170_v26 = vpop.f32.mrb[74].mxu0 }
 0x62e   : > { %v4195_v35 = vmax.f32 %v4170_v26, 0.0  ;;  %v6151_v41 = vpop.f32.mrb[75].mxu0  ;;  %v4199_v44 = vmul.f32 %v4194_v36, %v7257_v39 }
 0x630   : > { %v4200_v32 = vmul.f32 %v4195_v35, %v7265_v47 }
 0x632   : > { %v4204_v16 = vpack.c.bf16 %v4200_v32, %v4199_v44 }
 0x633   : > { %v4175_v50 = vpop.f32.mrb[76].mxu0 }
 0x634   : > { %v4196_v51 = vmax.f32 %v4175_v50, 0.0  ;;  %v6154_v53 = vpop.f32.mrb[77].mxu0  ;;  %6177 = vmatmul.mubr.bf16.vlgmr.msra.gmra.mrb[60].mxu1 %v4204_v16 }
 0x635   : > { %v4178_v31 = vpop.f32.mrb[78].mxu0  ;;  %6180 = vmatprep.mubr.msk.bf16.mxu1 %vm6726_vm0, %v7811_v14 }
 0x636   : > { %v4197_v24 = vmax.f32 %v4178_v31, 0.0  ;;  %v6155_v54 = vpop.f32.mrb[79].mxu0  ;;  %v4201_v1 = vmul.f32 %v4196_v51, %v7267_v48 }
 0x638   : > { %v4202_v55 = vmul.f32 %v4197_v24, %v7274_v57 }
 0x63a   : > { %v4205_v60 = vpack.c.bf16 %v4202_v55, %v4201_v1 }
 0x63b   : > { %v4183_v63 = vpop.f32.mrb[80].mxu0 }
 0x63c   : > { %v4198_v39 = vmax.f32 %v4183_v63, 0.0  ;;  %v6158_v2 = vpop.f32.mrb[81].mxu0  ;;  %6181 = vmatmul.mubr.bf16.gmra.mrb[64].mxu1 %v4205_v60 }
 0x63d   : > { %v4186_v47 = vpop.f32.mrb[82].mxu0  ;;  %6184 = vmatprep.mubr.msk.bf16.mxu1 %vm6726_vm0, %v7811_v14 }
 0x63e   : > { %v4203_v3 = vmul.f32 %v4198_v39, %v7287_v13  ;;  %v6159_v4 = vpop.f32.mrb[83].mxu0 }
 0x640   : > { %v4206_v7 = vpack.c.bf16 %v4203_v3, %v4203_v3 }
 0x644   : > { %6185 = vmatmul.mubr.bf16.gmra.mrb[68].mxu1 %v4206_v7 }
 0x707   : > { %v4305_v9 = vpop.f32.mrb[60].mxu1 }
 0x708   : > { %v4327_v48 = vadd.f32 %v4305_v9, %v7716_v8  ;;  %v6178_v57 = vpop.f32.mrb[61].mxu1 }
 0x709   : > { %v4308_v10 = vpop.f32.mrb[62].mxu1 }
 0x70a   : > { %v4332_v12 = vmax.f32 %v4327_v48, 0.0  ;;  %v4328_v18 = vadd.f32 %v4308_v10, %v7720_v11  ;;  %v6179_v19 = vpop.f32.mrb[63].mxu1 }
 0x70c   : > { %4337 = vst [vmem:[#allocation2 + $0x8] sm:$0xff] %v4332_v12  ;;  %v4333_v59 = vmax.f32 %v4328_v18, 0.0 }
 0x70e   : > { %4338 = vst [vmem:[#allocation2 + $0x10] sm:$0xff] %v4333_v59 }
 0x70f   : > { %v4313_v14 = vpop.f32.mrb[64].mxu1 }
 0x710   : > { %v4329_v13 = vadd.f32 %v4313_v14, %v7724_v15  ;;  %v6182_v52 = vpop.f32.mrb[65].mxu1 }
 0x711   : > { %v4316_v20 = vpop.f32.mrb[66].mxu1 }
 0x712   : > { %v4334_v49 = vmax.f32 %v4329_v13, 0.0  ;;  %v4330_v8 = vadd.f32 %v4316_v20, %v7728_v46  ;;  %v6183_v21 = vpop.f32.mrb[67].mxu1 }
 0x714   : > { %4339 = vst [vmem:[#allocation2 + $0x18] sm:$0xff] %v4334_v49  ;;  %v4335_v23 = vmax.f32 %v4330_v8, 0.0 }
 0x715   : > { %v4342_v11 = vld [vmem:[#allocation2 + $0xf] sm:$0xf] }
 0x716   : > { %4340 = vst [vmem:[#allocation2 + $0x20] sm:$0xff] %v4335_v23  ;;  %4343 = vst [vmem:[%s298_s19] sm:$0xf] %v4342_v11 }
 0x717   : > { %v4321_v58 = vpop.f32.mrb[68].mxu1 }
 0x718   : > { %v4331_v43 = vadd.f32 %v4321_v58, %v7931_v17  ;;  %v6186_v15 = vpop.f32.mrb[69].mxu1 }
 0x719   : > { %v4324_v45 = vpop.f32.mrb[70].mxu1 }
 0x71a   : > { %v4336_v27 = vmax.f32 %v4331_v43, 0.0  ;;  %v6187_v6 = vpop.f32.mrb[71].mxu1 }
 0x71b   : > { %v4344_v62 = vld [vmem:[#allocation2 + $0x15] sm:$0xf]  ;;  %v4346_v46 = vld [vmem:[#allocation2 + $0x1b] sm:$0xf] }
 0x71c   : > { %4341 = vst [vmem:[#allocation2 + $0x28] sm:$0xf] %v4336_v27  ;;  %4345 = vst [vmem:[%s298_s19 + $0x4] sm:$0xf] %v4344_v62 }
 0x71d   : > { %4347 = vst [vmem:[%s298_s19 + $0x8] sm:$0xf] %v4346_v46  ;;  %v4348_v17 = vld [vmem:[#allocation2 + $0x21] sm:$0xf] }
 0x71e   : > { %4349 = vst [vmem:[%s298_s19 + $0xc] sm:$0xf] %v4348_v17 }
 0x71f   : > { %6674 = shalt.err (!%p6671_p3)
}
 0x720   : > { %s6675_s13 = scalar_lea.hbm %s8134_s25, 256  ;;  %s6679_s19 = scalar_lea.hbm %s8189_s8, 512 }
 0x721   : > { %p6676_p4 = scmp.ne.s32.totalorder %s8134_s25, %s6675_s13  ;;  %p6680_p9 = scmp.lt.u32.totalorder %s8134_s25, %s8189_s8 }
 0x722   : > { %p6681_p10 = scmp.lt.u32.totalorder %s6679_s19, %s6675_s13  ;;  %p6683_p12 = scmp.lt.u32.totalorder %s6675_s13, %s8134_s25 }
 0x723   : > { %p6677_p7 = pnand %p6676_p4, %p6814_p5 }
 0x724   : > { %p6682_p11 = por %p6681_p10, %p6680_p9 }
 0x725   : > { %p6678_p8 = pneg %p6677_p7 }
 0x726   : > { %p6684_p13 = por %p6683_p12, %p6682_p11 }
 0x728   : > { %p6685_p0 = pnand %p6684_p13, %p6678_p8 }
 0x72a   : > { %6688 = shalt.err (!%p6685_p0)
}
 0x72b   : > { %s6729_s23 = smov 128   ;;  %s6730_s26 = smov 8  }
 0x72c   : > { %6380 = dma.vmem_to_hbm [thread:$0]  (%p6814_p5), %s8136_s21, 256, %s8134_s25, %s8140_s9, %s6729_s23, %s6729_s23, %s6730_s26  }
 0x72d PF: > { %p6386_p1 = scmp.ge.s32.totalorder %s6723_s30, 2  ;;  %s4379_s10 = sand.u32 1, %s6711_s27  }
 0x72e   : > { %s4380_s12 = scalar_lea.sflag [#allocation4], %s4379_s10 }
 0x72f   : > { %p6383_p2 = pnand %p6386_p1, %p6818_p6 }
 0x731   : > { %6706 = dma.done.wait (!%p6383_p2), %s4380_s12, 256  }
 0x732   : > { %6708 = vsyncadd (!%p6383_p2), %s4380_s12, 4294967040  ;;  %p18_p3 = scmp.ge.s32.totalorder %s6801_s11, 4   ;;  %s8192_s27 = smov %s6715_s28 }
 0x733   : > { %s8193_s28 = smov %s6719_s29  ;;  %s8194_s29 = smov %s6812_s14 }
 0x734   : > { %s8195_s30 = smov %s6801_s11  ;;  %20 = sbr.rel (!%p18_p3) target bundleno = 3 (0x3), region = 111 }
 0x73b   :  { %4385 = vsyncpa [#allocation4], 1 }
 0x73c   :  { %4387 = vsyncpa [#allocation4 + $0x1], 1 }

</bundles_post_ra>
